<compile_context>
chip_gen: v7x
topology: tpu7x:2x2x1
jax: 0.10.0
libtpu: 0.0.40
codegen_flags: <defaults>
</compile_context>

<pallas_src>
import math
from functools import partial

import jax
import jax.numpy as jnp
from jax import lax
from jax.experimental import pallas as pl
from jax.experimental.pallas import tpu as pltpu


def _round_up(x, m):
    return (x + m - 1) // m * m


def _make_fused_kernel(K1, T2, Wb, CP, Dp, Mp, CH1, NC1, CH2, NC2):
    """Fused conv5x5+PReLU -> packed sub-pixel transposed-conv kernel.

    Refs (in order):
      x_ref    : (CP, Lx)        fp32 input tile, channels padded to CP=8,
                                 flattened zero-padded spatial positions (lanes)
      mask_ref : (1, Ly_alloc)   fp32 validity mask of the conv1 output tile
      w1_ref   : (Dp, KX=25*CP)  fp32 conv1 weights, im2col layout
      b1_ref   : (Dp, 1)         fp32 conv1 bias
      a1_ref   : (Dp, 1)         fp32 PReLU slopes
      w2_ref   : (T2, Mp, KY)    bf16 packed deconv weights, tw folded into K
      b2_ref   : (Mp, 1)         fp32 packed deconv bias
      o_ref    : (Mp, Lout_alloc) fp32 packed output tile (lane-dense)
      y_ref    : (Dp, Ly_alloc)  bf16 scratch: 60-ch intermediate (padded to 64)
      xcol_ref : (KX, CH1)       fp32 scratch: stage-1 im2col chunk
      ycol_ref : (KY, CH2)       bf16 scratch: stage-2 im2col chunk
    """

    def kernel(x_ref, mask_ref, w1_ref, b1_ref, a1_ref, w2_ref, b2_ref,
               o_ref, y_ref, xcol_ref, ycol_ref):
        w1 = w1_ref[...]
        b1 = b1_ref[...]
        a1 = a1_ref[...]

        # ---- stage 1: 5x5 conv as ONE K=200 im2col dot per 128-aligned chunk ----
        for c in range(NC1):
            c0 = c * CH1
            for kh in range(K1):
                for kw in range(K1):
                    tap = kh * K1 + kw
                    off = kh * Wb + kw + c0
                    # aligned 8-sublane slab store of a lane-shifted input slice
                    xcol_ref[tap * CP:(tap + 1) * CP, :] = x_ref[:, off:off + CH1]
            acc = jnp.dot(w1, xcol_ref[...], preferred_element_type=jnp.float32)
            acc = acc + b1
            acc = jnp.where(acc > 0, acc, a1 * acc)          # PReLU (fp32)
            acc = acc * mask_ref[:, c0:c0 + CH1]             # zero outside HxW
            y_ref[:, c0:c0 + CH1] = acc.astype(y_ref.dtype)  # single bf16 store

        # ---- stage 2: ConvTranspose as packed sub-pixel phases; tw folded into K:
        # per chunk, 5 dots (Mp, KY=320)@(KY, CH2) accumulated in registers. ----
        b2 = b2_ref[...]
        for c in range(NC2):
            c0 = c * CH2
            acc = jnp.zeros((Mp, CH2), jnp.float32)
            for th in range(T2):
                for tw in range(T2):
                    off = th * Wb + tw + c0
                    ycol_ref[tw * Dp:(tw + 1) * Dp, :] = y_ref[:, off:off + CH2]
                acc = acc + jnp.dot(w2_ref[th], ycol_ref[...],
                                    preferred_element_type=jnp.float32)
            o_ref[:, c0:c0 + CH2] = acc + b2                 # single fp32 store

    return kernel


@partial(jax.jit, static_argnames=("scale", "tile_rows", "lane_chunk"))
def fsrcnn_forward(x_nchw, params, *, scale=2, tile_rows=16, lane_chunk=1024):
    """forward(): Conv2d(C,d,5,pad=2)+PReLU(d) -> ConvTranspose2d(d,C,9,s,p=4,op=s-1)."""
    w1, b1, a1, wT, bT = params
    N, Cin, H, W = x_nchw.shape
    D = w1.shape[0]
    Cout = wT.shape[1]
    K1 = w1.shape[2]                       # 5
    K2 = wT.shape[2]                       # 9
    P2 = 4                                 # fixed by the module
    s = scale
    h1 = (K1 - 1) // 2                     # conv1 padding (=2)

    # Sub-pixel tap window of the transposed conv over the undilated input.
    dlo = min(-((-(r + P2 - K2 + 1)) // s) for r in range(s))   # = -2
    dhi = max((r + P2) // s for r in range(s))                  # = +2
    T2 = dhi - dlo + 1                     # 5 taps per spatial dim
    M0 = s * s * Cout                      # packed output channels (phases*Cout)

    # Sublane-aligned padded sizes.
    CP = _round_up(Cin, 8)                 # 3 -> 8
    Dp = _round_up(D, 8)                   # 60 -> 64
    Mp = _round_up(M0, 8)                  # 12 -> 16
    KX = K1 * K1 * CP                      # 200
    KY = T2 * Dp                           # 320

    TH = int(tile_rows)
    T = -(-H // TH)                        # number of row tiles
    pad0 = h1 - dlo                        # top/left input halo (=4)
    Wb = _round_up(W + max(2 * h1 - dlo, T2 - 1), 8)   # padded flat row width
    Rey = TH + T2 - 1                      # intermediate rows per tile (+halo)
    Rex = Rey + K1 - 1                     # input rows per tile (+halo)
    Ly = Rey * Wb

    # Lane-chunked geometry: all chunk sizes / allocations are multiples of 128.
    CHMAX = max(128, _round_up(int(lane_chunk), 128))
    Lout = TH * Wb                         # multiple of 128 (TH=16, Wb%8==0)
    CH2 = min(CHMAX, _round_up(Lout, 128))
    NC2 = -(-Lout // CH2)
    Lout_alloc = NC2 * CH2
    halo2 = (T2 - 1) * (Wb + 1)
    Ly_need = Lout_alloc + halo2
    CH1 = min(CHMAX, _round_up(Ly_need, 128))
    NC1 = -(-Ly_need // CH1)
    Ly_alloc = NC1 * CH1
    halo1 = (K1 - 1) * (Wb + 1)
    Lx = _round_up(Ly_alloc + halo1, 128)

    # -------- per-tile, lane-dense (channels x flat-positions) inputs --------
    xf = x_nchw.astype(jnp.float32)
    xpad = jnp.pad(
        xf, ((0, 0), (0, CP - Cin),
             (pad0, T * TH - H + pad0),
             (pad0, Wb - W - pad0)))                         # (N, CP, rows, Wb)

    row_idx = jnp.arange(T)[:, None] * TH + jnp.arange(Rex)[None, :]
    xw = xpad[:, :, row_idx, :]                              # (N, CP, T, Rex, Wb)
    xw = jnp.transpose(xw, (0, 2, 1, 3, 4)).reshape(N, T, CP, Rex * Wb)
    xw = jnp.pad(xw, ((0, 0), (0, 0), (0, 0), (0, Lx - Rex * Wb)))

    # Validity mask of the conv1 output (true inside HxW, zero elsewhere/tail).
    yrow = jnp.arange(T)[:, None] * TH + dlo + jnp.arange(Rey)[None, :]
    rv = (yrow >= 0) & (yrow < H)                            # (T, Rey)
    ycol = dlo + jnp.arange(Wb)
    cv = (ycol >= 0) & (ycol < W)                            # (Wb,)
    mask = (rv[:, :, None] & cv[None, None, :]).astype(jnp.float32)
    mask = mask.reshape(T, 1, Ly)
    mask = jnp.pad(mask, ((0, 0), (0, 0), (0, Ly_alloc - Ly)))

    # conv1 weights as one (Dp, KX) im2col matrix (tap-major, channel-minor).
    w1t = jnp.transpose(w1.astype(jnp.float32), (0, 2, 3, 1))      # (D,K1,K1,Cin)
    w1t = jnp.pad(w1t, ((0, Dp - D), (0, 0), (0, 0), (0, CP - Cin)))
    w1p = w1t.reshape(Dp, KX)
    b1c = jnp.pad(b1.astype(jnp.float32), (0, Dp - D)).reshape(Dp, 1)
    a1c = jnp.pad(a1.astype(jnp.float32), (0, Dp - D)).reshape(Dp, 1)

    # Packed sub-pixel transposed-conv weights, tw tap axis folded into K (bf16).
    taps = jnp.arange(T2)
    ph = jnp.arange(s)
    kh = ph[None, :] + P2 - s * (dlo + taps[:, None])              # (T2, s)
    vh = (kh >= 0) & (kh < K2)
    khc = jnp.clip(kh, 0, K2 - 1)
    g = wT.astype(jnp.float32)[:, :, khc[:, :, None, None], khc[None, None, :, :]]
    val = (vh[:, :, None, None] & vh[None, None, :, :]).astype(jnp.float32)
    g = g * val[None, None]                                        # (D,Cout,T2,s,T2,s)
    w2p = jnp.transpose(g, (2, 4, 3, 5, 1, 0)).reshape(T2, T2, M0, D)
    w2p = jnp.pad(w2p, ((0, 0), (0, 0), (0, Mp - M0), (0, Dp - D)))
    w2k = jnp.transpose(w2p, (0, 2, 1, 3)).reshape(T2, Mp, KY).astype(jnp.bfloat16)
    b2c = jnp.concatenate(
        [jnp.tile(bT.astype(jnp.float32), s * s),
         jnp.zeros((Mp - M0,), jnp.float32)]).reshape(Mp, 1)

    # -------- fused Pallas kernel --------
    kernel = _make_fused_kernel(K1, T2, Wb, CP, Dp, Mp, CH1, NC1, CH2, NC2)
    out = pl.pallas_call(
        kernel,
        out_shape=jax.ShapeDtypeStruct((N, T, Mp, Lout_alloc), jnp.float32),
        grid=(N, T),
        in_specs=[
            pl.BlockSpec((None, None, CP, Lx), lambda n, t: (n, t, 0, 0)),
            pl.BlockSpec((None, 1, Ly_alloc), lambda n, t: (t, 0, 0)),
            pl.BlockSpec((Dp, KX), lambda n, t: (0, 0)),
            pl.BlockSpec((Dp, 1), lambda n, t: (0, 0)),
            pl.BlockSpec((Dp, 1), lambda n, t: (0, 0)),
            pl.BlockSpec((T2, Mp, KY), lambda n, t: (0, 0, 0)),
            pl.BlockSpec((Mp, 1), lambda n, t: (0, 0)),
        ],
        out_specs=pl.BlockSpec((None, None, Mp, Lout_alloc),
                               lambda n, t: (n, t, 0, 0)),
        scratch_shapes=[
            pltpu.VMEM((Dp, Ly_alloc), jnp.bfloat16),   # 60-ch intermediate
            pltpu.VMEM((KX, CH1), jnp.float32),         # stage-1 im2col chunk
            pltpu.VMEM((KY, CH2), jnp.bfloat16),        # stage-2 im2col chunk
        ],
        compiler_params=pltpu.CompilerParams(
            dimension_semantics=("parallel", "parallel"),
            vmem_limit_bytes=48 * 1024 * 1024),
    )(xw, mask, w1p, b1c, a1c, w2k, b2c)

    # -------- depth-to-space + crop: (N,T,(r,c,co),TH*Wb) -> (N,Cout,H*s,W*s) --------
    o = out[:, :, :M0, :Lout]
    o = o.reshape(N, T, s, s, Cout, TH, Wb)[..., :W]         # (n,t,r,c,co,i,g)
    o = jnp.transpose(o, (0, 4, 1, 5, 2, 6, 3))              # (n,co,t,i,r,g,c)
    o = o.reshape(N, Cout, T * TH * s, W * s)
    return o[:, :, :H * s, :]


def fsrcnn_ref(x_nchw, params, *, scale=2):
    """Pure-JAX reference (lax convolutions) for correctness checking."""
    w1, b1, a1, wT, bT = params
    x = jnp.transpose(x_nchw, (0, 2, 3, 1)).astype(jnp.float32)
    w1_hwio = jnp.transpose(w1, (2, 3, 1, 0))
    y = lax.conv_general_dilated(
        x, w1_hwio, (1, 1), ((2, 2), (2, 2)),
        dimension_numbers=('NHWC', 'HWIO', 'NHWC')) + b1
    y = jnp.where(y > 0, y, a1 * y)
    wf = jnp.transpose(wT, (2, 3, 0, 1))[::-1, ::-1, :, :]
    plo = wT.shape[2] - 1 - 4
    phi = plo + (scale - 1)
    o = lax.conv_general_dilated(
        y, wf, (1, 1), ((plo, phi), (plo, phi)), lhs_dilation=(scale, scale),
        dimension_numbers=('NHWC', 'HWIO', 'NHWC')) + bT
    return jnp.transpose(o, (0, 3, 1, 2))


if __name__ == "__main__":
    key = jax.random.PRNGKey(0)
    k1, k2, k3, k4, k5, kx = jax.random.split(key, 6)

    # FSRCNN(scale_factor=2, num_channels=3, d=60, s=12, m=4) — forward only
    # touches first_part (conv 3->60, k5, p2 + PReLU) and last_part
    # (ConvTranspose 60->3, k9, s2, p4, op1); mid_part is unused by forward().
    d, cin, scale = 60, 3, 2
    std1 = math.sqrt(2.0 / (d * 5 * 5))
    w1 = std1 * jax.random.normal(k1, (d, cin, 5, 5), jnp.float32)    # Conv2d weight
    b1 = 0.05 * jax.random.normal(k3, (d,), jnp.float32)              # Conv2d bias
    a1 = 0.1 + 0.2 * jax.random.uniform(k4, (d,), jnp.float32)        # PReLU slopes
    wT = 0.001 * jax.random.normal(k2, (d, cin, 9, 9), jnp.float32)   # ConvT weight
    bT = 0.05 * jax.random.normal(k5, (cin,), jnp.float32)            # ConvT bias
    params = (w1, b1, a1, wT, bT)

    x = jax.random.normal(kx, (2, cin, 16, 16), jnp.float32)          # NCHW input

    out = jax.block_until_ready(
        fsrcnn_forward(x, params, scale=scale, tile_rows=16))
    ref = jax.block_until_ready(fsrcnn_ref(x, params, scale=scale))

    assert out.shape == (2, cin, 32, 32), out.shape
    err = float(jnp.max(jnp.abs(out - ref)))
    # Stage-2 MXU operands are bf16 (per perf review) -> tolerance sized for that;
    # a structural/indexing bug would produce errors two orders of magnitude larger.
    assert err < 3e-3, f"max abs err {err}"
    print("KERNEL_OK")
</pallas_src>

<mosaic_0001>
module attributes {stable_mosaic.version = 11 : i64} {
  func.func @kernel(%arg0: i32, %arg1: i32, %arg2: memref<1x1x8x640xf32, #tpu.memory_space<vmem>>, %arg3: memref<1x1x512xf32, #tpu.memory_space<vmem>>, %arg4: memref<64x200xf32, #tpu.memory_space<vmem>>, %arg5: memref<64x1xf32, #tpu.memory_space<vmem>>, %arg6: memref<64x1xf32, #tpu.memory_space<vmem>>, %arg7: memref<5x16x320xbf16, #tpu.memory_space<vmem>>, %arg8: memref<16x1xf32, #tpu.memory_space<vmem>>, %arg9: memref<1x1x16x384xf32, #tpu.memory_space<vmem>>, %arg10: memref<64x512xbf16, #tpu.memory_space<vmem>>, %arg11: memref<200x512xf32, #tpu.memory_space<vmem>>, %arg12: memref<320x384xbf16, #tpu.memory_space<vmem>>) attributes {dimension_semantics = [#tpu.dimension_semantics<parallel>, #tpu.dimension_semantics<parallel>], iteration_bounds = array<i64: 2, 1>, scalar_prefetch = 0 : i64, scratch_operands = 3 : i64, tpu.core_type = #tpu.core_type<tc>, window_params = [{transform_indices = @transform_0, window_bounds = array<i64: 1, 1, 8, 640>}, {transform_indices = @transform_1, window_bounds = array<i64: 1, 1, 512>}, {pipeline_mode = #tpu.pipeline_mode<synchronous>, transform_indices = @transform_2, window_bounds = array<i64: 64, 200>}, {pipeline_mode = #tpu.pipeline_mode<synchronous>, transform_indices = @transform_3, window_bounds = array<i64: 64, 1>}, {pipeline_mode = #tpu.pipeline_mode<synchronous>, transform_indices = @transform_4, window_bounds = array<i64: 64, 1>}, {pipeline_mode = #tpu.pipeline_mode<synchronous>, transform_indices = @transform_5, window_bounds = array<i64: 5, 16, 320>}, {pipeline_mode = #tpu.pipeline_mode<synchronous>, transform_indices = @transform_6, window_bounds = array<i64: 16, 1>}, {transform_indices = @transform_7, window_bounds = array<i64: 1, 1, 16, 384>}]} {
    %c0 = arith.constant 0 : index
    %c0_0 = arith.constant 0 : index
    %0 = vector.load %arg4[%c0, %c0_0] : memref<64x200xf32, #tpu.memory_space<vmem>>, vector<64x200xf32>
    %c0_1 = arith.constant 0 : index
    %c0_2 = arith.constant 0 : index
    %1 = vector.load %arg5[%c0_1, %c0_2] : memref<64x1xf32, #tpu.memory_space<vmem>>, vector<64x1xf32>
    %c0_3 = arith.constant 0 : index
    %c0_4 = arith.constant 0 : index
    %2 = vector.load %arg6[%c0_3, %c0_4] : memref<64x1xf32, #tpu.memory_space<vmem>>, vector<64x1xf32>
    %c0_5 = arith.constant 0 : index
    %c0_6 = arith.constant 0 : index
    %c0_7 = arith.constant 0 : index
    %c0_8 = arith.constant 0 : index
    %3 = vector.load %arg2[%c0_5, %c0_6, %c0_7, %c0_8] : memref<1x1x8x640xf32, #tpu.memory_space<vmem>>, vector<1x1x8x512xf32>
    %4 = vector.shape_cast %3 : vector<1x1x8x512xf32> to vector<8x512xf32>
    %c0_9 = arith.constant 0 : index
    %c0_10 = arith.constant 0 : index
    %5 = vector.load %arg11[%c0_9, %c0_10] : memref<200x512xf32, #tpu.memory_space<vmem>>, vector<8x512xf32>
    tpu.vector_store %arg11[%c0_9, %c0_10], %4 {strides = array<i32>} : memref<200x512xf32, #tpu.memory_space<vmem>>, vector<8x512xf32>,
    %c0_11 = arith.constant 0 : index
    %c0_12 = arith.constant 0 : index
    %c0_13 = arith.constant 0 : index
    %c1 = arith.constant 1 : index
    %6 = vector.load %arg2[%c0_11, %c0_12, %c0_13, %c1] : memref<1x1x8x640xf32, #tpu.memory_space<vmem>>, vector<1x1x8x512xf32>
    %7 = vector.shape_cast %6 : vector<1x1x8x512xf32> to vector<8x512xf32>
    %c8 = arith.constant 8 : index
    %c0_14 = arith.constant 0 : index
    %8 = vector.load %arg11[%c8, %c0_14] : memref<200x512xf32, #tpu.memory_space<vmem>>, vector<8x512xf32>
    tpu.vector_store %arg11[%c8, %c0_14], %7 {strides = array<i32>} : memref<200x512xf32, #tpu.memory_space<vmem>>, vector<8x512xf32>,
    %c0_15 = arith.constant 0 : index
    %c0_16 = arith.constant 0 : index
    %c0_17 = arith.constant 0 : index
    %c2 = arith.constant 2 : index
    %9 = vector.load %arg2[%c0_15, %c0_16, %c0_17, %c2] : memref<1x1x8x640xf32, #tpu.memory_space<vmem>>, vector<1x1x8x512xf32>
    %10 = vector.shape_cast %9 : vector<1x1x8x512xf32> to vector<8x512xf32>
    %c16 = arith.constant 16 : index
    %c0_18 = arith.constant 0 : index
    %11 = vector.load %arg11[%c16, %c0_18] : memref<200x512xf32, #tpu.memory_space<vmem>>, vector<8x512xf32>
    tpu.vector_store %arg11[%c16, %c0_18], %10 {strides = array<i32>} : memref<200x512xf32, #tpu.memory_space<vmem>>, vector<8x512xf32>,
    %c0_19 = arith.constant 0 : index
    %c0_20 = arith.constant 0 : index
    %c0_21 = arith.constant 0 : index
    %c3 = arith.constant 3 : index
    %12 = vector.load %arg2[%c0_19, %c0_20, %c0_21, %c3] : memref<1x1x8x640xf32, #tpu.memory_space<vmem>>, vector<1x1x8x512xf32>
    %13 = vector.shape_cast %12 : vector<1x1x8x512xf32> to vector<8x512xf32>
    %c24 = arith.constant 24 : index
    %c0_22 = arith.constant 0 : index
    %14 = vector.load %arg11[%c24, %c0_22] : memref<200x512xf32, #tpu.memory_space<vmem>>, vector<8x512xf32>
    tpu.vector_store %arg11[%c24, %c0_22], %13 {strides = array<i32>} : memref<200x512xf32, #tpu.memory_space<vmem>>, vector<8x512xf32>,
    %c0_23 = arith.constant 0 : index
    %c0_24 = arith.constant 0 : index
    %c0_25 = arith.constant 0 : index
    %c4 = arith.constant 4 : index
    %15 = vector.load %arg2[%c0_23, %c0_24, %c0_25, %c4] : memref<1x1x8x640xf32, #tpu.memory_space<vmem>>, vector<1x1x8x512xf32>
    %16 = vector.shape_cast %15 : vector<1x1x8x512xf32> to vector<8x512xf32>
    %c32 = arith.constant 32 : index
    %c0_26 = arith.constant 0 : index
    %17 = vector.load %arg11[%c32, %c0_26] : memref<200x512xf32, #tpu.memory_space<vmem>>, vector<8x512xf32>
    tpu.vector_store %arg11[%c32, %c0_26], %16 {strides = array<i32>} : memref<200x512xf32, #tpu.memory_space<vmem>>, vector<8x512xf32>,
    %c0_27 = arith.constant 0 : index
    %c0_28 = arith.constant 0 : index
    %c0_29 = arith.constant 0 : index
    %c24_30 = arith.constant 24 : index
    %18 = vector.load %arg2[%c0_27, %c0_28, %c0_29, %c24_30] : memref<1x1x8x640xf32, #tpu.memory_space<vmem>>, vector<1x1x8x512xf32>
    %19 = vector.shape_cast %18 : vector<1x1x8x512xf32> to vector<8x512xf32>
    %c40 = arith.constant 40 : index
    %c0_31 = arith.constant 0 : index
    %20 = vector.load %arg11[%c40, %c0_31] : memref<200x512xf32, #tpu.memory_space<vmem>>, vector<8x512xf32>
    tpu.vector_store %arg11[%c40, %c0_31], %19 {strides = array<i32>} : memref<200x512xf32, #tpu.memory_space<vmem>>, vector<8x512xf32>,
    %c0_32 = arith.constant 0 : index
    %c0_33 = arith.constant 0 : index
    %c0_34 = arith.constant 0 : index
    %c25 = arith.constant 25 : index
    %21 = vector.load %arg2[%c0_32, %c0_33, %c0_34, %c25] : memref<1x1x8x640xf32, #tpu.memory_space<vmem>>, vector<1x1x8x512xf32>
    %22 = vector.shape_cast %21 : vector<1x1x8x512xf32> to vector<8x512xf32>
    %c48 = arith.constant 48 : index
    %c0_35 = arith.constant 0 : index
    %23 = vector.load %arg11[%c48, %c0_35] : memref<200x512xf32, #tpu.memory_space<vmem>>, vector<8x512xf32>
    tpu.vector_store %arg11[%c48, %c0_35], %22 {strides = array<i32>} : memref<200x512xf32, #tpu.memory_space<vmem>>, vector<8x512xf32>,
    %c0_36 = arith.constant 0 : index
    %c0_37 = arith.constant 0 : index
    %c0_38 = arith.constant 0 : index
    %c26 = arith.constant 26 : index
    %24 = vector.load %arg2[%c0_36, %c0_37, %c0_38, %c26] : memref<1x1x8x640xf32, #tpu.memory_space<vmem>>, vector<1x1x8x512xf32>
    %25 = vector.shape_cast %24 : vector<1x1x8x512xf32> to vector<8x512xf32>
    %c56 = arith.constant 56 : index
    %c0_39 = arith.constant 0 : index
    %26 = vector.load %arg11[%c56, %c0_39] : memref<200x512xf32, #tpu.memory_space<vmem>>, vector<8x512xf32>
    tpu.vector_store %arg11[%c56, %c0_39], %25 {strides = array<i32>} : memref<200x512xf32, #tpu.memory_space<vmem>>, vector<8x512xf32>,
    %c0_40 = arith.constant 0 : index
    %c0_41 = arith.constant 0 : index
    %c0_42 = arith.constant 0 : index
    %c27 = arith.constant 27 : index
    %27 = vector.load %arg2[%c0_40, %c0_41, %c0_42, %c27] : memref<1x1x8x640xf32, #tpu.memory_space<vmem>>, vector<1x1x8x512xf32>
    %28 = vector.shape_cast %27 : vector<1x1x8x512xf32> to vector<8x512xf32>
    %c64 = arith.constant 64 : index
    %c0_43 = arith.constant 0 : index
    %29 = vector.load %arg11[%c64, %c0_43] : memref<200x512xf32, #tpu.memory_space<vmem>>, vector<8x512xf32>
    tpu.vector_store %arg11[%c64, %c0_43], %28 {strides = array<i32>} : memref<200x512xf32, #tpu.memory_space<vmem>>, vector<8x512xf32>,
    %c0_44 = arith.constant 0 : index
    %c0_45 = arith.constant 0 : index
    %c0_46 = arith.constant 0 : index
    %c28 = arith.constant 28 : index
    %30 = vector.load %arg2[%c0_44, %c0_45, %c0_46, %c28] : memref<1x1x8x640xf32, #tpu.memory_space<vmem>>, vector<1x1x8x512xf32>
    %31 = vector.shape_cast %30 : vector<1x1x8x512xf32> to vector<8x512xf32>
    %c72 = arith.constant 72 : index
    %c0_47 = arith.constant 0 : index
    %32 = vector.load %arg11[%c72, %c0_47] : memref<200x512xf32, #tpu.memory_space<vmem>>, vector<8x512xf32>
    tpu.vector_store %arg11[%c72, %c0_47], %31 {strides = array<i32>} : memref<200x512xf32, #tpu.memory_space<vmem>>, vector<8x512xf32>,
    %c0_48 = arith.constant 0 : index
    %c0_49 = arith.constant 0 : index
    %c0_50 = arith.constant 0 : index
    %c48_51 = arith.constant 48 : index
    %33 = vector.load %arg2[%c0_48, %c0_49, %c0_50, %c48_51] : memref<1x1x8x640xf32, #tpu.memory_space<vmem>>, vector<1x1x8x512xf32>
    %34 = vector.shape_cast %33 : vector<1x1x8x512xf32> to vector<8x512xf32>
    %c80 = arith.constant 80 : index
    %c0_52 = arith.constant 0 : index
    %35 = vector.load %arg11[%c80, %c0_52] : memref<200x512xf32, #tpu.memory_space<vmem>>, vector<8x512xf32>
    tpu.vector_store %arg11[%c80, %c0_52], %34 {strides = array<i32>} : memref<200x512xf32, #tpu.memory_space<vmem>>, vector<8x512xf32>,
    %c0_53 = arith.constant 0 : index
    %c0_54 = arith.constant 0 : index
    %c0_55 = arith.constant 0 : index
    %c49 = arith.constant 49 : index
    %36 = vector.load %arg2[%c0_53, %c0_54, %c0_55, %c49] : memref<1x1x8x640xf32, #tpu.memory_space<vmem>>, vector<1x1x8x512xf32>
    %37 = vector.shape_cast %36 : vector<1x1x8x512xf32> to vector<8x512xf32>
    %c88 = arith.constant 88 : index
    %c0_56 = arith.constant 0 : index
    %38 = vector.load %arg11[%c88, %c0_56] : memref<200x512xf32, #tpu.memory_space<vmem>>, vector<8x512xf32>
    tpu.vector_store %arg11[%c88, %c0_56], %37 {strides = array<i32>} : memref<200x512xf32, #tpu.memory_space<vmem>>, vector<8x512xf32>,
    %c0_57 = arith.constant 0 : index
    %c0_58 = arith.constant 0 : index
    %c0_59 = arith.constant 0 : index
    %c50 = arith.constant 50 : index
    %39 = vector.load %arg2[%c0_57, %c0_58, %c0_59, %c50] : memref<1x1x8x640xf32, #tpu.memory_space<vmem>>, vector<1x1x8x512xf32>
    %40 = vector.shape_cast %39 : vector<1x1x8x512xf32> to vector<8x512xf32>
    %c96 = arith.constant 96 : index
    %c0_60 = arith.constant 0 : index
    %41 = vector.load %arg11[%c96, %c0_60] : memref<200x512xf32, #tpu.memory_space<vmem>>, vector<8x512xf32>
    tpu.vector_store %arg11[%c96, %c0_60], %40 {strides = array<i32>} : memref<200x512xf32, #tpu.memory_space<vmem>>, vector<8x512xf32>,
    %c0_61 = arith.constant 0 : index
    %c0_62 = arith.constant 0 : index
    %c0_63 = arith.constant 0 : index
    %c51 = arith.constant 51 : index
    %42 = vector.load %arg2[%c0_61, %c0_62, %c0_63, %c51] : memref<1x1x8x640xf32, #tpu.memory_space<vmem>>, vector<1x1x8x512xf32>
    %43 = vector.shape_cast %42 : vector<1x1x8x512xf32> to vector<8x512xf32>
    %c104 = arith.constant 104 : index
    %c0_64 = arith.constant 0 : index
    %44 = vector.load %arg11[%c104, %c0_64] : memref<200x512xf32, #tpu.memory_space<vmem>>, vector<8x512xf32>
    tpu.vector_store %arg11[%c104, %c0_64], %43 {strides = array<i32>} : memref<200x512xf32, #tpu.memory_space<vmem>>, vector<8x512xf32>,
    %c0_65 = arith.constant 0 : index
    %c0_66 = arith.constant 0 : index
    %c0_67 = arith.constant 0 : index
    %c52 = arith.constant 52 : index
    %45 = vector.load %arg2[%c0_65, %c0_66, %c0_67, %c52] : memref<1x1x8x640xf32, #tpu.memory_space<vmem>>, vector<1x1x8x512xf32>
    %46 = vector.shape_cast %45 : vector<1x1x8x512xf32> to vector<8x512xf32>
    %c112 = arith.constant 112 : index
    %c0_68 = arith.constant 0 : index
    %47 = vector.load %arg11[%c112, %c0_68] : memref<200x512xf32, #tpu.memory_space<vmem>>, vector<8x512xf32>
    tpu.vector_store %arg11[%c112, %c0_68], %46 {strides = array<i32>} : memref<200x512xf32, #tpu.memory_space<vmem>>, vector<8x512xf32>,
    %c0_69 = arith.constant 0 : index
    %c0_70 = arith.constant 0 : index
    %c0_71 = arith.constant 0 : index
    %c72_72 = arith.constant 72 : index
    %48 = vector.load %arg2[%c0_69, %c0_70, %c0_71, %c72_72] : memref<1x1x8x640xf32, #tpu.memory_space<vmem>>, vector<1x1x8x512xf32>
    %49 = vector.shape_cast %48 : vector<1x1x8x512xf32> to vector<8x512xf32>
    %c120 = arith.constant 120 : index
    %c0_73 = arith.constant 0 : index
    %50 = vector.load %arg11[%c120, %c0_73] : memref<200x512xf32, #tpu.memory_space<vmem>>, vector<8x512xf32>
    tpu.vector_store %arg11[%c120, %c0_73], %49 {strides = array<i32>} : memref<200x512xf32, #tpu.memory_space<vmem>>, vector<8x512xf32>,
    %c0_74 = arith.constant 0 : index
    %c0_75 = arith.constant 0 : index
    %c0_76 = arith.constant 0 : index
    %c73 = arith.constant 73 : index
    %51 = vector.load %arg2[%c0_74, %c0_75, %c0_76, %c73] : memref<1x1x8x640xf32, #tpu.memory_space<vmem>>, vector<1x1x8x512xf32>
    %52 = vector.shape_cast %51 : vector<1x1x8x512xf32> to vector<8x512xf32>
    %c128 = arith.constant 128 : index
    %c0_77 = arith.constant 0 : index
    %53 = vector.load %arg11[%c128, %c0_77] : memref<200x512xf32, #tpu.memory_space<vmem>>, vector<8x512xf32>
    tpu.vector_store %arg11[%c128, %c0_77], %52 {strides = array<i32>} : memref<200x512xf32, #tpu.memory_space<vmem>>, vector<8x512xf32>,
    %c0_78 = arith.constant 0 : index
    %c0_79 = arith.constant 0 : index
    %c0_80 = arith.constant 0 : index
    %c74 = arith.constant 74 : index
    %54 = vector.load %arg2[%c0_78, %c0_79, %c0_80, %c74] : memref<1x1x8x640xf32, #tpu.memory_space<vmem>>, vector<1x1x8x512xf32>
    %55 = vector.shape_cast %54 : vector<1x1x8x512xf32> to vector<8x512xf32>
    %c136 = arith.constant 136 : index
    %c0_81 = arith.constant 0 : index
    %56 = vector.load %arg11[%c136, %c0_81] : memref<200x512xf32, #tpu.memory_space<vmem>>, vector<8x512xf32>
    tpu.vector_store %arg11[%c136, %c0_81], %55 {strides = array<i32>} : memref<200x512xf32, #tpu.memory_space<vmem>>, vector<8x512xf32>,
    %c0_82 = arith.constant 0 : index
    %c0_83 = arith.constant 0 : index
    %c0_84 = arith.constant 0 : index
    %c75 = arith.constant 75 : index
    %57 = vector.load %arg2[%c0_82, %c0_83, %c0_84, %c75] : memref<1x1x8x640xf32, #tpu.memory_space<vmem>>, vector<1x1x8x512xf32>
    %58 = vector.shape_cast %57 : vector<1x1x8x512xf32> to vector<8x512xf32>
    %c144 = arith.constant 144 : index
    %c0_85 = arith.constant 0 : index
    %59 = vector.load %arg11[%c144, %c0_85] : memref<200x512xf32, #tpu.memory_space<vmem>>, vector<8x512xf32>
    tpu.vector_store %arg11[%c144, %c0_85], %58 {strides = array<i32>} : memref<200x512xf32, #tpu.memory_space<vmem>>, vector<8x512xf32>,
    %c0_86 = arith.constant 0 : index
    %c0_87 = arith.constant 0 : index
    %c0_88 = arith.constant 0 : index
    %c76 = arith.constant 76 : index
    %60 = vector.load %arg2[%c0_86, %c0_87, %c0_88, %c76] : memref<1x1x8x640xf32, #tpu.memory_space<vmem>>, vector<1x1x8x512xf32>
    %61 = vector.shape_cast %60 : vector<1x1x8x512xf32> to vector<8x512xf32>
    %c152 = arith.constant 152 : index
    %c0_89 = arith.constant 0 : index
    %62 = vector.load %arg11[%c152, %c0_89] : memref<200x512xf32, #tpu.memory_space<vmem>>, vector<8x512xf32>
    tpu.vector_store %arg11[%c152, %c0_89], %61 {strides = array<i32>} : memref<200x512xf32, #tpu.memory_space<vmem>>, vector<8x512xf32>,
    %c0_90 = arith.constant 0 : index
    %c0_91 = arith.constant 0 : index
    %c0_92 = arith.constant 0 : index
    %c96_93 = arith.constant 96 : index
    %63 = vector.load %arg2[%c0_90, %c0_91, %c0_92, %c96_93] : memref<1x1x8x640xf32, #tpu.memory_space<vmem>>, vector<1x1x8x512xf32>
    %64 = vector.shape_cast %63 : vector<1x1x8x512xf32> to vector<8x512xf32>
    %c160 = arith.constant 160 : index
    %c0_94 = arith.constant 0 : index
    %65 = vector.load %arg11[%c160, %c0_94] : memref<200x512xf32, #tpu.memory_space<vmem>>, vector<8x512xf32>
    tpu.vector_store %arg11[%c160, %c0_94], %64 {strides = array<i32>} : memref<200x512xf32, #tpu.memory_space<vmem>>, vector<8x512xf32>,
    %c0_95 = arith.constant 0 : index
    %c0_96 = arith.constant 0 : index
    %c0_97 = arith.constant 0 : index
    %c97 = arith.constant 97 : index
    %66 = vector.load %arg2[%c0_95, %c0_96, %c0_97, %c97] : memref<1x1x8x640xf32, #tpu.memory_space<vmem>>, vector<1x1x8x512xf32>
    %67 = vector.shape_cast %66 : vector<1x1x8x512xf32> to vector<8x512xf32>
    %c168 = arith.constant 168 : index
    %c0_98 = arith.constant 0 : index
    %68 = vector.load %arg11[%c168, %c0_98] : memref<200x512xf32, #tpu.memory_space<vmem>>, vector<8x512xf32>
    tpu.vector_store %arg11[%c168, %c0_98], %67 {strides = array<i32>} : memref<200x512xf32, #tpu.memory_space<vmem>>, vector<8x512xf32>,
    %c0_99 = arith.constant 0 : index
    %c0_100 = arith.constant 0 : index
    %c0_101 = arith.constant 0 : index
    %c98 = arith.constant 98 : index
    %69 = vector.load %arg2[%c0_99, %c0_100, %c0_101, %c98] : memref<1x1x8x640xf32, #tpu.memory_space<vmem>>, vector<1x1x8x512xf32>
    %70 = vector.shape_cast %69 : vector<1x1x8x512xf32> to vector<8x512xf32>
    %c176 = arith.constant 176 : index
    %c0_102 = arith.constant 0 : index
    %71 = vector.load %arg11[%c176, %c0_102] : memref<200x512xf32, #tpu.memory_space<vmem>>, vector<8x512xf32>
    tpu.vector_store %arg11[%c176, %c0_102], %70 {strides = array<i32>} : memref<200x512xf32, #tpu.memory_space<vmem>>, vector<8x512xf32>,
    %c0_103 = arith.constant 0 : index
    %c0_104 = arith.constant 0 : index
    %c0_105 = arith.constant 0 : index
    %c99 = arith.constant 99 : index
    %72 = vector.load %arg2[%c0_103, %c0_104, %c0_105, %c99] : memref<1x1x8x640xf32, #tpu.memory_space<vmem>>, vector<1x1x8x512xf32>
    %73 = vector.shape_cast %72 : vector<1x1x8x512xf32> to vector<8x512xf32>
    %c184 = arith.constant 184 : index
    %c0_106 = arith.constant 0 : index
    %74 = vector.load %arg11[%c184, %c0_106] : memref<200x512xf32, #tpu.memory_space<vmem>>, vector<8x512xf32>
    tpu.vector_store %arg11[%c184, %c0_106], %73 {strides = array<i32>} : memref<200x512xf32, #tpu.memory_space<vmem>>, vector<8x512xf32>,
    %c0_107 = arith.constant 0 : index
    %c0_108 = arith.constant 0 : index
    %c0_109 = arith.constant 0 : index
    %c100 = arith.constant 100 : index
    %75 = vector.load %arg2[%c0_107, %c0_108, %c0_109, %c100] : memref<1x1x8x640xf32, #tpu.memory_space<vmem>>, vector<1x1x8x512xf32>
    %76 = vector.shape_cast %75 : vector<1x1x8x512xf32> to vector<8x512xf32>
    %c192 = arith.constant 192 : index
    %c0_110 = arith.constant 0 : index
    %77 = vector.load %arg11[%c192, %c0_110] : memref<200x512xf32, #tpu.memory_space<vmem>>, vector<8x512xf32>
    tpu.vector_store %arg11[%c192, %c0_110], %76 {strides = array<i32>} : memref<200x512xf32, #tpu.memory_space<vmem>>, vector<8x512xf32>,
    %c0_111 = arith.constant 0 : index
    %c0_112 = arith.constant 0 : index
    %78 = vector.load %arg11[%c0_111, %c0_112] : memref<200x512xf32, #tpu.memory_space<vmem>>, vector<200x512xf32>
    %cst = arith.constant dense<0.000000e+00> : vector<64x512xf32>
    %79 = tpu.matmul %0, %78, %cst {dimension_numbers = #tpu.dot_dimension_numbers<[1], [0], [0], [1], [0, 0, 1, 1], [], []>} : vector<64x200xf32>, vector<200x512xf32>, vector<64x512xf32> -> vector<64x512xf32>
    %80 = vector.broadcast %1 : vector<64x1xf32> to vector<64x512xf32>
    %81 = arith.addf %79, %80 : vector<64x512xf32>
    %cst_113 = arith.constant 0.000000e+00 : f32
    %82 = vector.broadcast %cst_113 : f32 to vector<64x512xf32>
    %83 = arith.cmpf ogt, %81, %82 : vector<64x512xf32>
    %84 = vector.broadcast %2 : vector<64x1xf32> to vector<64x512xf32>
    %85 = arith.mulf %84, %81 : vector<64x512xf32>
    %86 = arith.select %83, %81, %85 : vector<64x512xi1>, vector<64x512xf32>
    %c0_114 = arith.constant 0 : index
    %c0_115 = arith.constant 0 : index
    %c0_116 = arith.constant 0 : index
    %87 = vector.load %arg3[%c0_114, %c0_115, %c0_116] : memref<1x1x512xf32, #tpu.memory_space<vmem>>, vector<1x1x512xf32>
    %88 = vector.shape_cast %87 : vector<1x1x512xf32> to vector<1x512xf32>
    %89 = vector.broadcast %88 : vector<1x512xf32> to vector<64x512xf32>
    %90 = arith.mulf %86, %89 : vector<64x512xf32>
    %91 = arith.truncf %90 : vector<64x512xf32> to vector<64x512xbf16>
    %c0_117 = arith.constant 0 : index
    %c0_118 = arith.constant 0 : index
    %92 = vector.load %arg10[%c0_117, %c0_118] : memref<64x512xbf16, #tpu.memory_space<vmem>>, vector<64x512xbf16>
    tpu.vector_store %arg10[%c0_117, %c0_118], %91 {strides = array<i32>} : memref<64x512xbf16, #tpu.memory_space<vmem>>, vector<64x512xbf16>,
    %c0_119 = arith.constant 0 : index
    %c0_120 = arith.constant 0 : index
    %93 = vector.load %arg8[%c0_119, %c0_120] : memref<16x1xf32, #tpu.memory_space<vmem>>, vector<16x1xf32>
    %cst_121 = arith.constant 0.000000e+00 : f32
    %94 = vector.broadcast %cst_121 : f32 to vector<16x384xf32>
    %c0_122 = arith.constant 0 : index
    %c0_123 = arith.constant 0 : index
    %95 = vector.load %arg10[%c0_122, %c0_123] : memref<64x512xbf16, #tpu.memory_space<vmem>>, vector<64x384xbf16>
    %c0_124 = arith.constant 0 : index
    %c0_125 = arith.constant 0 : index
    %96 = vector.load %arg12[%c0_124, %c0_125] : memref<320x384xbf16, #tpu.memory_space<vmem>>, vector<64x384xbf16>
    tpu.vector_store %arg12[%c0_124, %c0_125], %95 {strides = array<i32>} : memref<320x384xbf16, #tpu.memory_space<vmem>>, vector<64x384xbf16>,
    %c0_126 = arith.constant 0 : index
    %c1_127 = arith.constant 1 : index
    %97 = vector.load %arg10[%c0_126, %c1_127] : memref<64x512xbf16, #tpu.memory_space<vmem>>, vector<64x384xbf16>
    %c64_128 = arith.constant 64 : index
    %c0_129 = arith.constant 0 : index
    %98 = vector.load %arg12[%c64_128, %c0_129] : memref<320x384xbf16, #tpu.memory_space<vmem>>, vector<64x384xbf16>
    tpu.vector_store %arg12[%c64_128, %c0_129], %97 {strides = array<i32>} : memref<320x384xbf16, #tpu.memory_space<vmem>>, vector<64x384xbf16>,
    %c0_130 = arith.constant 0 : index
    %c2_131 = arith.constant 2 : index
    %99 = vector.load %arg10[%c0_130, %c2_131] : memref<64x512xbf16, #tpu.memory_space<vmem>>, vector<64x384xbf16>
    %c128_132 = arith.constant 128 : index
    %c0_133 = arith.constant 0 : index
    %100 = vector.load %arg12[%c128_132, %c0_133] : memref<320x384xbf16, #tpu.memory_space<vmem>>, vector<64x384xbf16>
    tpu.vector_store %arg12[%c128_132, %c0_133], %99 {strides = array<i32>} : memref<320x384xbf16, #tpu.memory_space<vmem>>, vector<64x384xbf16>,
    %c0_134 = arith.constant 0 : index
    %c3_135 = arith.constant 3 : index
    %101 = vector.load %arg10[%c0_134, %c3_135] : memref<64x512xbf16, #tpu.memory_space<vmem>>, vector<64x384xbf16>
    %c192_136 = arith.constant 192 : index
    %c0_137 = arith.constant 0 : index
    %102 = vector.load %arg12[%c192_136, %c0_137] : memref<320x384xbf16, #tpu.memory_space<vmem>>, vector<64x384xbf16>
    tpu.vector_store %arg12[%c192_136, %c0_137], %101 {strides = array<i32>} : memref<320x384xbf16, #tpu.memory_space<vmem>>, vector<64x384xbf16>,
    %c0_138 = arith.constant 0 : index
    %c4_139 = arith.constant 4 : index
    %103 = vector.load %arg10[%c0_138, %c4_139] : memref<64x512xbf16, #tpu.memory_space<vmem>>, vector<64x384xbf16>
    %c256 = arith.constant 256 : index
    %c0_140 = arith.constant 0 : index
    %104 = vector.load %arg12[%c256, %c0_140] : memref<320x384xbf16, #tpu.memory_space<vmem>>, vector<64x384xbf16>
    tpu.vector_store %arg12[%c256, %c0_140], %103 {strides = array<i32>} : memref<320x384xbf16, #tpu.memory_space<vmem>>, vector<64x384xbf16>,
    %c0_141 = arith.constant 0 : index
    %c0_142 = arith.constant 0 : index
    %c0_143 = arith.constant 0 : index
    %105 = vector.load %arg7[%c0_141, %c0_142, %c0_143] : memref<5x16x320xbf16, #tpu.memory_space<vmem>>, vector<1x16x320xbf16>
    %106 = vector.shape_cast %105 : vector<1x16x320xbf16> to vector<16x320xbf16>
    %c0_144 = arith.constant 0 : index
    %c0_145 = arith.constant 0 : index
    %107 = vector.load %arg12[%c0_144, %c0_145] : memref<320x384xbf16, #tpu.memory_space<vmem>>, vector<320x384xbf16>
    %cst_146 = arith.constant dense<0.000000e+00> : vector<16x384xf32>
    %108 = tpu.matmul %106, %107, %cst_146 {dimension_numbers = #tpu.dot_dimension_numbers<[1], [0], [0], [1], [0, 0, 1, 1], [], []>} : vector<16x320xbf16>, vector<320x384xbf16>, vector<16x384xf32> -> vector<16x384xf32>
    %109 = arith.addf %94, %108 : vector<16x384xf32>
    %c0_147 = arith.constant 0 : index
    %c24_148 = arith.constant 24 : index
    %110 = vector.load %arg10[%c0_147, %c24_148] : memref<64x512xbf16, #tpu.memory_space<vmem>>, vector<64x384xbf16>
    %c0_149 = arith.constant 0 : index
    %c0_150 = arith.constant 0 : index
    %111 = vector.load %arg12[%c0_149, %c0_150] : memref<320x384xbf16, #tpu.memory_space<vmem>>, vector<64x384xbf16>
    tpu.vector_store %arg12[%c0_149, %c0_150], %110 {strides = array<i32>} : memref<320x384xbf16, #tpu.memory_space<vmem>>, vector<64x384xbf16>,
    %c0_151 = arith.constant 0 : index
    %c25_152 = arith.constant 25 : index
    %112 = vector.load %arg10[%c0_151, %c25_152] : memref<64x512xbf16, #tpu.memory_space<vmem>>, vector<64x384xbf16>
    %c64_153 = arith.constant 64 : index
    %c0_154 = arith.constant 0 : index
    %113 = vector.load %arg12[%c64_153, %c0_154] : memref<320x384xbf16, #tpu.memory_space<vmem>>, vector<64x384xbf16>
    tpu.vector_store %arg12[%c64_153, %c0_154], %112 {strides = array<i32>} : memref<320x384xbf16, #tpu.memory_space<vmem>>, vector<64x384xbf16>,
    %c0_155 = arith.constant 0 : index
    %c26_156 = arith.constant 26 : index
    %114 = vector.load %arg10[%c0_155, %c26_156] : memref<64x512xbf16, #tpu.memory_space<vmem>>, vector<64x384xbf16>
    %c128_157 = arith.constant 128 : index
    %c0_158 = arith.constant 0 : index
    %115 = vector.load %arg12[%c128_157, %c0_158] : memref<320x384xbf16, #tpu.memory_space<vmem>>, vector<64x384xbf16>
    tpu.vector_store %arg12[%c128_157, %c0_158], %114 {strides = array<i32>} : memref<320x384xbf16, #tpu.memory_space<vmem>>, vector<64x384xbf16>,
    %c0_159 = arith.constant 0 : index
    %c27_160 = arith.constant 27 : index
    %116 = vector.load %arg10[%c0_159, %c27_160] : memref<64x512xbf16, #tpu.memory_space<vmem>>, vector<64x384xbf16>
    %c192_161 = arith.constant 192 : index
    %c0_162 = arith.constant 0 : index
    %117 = vector.load %arg12[%c192_161, %c0_162] : memref<320x384xbf16, #tpu.memory_space<vmem>>, vector<64x384xbf16>
    tpu.vector_store %arg12[%c192_161, %c0_162], %116 {strides = array<i32>} : memref<320x384xbf16, #tpu.memory_space<vmem>>, vector<64x384xbf16>,
    %c0_163 = arith.constant 0 : index
    %c28_164 = arith.constant 28 : index
    %118 = vector.load %arg10[%c0_163, %c28_164] : memref<64x512xbf16, #tpu.memory_space<vmem>>, vector<64x384xbf16>
    %c256_165 = arith.constant 256 : index
    %c0_166 = arith.constant 0 : index
    %119 = vector.load %arg12[%c256_165, %c0_166] : memref<320x384xbf16, #tpu.memory_space<vmem>>, vector<64x384xbf16>
    tpu.vector_store %arg12[%c256_165, %c0_166], %118 {strides = array<i32>} : memref<320x384xbf16, #tpu.memory_space<vmem>>, vector<64x384xbf16>,
    %c1_167 = arith.constant 1 : index
    %c0_168 = arith.constant 0 : index
    %c0_169 = arith.constant 0 : index
    %120 = vector.load %arg7[%c1_167, %c0_168, %c0_169] : memref<5x16x320xbf16, #tpu.memory_space<vmem>>, vector<1x16x320xbf16>
    %121 = vector.shape_cast %120 : vector<1x16x320xbf16> to vector<16x320xbf16>
    %c0_170 = arith.constant 0 : index
    %c0_171 = arith.constant 0 : index
    %122 = vector.load %arg12[%c0_170, %c0_171] : memref<320x384xbf16, #tpu.memory_space<vmem>>, vector<320x384xbf16>
    %cst_172 = arith.constant dense<0.000000e+00> : vector<16x384xf32>
    %123 = tpu.matmul %121, %122, %cst_172 {dimension_numbers = #tpu.dot_dimension_numbers<[1], [0], [0], [1], [0, 0, 1, 1], [], []>} : vector<16x320xbf16>, vector<320x384xbf16>, vector<16x384xf32> -> vector<16x384xf32>
    %124 = arith.addf %109, %123 : vector<16x384xf32>
    %c0_173 = arith.constant 0 : index
    %c48_174 = arith.constant 48 : index
    %125 = vector.load %arg10[%c0_173, %c48_174] : memref<64x512xbf16, #tpu.memory_space<vmem>>, vector<64x384xbf16>
    %c0_175 = arith.constant 0 : index
    %c0_176 = arith.constant 0 : index
    %126 = vector.load %arg12[%c0_175, %c0_176] : memref<320x384xbf16, #tpu.memory_space<vmem>>, vector<64x384xbf16>
    tpu.vector_store %arg12[%c0_175, %c0_176], %125 {strides = array<i32>} : memref<320x384xbf16, #tpu.memory_space<vmem>>, vector<64x384xbf16>,
    %c0_177 = arith.constant 0 : index
    %c49_178 = arith.constant 49 : index
    %127 = vector.load %arg10[%c0_177, %c49_178] : memref<64x512xbf16, #tpu.memory_space<vmem>>, vector<64x384xbf16>
    %c64_179 = arith.constant 64 : index
    %c0_180 = arith.constant 0 : index
    %128 = vector.load %arg12[%c64_179, %c0_180] : memref<320x384xbf16, #tpu.memory_space<vmem>>, vector<64x384xbf16>
    tpu.vector_store %arg12[%c64_179, %c0_180], %127 {strides = array<i32>} : memref<320x384xbf16, #tpu.memory_space<vmem>>, vector<64x384xbf16>,
    %c0_181 = arith.constant 0 : index
    %c50_182 = arith.constant 50 : index
    %129 = vector.load %arg10[%c0_181, %c50_182] : memref<64x512xbf16, #tpu.memory_space<vmem>>, vector<64x384xbf16>
    %c128_183 = arith.constant 128 : index
    %c0_184 = arith.constant 0 : index
    %130 = vector.load %arg12[%c128_183, %c0_184] : memref<320x384xbf16, #tpu.memory_space<vmem>>, vector<64x384xbf16>
    tpu.vector_store %arg12[%c128_183, %c0_184], %129 {strides = array<i32>} : memref<320x384xbf16, #tpu.memory_space<vmem>>, vector<64x384xbf16>,
    %c0_185 = arith.constant 0 : index
    %c51_186 = arith.constant 51 : index
    %131 = vector.load %arg10[%c0_185, %c51_186] : memref<64x512xbf16, #tpu.memory_space<vmem>>, vector<64x384xbf16>
    %c192_187 = arith.constant 192 : index
    %c0_188 = arith.constant 0 : index
    %132 = vector.load %arg12[%c192_187, %c0_188] : memref<320x384xbf16, #tpu.memory_space<vmem>>, vector<64x384xbf16>
    tpu.vector_store %arg12[%c192_187, %c0_188], %131 {strides = array<i32>} : memref<320x384xbf16, #tpu.memory_space<vmem>>, vector<64x384xbf16>,
    %c0_189 = arith.constant 0 : index
    %c52_190 = arith.constant 52 : index
    %133 = vector.load %arg10[%c0_189, %c52_190] : memref<64x512xbf16, #tpu.memory_space<vmem>>, vector<64x384xbf16>
    %c256_191 = arith.constant 256 : index
    %c0_192 = arith.constant 0 : index
    %134 = vector.load %arg12[%c256_191, %c0_192] : memref<320x384xbf16, #tpu.memory_space<vmem>>, vector<64x384xbf16>
    tpu.vector_store %arg12[%c256_191, %c0_192], %133 {strides = array<i32>} : memref<320x384xbf16, #tpu.memory_space<vmem>>, vector<64x384xbf16>,
    %c2_193 = arith.constant 2 : index
    %c0_194 = arith.constant 0 : index
    %c0_195 = arith.constant 0 : index
    %135 = vector.load %arg7[%c2_193, %c0_194, %c0_195] : memref<5x16x320xbf16, #tpu.memory_space<vmem>>, vector<1x16x320xbf16>
    %136 = vector.shape_cast %135 : vector<1x16x320xbf16> to vector<16x320xbf16>
    %c0_196 = arith.constant 0 : index
    %c0_197 = arith.constant 0 : index
    %137 = vector.load %arg12[%c0_196, %c0_197] : memref<320x384xbf16, #tpu.memory_space<vmem>>, vector<320x384xbf16>
    %cst_198 = arith.constant dense<0.000000e+00> : vector<16x384xf32>
    %138 = tpu.matmul %136, %137, %cst_198 {dimension_numbers = #tpu.dot_dimension_numbers<[1], [0], [0], [1], [0, 0, 1, 1], [], []>} : vector<16x320xbf16>, vector<320x384xbf16>, vector<16x384xf32> -> vector<16x384xf32>
    %139 = arith.addf %124, %138 : vector<16x384xf32>
    %c0_199 = arith.constant 0 : index
    %c72_200 = arith.constant 72 : index
    %140 = vector.load %arg10[%c0_199, %c72_200] : memref<64x512xbf16, #tpu.memory_space<vmem>>, vector<64x384xbf16>
    %c0_201 = arith.constant 0 : index
    %c0_202 = arith.constant 0 : index
    %141 = vector.load %arg12[%c0_201, %c0_202] : memref<320x384xbf16, #tpu.memory_space<vmem>>, vector<64x384xbf16>
    tpu.vector_store %arg12[%c0_201, %c0_202], %140 {strides = array<i32>} : memref<320x384xbf16, #tpu.memory_space<vmem>>, vector<64x384xbf16>,
    %c0_203 = arith.constant 0 : index
    %c73_204 = arith.constant 73 : index
    %142 = vector.load %arg10[%c0_203, %c73_204] : memref<64x512xbf16, #tpu.memory_space<vmem>>, vector<64x384xbf16>
    %c64_205 = arith.constant 64 : index
    %c0_206 = arith.constant 0 : index
    %143 = vector.load %arg12[%c64_205, %c0_206] : memref<320x384xbf16, #tpu.memory_space<vmem>>, vector<64x384xbf16>
    tpu.vector_store %arg12[%c64_205, %c0_206], %142 {strides = array<i32>} : memref<320x384xbf16, #tpu.memory_space<vmem>>, vector<64x384xbf16>,
    %c0_207 = arith.constant 0 : index
    %c74_208 = arith.constant 74 : index
    %144 = vector.load %arg10[%c0_207, %c74_208] : memref<64x512xbf16, #tpu.memory_space<vmem>>, vector<64x384xbf16>
    %c128_209 = arith.constant 128 : index
    %c0_210 = arith.constant 0 : index
    %145 = vector.load %arg12[%c128_209, %c0_210] : memref<320x384xbf16, #tpu.memory_space<vmem>>, vector<64x384xbf16>
    tpu.vector_store %arg12[%c128_209, %c0_210], %144 {strides = array<i32>} : memref<320x384xbf16, #tpu.memory_space<vmem>>, vector<64x384xbf16>,
    %c0_211 = arith.constant 0 : index
    %c75_212 = arith.constant 75 : index
    %146 = vector.load %arg10[%c0_211, %c75_212] : memref<64x512xbf16, #tpu.memory_space<vmem>>, vector<64x384xbf16>
    %c192_213 = arith.constant 192 : index
    %c0_214 = arith.constant 0 : index
    %147 = vector.load %arg12[%c192_213, %c0_214] : memref<320x384xbf16, #tpu.memory_space<vmem>>, vector<64x384xbf16>
    tpu.vector_store %arg12[%c192_213, %c0_214], %146 {strides = array<i32>} : memref<320x384xbf16, #tpu.memory_space<vmem>>, vector<64x384xbf16>,
    %c0_215 = arith.constant 0 : index
    %c76_216 = arith.constant 76 : index
    %148 = vector.load %arg10[%c0_215, %c76_216] : memref<64x512xbf16, #tpu.memory_space<vmem>>, vector<64x384xbf16>
    %c256_217 = arith.constant 256 : index
    %c0_218 = arith.constant 0 : index
    %149 = vector.load %arg12[%c256_217, %c0_218] : memref<320x384xbf16, #tpu.memory_space<vmem>>, vector<64x384xbf16>
    tpu.vector_store %arg12[%c256_217, %c0_218], %148 {strides = array<i32>} : memref<320x384xbf16, #tpu.memory_space<vmem>>, vector<64x384xbf16>,
    %c3_219 = arith.constant 3 : index
    %c0_220 = arith.constant 0 : index
    %c0_221 = arith.constant 0 : index
    %150 = vector.load %arg7[%c3_219, %c0_220, %c0_221] : memref<5x16x320xbf16, #tpu.memory_space<vmem>>, vector<1x16x320xbf16>
    %151 = vector.shape_cast %150 : vector<1x16x320xbf16> to vector<16x320xbf16>
    %c0_222 = arith.constant 0 : index
    %c0_223 = arith.constant 0 : index
    %152 = vector.load %arg12[%c0_222, %c0_223] : memref<320x384xbf16, #tpu.memory_space<vmem>>, vector<320x384xbf16>
    %cst_224 = arith.constant dense<0.000000e+00> : vector<16x384xf32>
    %153 = tpu.matmul %151, %152, %cst_224 {dimension_numbers = #tpu.dot_dimension_numbers<[1], [0], [0], [1], [0, 0, 1, 1], [], []>} : vector<16x320xbf16>, vector<320x384xbf16>, vector<16x384xf32> -> vector<16x384xf32>
    %154 = arith.addf %139, %153 : vector<16x384xf32>
    %c0_225 = arith.constant 0 : index
    %c96_226 = arith.constant 96 : index
    %155 = vector.load %arg10[%c0_225, %c96_226] : memref<64x512xbf16, #tpu.memory_space<vmem>>, vector<64x384xbf16>
    %c0_227 = arith.constant 0 : index
    %c0_228 = arith.constant 0 : index
    %156 = vector.load %arg12[%c0_227, %c0_228] : memref<320x384xbf16, #tpu.memory_space<vmem>>, vector<64x384xbf16>
    tpu.vector_store %arg12[%c0_227, %c0_228], %155 {strides = array<i32>} : memref<320x384xbf16, #tpu.memory_space<vmem>>, vector<64x384xbf16>,
    %c0_229 = arith.constant 0 : index
    %c97_230 = arith.constant 97 : index
    %157 = vector.load %arg10[%c0_229, %c97_230] : memref<64x512xbf16, #tpu.memory_space<vmem>>, vector<64x384xbf16>
    %c64_231 = arith.constant 64 : index
    %c0_232 = arith.constant 0 : index
    %158 = vector.load %arg12[%c64_231, %c0_232] : memref<320x384xbf16, #tpu.memory_space<vmem>>, vector<64x384xbf16>
    tpu.vector_store %arg12[%c64_231, %c0_232], %157 {strides = array<i32>} : memref<320x384xbf16, #tpu.memory_space<vmem>>, vector<64x384xbf16>,
    %c0_233 = arith.constant 0 : index
    %c98_234 = arith.constant 98 : index
    %159 = vector.load %arg10[%c0_233, %c98_234] : memref<64x512xbf16, #tpu.memory_space<vmem>>, vector<64x384xbf16>
    %c128_235 = arith.constant 128 : index
    %c0_236 = arith.constant 0 : index
    %160 = vector.load %arg12[%c128_235, %c0_236] : memref<320x384xbf16, #tpu.memory_space<vmem>>, vector<64x384xbf16>
    tpu.vector_store %arg12[%c128_235, %c0_236], %159 {strides = array<i32>} : memref<320x384xbf16, #tpu.memory_space<vmem>>, vector<64x384xbf16>,
    %c0_237 = arith.constant 0 : index
    %c99_238 = arith.constant 99 : index
    %161 = vector.load %arg10[%c0_237, %c99_238] : memref<64x512xbf16, #tpu.memory_space<vmem>>, vector<64x384xbf16>
    %c192_239 = arith.constant 192 : index
    %c0_240 = arith.constant 0 : index
    %162 = vector.load %arg12[%c192_239, %c0_240] : memref<320x384xbf16, #tpu.memory_space<vmem>>, vector<64x384xbf16>
    tpu.vector_store %arg12[%c192_239, %c0_240], %161 {strides = array<i32>} : memref<320x384xbf16, #tpu.memory_space<vmem>>, vector<64x384xbf16>,
    %c0_241 = arith.constant 0 : index
    %c100_242 = arith.constant 100 : index
    %163 = vector.load %arg10[%c0_241, %c100_242] : memref<64x512xbf16, #tpu.memory_space<vmem>>, vector<64x384xbf16>
    %c256_243 = arith.constant 256 : index
    %c0_244 = arith.constant 0 : index
    %164 = vector.load %arg12[%c256_243, %c0_244] : memref<320x384xbf16, #tpu.memory_space<vmem>>, vector<64x384xbf16>
    tpu.vector_store %arg12[%c256_243, %c0_244], %163 {strides = array<i32>} : memref<320x384xbf16, #tpu.memory_space<vmem>>, vector<64x384xbf16>,
    %c4_245 = arith.constant 4 : index
    %c0_246 = arith.constant 0 : index
    %c0_247 = arith.constant 0 : index
    %165 = vector.load %arg7[%c4_245, %c0_246, %c0_247] : memref<5x16x320xbf16, #tpu.memory_space<vmem>>, vector<1x16x320xbf16>
    %166 = vector.shape_cast %165 : vector<1x16x320xbf16> to vector<16x320xbf16>
    %c0_248 = arith.constant 0 : index
    %c0_249 = arith.constant 0 : index
    %167 = vector.load %arg12[%c0_248, %c0_249] : memref<320x384xbf16, #tpu.memory_space<vmem>>, vector<320x384xbf16>
    %cst_250 = arith.constant dense<0.000000e+00> : vector<16x384xf32>
    %168 = tpu.matmul %166, %167, %cst_250 {dimension_numbers = #tpu.dot_dimension_numbers<[1], [0], [0], [1], [0, 0, 1, 1], [], []>} : vector<16x320xbf16>, vector<320x384xbf16>, vector<16x384xf32> -> vector<16x384xf32>
    %169 = arith.addf %154, %168 : vector<16x384xf32>
    %170 = vector.broadcast %93 : vector<16x1xf32> to vector<16x384xf32>
    %171 = arith.addf %169, %170 : vector<16x384xf32>
    %c0_251 = arith.constant 0 : index
    %c0_252 = arith.constant 0 : index
    %c0_253 = arith.constant 0 : index
    %c0_254 = arith.constant 0 : index
    %172 = vector.load %arg9[%c0_251, %c0_252, %c0_253, %c0_254] : memref<1x1x16x384xf32, #tpu.memory_space<vmem>>, vector<1x1x16x384xf32>
    %173 = vector.shape_cast %172 : vector<1x1x16x384xf32> to vector<16x384xf32>
    %174 = vector.shape_cast %171 : vector<16x384xf32> to vector<1x1x16x384xf32>
    tpu.vector_store %arg9[%c0_251, %c0_252, %c0_253, %c0_254], %174 {strides = array<i32>} : memref<1x1x16x384xf32, #tpu.memory_space<vmem>>, vector<1x1x16x384xf32>,
    return
  }
  func.func @transform_0(%arg0: i32, %arg1: i32) -> (i32, i32, i32, i32) {
    %c0_i32 = arith.constant 0 : i32
    %c0_i32_0 = arith.constant 0 : i32
    %c0_i32_1 = arith.constant 0 : i32
    return %arg0, %arg1, %c0_i32, %c0_i32_0 : i32, i32, i32, i32
  }
  func.func @transform_1(%arg0: i32, %arg1: i32) -> (i32, i32, i32) {
    %c0_i32 = arith.constant 0 : i32
    %c0_i32_0 = arith.constant 0 : i32
    %c0_i32_1 = arith.constant 0 : i32
    return %arg1, %c0_i32, %c0_i32_0 : i32, i32, i32
  }
  func.func @transform_2(%arg0: i32, %arg1: i32) -> (i32, i32) {
    %c0_i32 = arith.constant 0 : i32
    %c0_i32_0 = arith.constant 0 : i32
    %c0_i32_1 = arith.constant 0 : i32
    return %c0_i32, %c0_i32_0 : i32, i32
  }
  func.func @transform_3(%arg0: i32, %arg1: i32) -> (i32, i32) {
    %c0_i32 = arith.constant 0 : i32
    %c0_i32_0 = arith.constant 0 : i32
    %c0_i32_1 = arith.constant 0 : i32
    return %c0_i32, %c0_i32_0 : i32, i32
  }
  func.func @transform_4(%arg0: i32, %arg1: i32) -> (i32, i32) {
    %c0_i32 = arith.constant 0 : i32
    %c0_i32_0 = arith.constant 0 : i32
    %c0_i32_1 = arith.constant 0 : i32
    return %c0_i32, %c0_i32_0 : i32, i32
  }
  func.func @transform_5(%arg0: i32, %arg1: i32) -> (i32, i32, i32) {
    %c0_i32 = arith.constant 0 : i32
    %c0_i32_0 = arith.constant 0 : i32
    %c0_i32_1 = arith.constant 0 : i32
    %c0_i32_2 = arith.constant 0 : i32
    return %c0_i32, %c0_i32_0, %c0_i32_1 : i32, i32, i32
  }
  func.func @transform_6(%arg0: i32, %arg1: i32) -> (i32, i32) {
    %c0_i32 = arith.constant 0 : i32
    %c0_i32_0 = arith.constant 0 : i32
    %c0_i32_1 = arith.constant 0 : i32
    return %c0_i32, %c0_i32_0 : i32, i32
  }
  func.func @transform_7(%arg0: i32, %arg1: i32) -> (i32, i32, i32, i32) {
    %c0_i32 = arith.constant 0 : i32
    %c0_i32_0 = arith.constant 0 : i32
    %c0_i32_1 = arith.constant 0 : i32
    return %arg0, %arg1, %c0_i32, %c0_i32_0 : i32, i32, i32, i32
  }
}

</mosaic_0001>

<bundles_post_ra>
// kernel: tile.8
= control target key start
LH: loop header
LB: loop body
LE: loop exit
PB: predicated region body
PF: predicated region fallthrough
CT: control target
= control target key end

     0   :  { %2 = vsyncpa [#allocation1], 0  ;;  %s44_s6 = smov [#allocation0]   ;;  %s70_s0 = inlined_call_operand.hbm [shape: f32[3], index: 0, kind: input, shape index: {}]   ;;  %s71_s1 = inlined_call_operand.vmem [shape: f32[4,3], index: 1, kind: output, shape index: {}]  }
   0x1   :  { %s9_s7 = sshll.u32 %s44_s6, 4  ;;  %s20_s10 = scalar_lea.hbm %s70_s0, 16  ;;  %s10_s7 = int_to_ptr.vmem [resolvable:$true] %s9_s7 }
   0x2   :  { %p21_p0 = scmp.ne.s32.totalorder %s70_s0, %s20_s10  ;;  %p24_p1 = scmp.lt.u32.totalorder %s20_s10, %s70_s0 }
   0x4   :  { %p26_p2 = pnand %p24_p1, %p21_p0 }
   0x6   :  { %29 = shalt.err (!%p26_p2)
}
   0x7   :  { %s30_s15 = scalar_lea.vmem %s10_s7, 16  ;;  %s34_s16 = scalar_lea.vmem %s10_s7, 32 }
   0x8   :  { %p31_p3 = scmp.ne.s32.totalorder %s10_s7, %s30_s15  ;;  %p35_p4 = scmp.lt.s32.totalorder %s10_s7, %s10_s7 }
   0x9   :  { %p36_p5 = scmp.lt.s32.totalorder %s34_s16, %s30_s15 }
   0xb   :  { %p37_p6 = por %p36_p5, %p35_p4 }
   0xd   :  { %p38_p7 = pnand %p37_p6, %p31_p3 }
   0xf   :  { %41 = shalt.err (!%p38_p7)
}
  0x10   :  { %12 = dma.hbm_to_vmem [thread:$0]  %s70_s0, 16, %s10_s7, [#allocation1]  }
  0x11   :  { %42 = dma.done.wait [#allocation1], 16  }
  0x12   :  { %43 = vsyncadd [#allocation1], 4294967280  ;;  %v16_v0 = vld [vmem:[#allocation0] ss:$0 sm:$0xff] }
  0x13   :  { %17 = vst [vmem:[%s71_s1] sm:$0xf] %v16_v0 }
  0x14   :  { %18 = vsyncpa [#allocation1], 1 }

// kernel: tile.9
= control target key start
LH: loop header
LB: loop body
LE: loop exit
PB: predicated region body
PF: predicated region fallthrough
CT: control target
= control target key end

     0   :  { %vm7_vm0 = vcmask 23552   ;;  %s37_s8 = smov 3   ;;  %s38_s9 = smov 6   ;;  %vm13_vm1 = vcmask 97352   ;;  %vm19_vm2 = vcmask 72752   ;;  %vm25_vm3 = vcmask 48152   ;;  %s55_s0 = inlined_call_operand.vmem [shape: f32[4,3], index: 0, kind: input, shape index: {}]   ;;  %s56_s1 = inlined_call_operand.vmem [shape: f32[12], index: 1, kind: output, shape index: {}]  }
   0x1   :  { %v4_v0 = vld [vmem:[%s55_s0] sm:$0xf]  ;;  %s36_s0 = smov 9  }
   0x2   :  { %5 = vst [vmem:[#allocation1] sm:$0xf] %v4_v0 }
   0x9   :  { %v10_v1 = vld [vmem:[#allocation1 + $0x3] sm:$0x1]   ;;  %v22_v2 = vld [vmem:[#allocation1 + $0x1] sm:$0x1]   ;;  %v6_v3 = vld [vmem:[#allocation1] sm:$0x1]  }
   0xa   :  { %11 = vrot.lane.b32.xlu0 %v10_v1, %s36_s0  ;;  %23 = vrot.lane.b32.xlu1 %v22_v2, %s37_s8  ;;  %v16_v4 = vld [vmem:[#allocation1 + $0x2] sm:$0x1]   ;;  %8 = vst.msk [vmem:[#allocation0] sm:$0x1] %vm7_vm0, %v6_v3  }
   0xe   :  { %17 = vrot.lane.b32.xlu0 %v16_v4, %s38_s9 }
  0x7c   :  { %v12_v5 = vpop.permute.xlu0 %11   ;;  %v24_v6 = vpop.permute.xlu1 %23  }
  0x7d   :  { %14 = vst.msk [vmem:[#allocation0] sm:$0x1] %vm13_vm1, %v12_v5  }
  0x80   :  { %v18_v7 = vpop.permute.xlu0 %17  }
  0x81   :  { %20 = vst.msk [vmem:[#allocation0] sm:$0x1] %vm19_vm2, %v18_v7  }
  0x82   :  { %26 = vst.msk [vmem:[#allocation0] sm:$0x1] %vm25_vm3, %v24_v6  }
  0x89   :  { %v30_v8 = vld [vmem:[#allocation0] sm:$0x1] }
  0x8a   :  { %32 = vst [vmem:[%s56_s1] sm:$0x1] %v30_v8 }

// kernel: fsrcnn_forward.1
= control target key start
LH: loop header
LB: loop body
LE: loop exit
PB: predicated region body
PF: predicated region fallthrough
CT: control target
= control target key end

     0   :  { %s6421_s24 = smov 0   ;;  %s6423_s25 = smov 0   ;;  %s8723_s0 = inlined_call_operand.vmem [shape: f32[2,1,8,640], index: 0, kind: input, shape index: {}]   ;;  %s8724_s1 = inlined_call_operand.vmem [shape: f32[1,1,512], index: 1, kind: input, shape index: {}]   ;;  %s8725_s2 = inlined_call_operand.vmem [shape: f32[64,200], index: 2, kind: input, shape index: {}]   ;;  %s8726_s3 = inlined_call_operand.vmem [shape: f32[64,1], index: 3, kind: input, shape index: {}]   ;;  %s8727_s4 = inlined_call_operand.vmem [shape: f32[64,1], index: 4, kind: input, shape index: {}]   ;;  %s8728_s5 = inlined_call_operand.vmem [shape: bf16[5,16,320], index: 5, kind: input, shape index: {}]   ;;  %s8729_s6 = inlined_call_operand.vmem [shape: f32[16,1], index: 6, kind: input, shape index: {}]   ;;  %s8730_s7 = inlined_call_operand.vmem [shape: f32[2,1,16,384], index: 7, kind: output, shape index: {}]  }
   0x1   :  { %s6425_s26 = smov 0  }
   0x2 LB: > { %s29_s27 = sadd.s32 1, %s6348_s25  ;;  %p5636_p0 = scmp.ge.s32.totalorder %s6352_s26, 1  ;;  %s6352_s26 = sphi %s6425_s26, %s17_s26   ;;  %s6348_s25 = sphi %s6423_s25, %s9110_s25   ;;  %s6344_s24 = sphi %s6421_s24, %s9109_s24  }
   0x3   : > { %p31_p1 = scmp.ge.s32.totalorder %s29_s27, 2  ;;  %p266_p2 = scmp.lt.s32.totalorder %s6352_s26, 3 }
   0x5   : > { %s9112_s27 = smov (%p31_p1, %s29_s27), 0  ;;  %p267_p3 = pnand %p5636_p0, %p266_p2 }
   0x7   : > { %270 = sbr.rel (%p267_p3) target bundleno = 1617 (0x651), region = 48 }
   0xe   : > { %p310_p4 = scmp.lt.s32.totalorder %s6344_s24, 1  ;;  %s6354_s9 = smov 127   ;;  %vm393_vm0 = vcmask 1039360   ;;  %vm426_vm1 = vcmask 1031168   ;;  %vm459_vm2 = vcmask 1022976   ;;  %v334_v51 = vld [vmem:[%s8725_s2 + $0x8] sm:$0xff] }
   0xf   : > { %s6355_s10 = smov 126   ;;  %s6356_s11 = smov 125   ;;  %vm1305_vm3 = vcmask 588800   ;;  %vm8770_vm4 = vcmask 1014784   ;;  %vm525_vm5 = vcmask 850944   ;;  %vm558_vm6 = vcmask 842752  }
  0x10   : > { %s9114_s24 = smov (!%p310_p4, %s6344_s24), 1  ;;  %s6357_s12 = smov 124   ;;  %5647 = vmatprep.mubr.msk.f32.mxu1 %vm1305_vm3, %v334_v51  ;;  %5639 = vmatprep.mubr.msk.f32.mxu0 %vm1305_vm3, %v334_v51  ;;  %vm591_vm7 = vcmask 834560   ;;  %vm624_vm8 = vcmask 826368   ;;  %vm657_vm9 = vcmask 818176   ;;  %vm690_vm10 = vcmask 654336  }
  0x11   : > { %s6025_s28 = smul.u32 40, %s9114_s24  ;;  %s6358_s13 = smov 104   ;;  %vm723_vm11 = vcmask 646144   ;;  %vm8754_vm12 = vcmask 637952   ;;  %vm8753_vm13 = vcmask 629760   ;;  %vm8756_vm14 = vcmask 621568  }
  0x12   : > { %s6359_s14 = smov 103   ;;  %s6360_s15 = smov 102   ;;  %vm8755_vm15 = vcmask 457728  }
  0x13   : > { %s318_s8 = scalar_lea.vmem %s8723_s0, %s6025_s28  ;;  %s6361_s16 = smov 101  }
  0x14   : > { %v6445_v0 = vld [vmem:[%s318_s8 + $0x20] sm:$0xff]  ;;  %v6449_v2 = vld [vmem:[%s318_s8 + $0x8] sm:$0xff]  ;;  %v6457_v4 = vld [vmem:[%s318_s8 + $0x10] sm:$0xff]  ;;  %s6362_s17 = smov 100   ;;  %s6363_s18 = smov 80  }
  0x15   : > { %v6447_v1 = vld [vmem:[%s318_s8] sm:$0xff]  ;;  %391 = vrot.lane.b32.xlu1 %v6445_v0, %s6354_s9  ;;  %v6459_v5 = vld [vmem:[%s318_s8 + $0x18] sm:$0xff]  ;;  %s6364_s19 = smov 79   ;;  %s8764_s20 = smov 78   ;;  %v6549_v8 = vpack.i.bf16 %v6457_v4, %v6449_v2 }
  0x16   : > { %v6455_v3 = vpack.i.bf16 %v6449_v2, %v6447_v1  ;;  %v6083_v6 = vpack.i.bf16 %v6459_v5, %v6457_v4  ;;  %s8762_s21 = smov 77   ;;  %s8751_s22 = smov 76   ;;  %v6243_v7 = vpack.i.bf16 %v6445_v0, %v6459_v5 }
  0x17   : > { %s8749_s23 = smov 56   ;;  %s8731_s28 = smov 55  }
  0x18   : > { %6079 = vrot.lane.b32.xlu0 %v6455_v3, %s6354_s9  ;;  %s8733_s29 = smov 54   ;;  %s8741_s30 = smov 53  }
  0x19   : > { %6089 = vrot.lane.b32.xlu1 %v6455_v3, %s6355_s10  ;;  %s8735_s8 = smov 52  }
  0x1c   : > { %6084 = vrot.lane.b32.xlu0 %v6083_v6, %s6354_s9 }
  0x1d   : > { %424 = vrot.lane.b32.xlu1 %v6445_v0, %s6355_s10 }
  0x20   : > { %6094 = vrot.lane.b32.xlu0 %v6083_v6, %s6355_s10 }
  0x21   : > { %6104 = vrot.lane.b32.xlu1 %v6083_v6, %s6356_s11 }
  0x24   : > { %6099 = vrot.lane.b32.xlu0 %v6455_v3, %s6356_s11 }
  0x25   : > { %6109 = vrot.lane.b32.xlu1 %v6455_v3, %s6357_s12 }
  0x28   : > { %457 = vrot.lane.b32.xlu0 %v6445_v0, %s6356_s11 }
  0x29   : > { %490 = vrot.lane.b32.xlu1 %v6445_v0, %s6357_s12 }
  0x2c   : > { %6114 = vrot.lane.b32.xlu0 %v6083_v6, %s6357_s12 }
  0x2d   : > { %6124 = vrot.lane.b32.xlu1 %v6083_v6, %s6358_s13 }
  0x30   : > { %6119 = vrot.lane.b32.xlu0 %v6455_v3, %s6358_s13 }
  0x31   : > { %6129 = vrot.lane.b32.xlu1 %v6455_v3, %s6359_s14 }
  0x34   : > { %523 = vrot.lane.b32.xlu0 %v6445_v0, %s6358_s13 }
  0x35   : > { %556 = vrot.lane.b32.xlu1 %v6445_v0, %s6359_s14 }
  0x38   : > { %6134 = vrot.lane.b32.xlu0 %v6083_v6, %s6359_s14 }
  0x39   : > { %6144 = vrot.lane.b32.xlu1 %v6083_v6, %s6360_s15 }
  0x3c   : > { %6139 = vrot.lane.b32.xlu0 %v6455_v3, %s6360_s15 }
  0x3d   : > { %6149 = vrot.lane.b32.xlu1 %v6455_v3, %s6361_s16 }
  0x40   : > { %589 = vrot.lane.b32.xlu0 %v6445_v0, %s6360_s15 }
  0x41   : > { %622 = vrot.lane.b32.xlu1 %v6445_v0, %s6361_s16 }
  0x44   : > { %6154 = vrot.lane.b32.xlu0 %v6083_v6, %s6361_s16 }
  0x45   : > { %6164 = vrot.lane.b32.xlu1 %v6083_v6, %s6362_s17 }
  0x48   : > { %6159 = vrot.lane.b32.xlu0 %v6455_v3, %s6362_s17 }
  0x49   : > { %6169 = vrot.lane.b32.xlu1 %v6455_v3, %s6363_s18 }
  0x4c   : > { %655 = vrot.lane.b32.xlu0 %v6445_v0, %s6362_s17 }
  0x4d   : > { %688 = vrot.lane.b32.xlu1 %v6445_v0, %s6363_s18 }
  0x50   : > { %6174 = vrot.lane.b32.xlu0 %v6083_v6, %s6363_s18 }
  0x51   : > { %6184 = vrot.lane.b32.xlu1 %v6083_v6, %s6364_s19 }
  0x54   : > { %6179 = vrot.lane.b32.xlu0 %v6455_v3, %s6364_s19 }
  0x55   : > { %6189 = vrot.lane.b32.xlu1 %v6455_v3, %s8764_s20 }
  0x58   : > { %721 = vrot.lane.b32.xlu0 %v6445_v0, %s6364_s19 }
  0x59   : > { %754 = vrot.lane.b32.xlu1 %v6445_v0, %s8764_s20 }
  0x5c   : > { %6194 = vrot.lane.b32.xlu0 %v6083_v6, %s8764_s20  ;;  %s8992_s20 = smov 32  }
  0x5d   : > { %6204 = vrot.lane.b32.xlu1 %v6083_v6, %s8762_s21 }
  0x60   : > { %6199 = vrot.lane.b32.xlu0 %v6455_v3, %s8762_s21 }
  0x61   : > { %6209 = vrot.lane.b32.xlu1 %v6455_v3, %s8751_s22 }
  0x64   : > { %787 = vrot.lane.b32.xlu0 %v6445_v0, %s8762_s21  ;;  %s9003_s21 = smov 31  }
  0x65   : > { %820 = vrot.lane.b32.xlu1 %v6445_v0, %s8751_s22 }
  0x68   : > { %6214 = vrot.lane.b32.xlu0 %v6083_v6, %s8751_s22  ;;  %s8871_s22 = smov 56  }
  0x69   : > { %6224 = vrot.lane.b32.xlu1 %v6083_v6, %s8749_s23 }
  0x6c   : > { %6219 = vrot.lane.b32.xlu0 %v6455_v3, %s8749_s23 }
  0x6d   : > { %6229 = vrot.lane.b32.xlu1 %v6455_v3, %s8731_s28 }
  0x70   : > { %853 = vrot.lane.b32.xlu0 %v6445_v0, %s8749_s23 }
  0x71   : > { %886 = vrot.lane.b32.xlu1 %v6445_v0, %s8731_s28 }
  0x74   : > { %6234 = vrot.lane.b32.xlu0 %v6083_v6, %s8731_s28  ;;  %s8739_s28 = smov 32  }
  0x75   : > { %6244 = vrot.lane.b32.xlu1 %v6243_v7, %s8733_s29 }
  0x78   : > { %6239 = vrot.lane.b32.xlu0 %v6455_v3, %s8733_s29 }
  0x79   : > { %6249 = vrot.lane.b32.xlu1 %v6243_v7, %s8741_s30 }
  0x7c   : > { %915 = vrot.lane.b32.xlu0 %v6457_v4, %s8733_s29  ;;  %s8737_s29 = smov 31  }
  0x7d   : > { %6259 = vrot.lane.b32.xlu1 %v6549_v8, %s8741_s30 }
  0x80   : > { %6254 = vrot.lane.b32.xlu0 %v6243_v7, %s8735_s8 }
  0x81   : > { %944 = vrot.lane.b32.xlu1 %v6447_v1, %s8741_s30  ;;  %s8891_s30 = smov 55  }
  0x84   : > { %6264 = vrot.lane.b32.xlu0 %v6549_v8, %s8735_s8 }
  0x85   : > { %6269 = vrot.lane.b32.xlu1 %v6243_v7, %s8739_s28 }
  0x87   : > { %v392_v9 = vpop.permute.xlu1 %391 }
  0x88   : > { %977 = vrot.lane.b32.xlu0 %v6447_v1, %s8735_s8  ;;  %s8743_s8 = smov 30  }
  0x89   : > { %6279 = vrot.lane.b32.xlu1 %v6549_v8, %s8739_s28 }
  0x8a   : > { %v6080_v10 = vpop.permute.xlu0 %6079 }
  0x8b   : > { %v6082_v11 = vunpack.i.h.bf16 %v6080_v10  ;;  %v6081_v12 = vunpack.i.l.bf16 %v6080_v10  ;;  %v6090_v13 = vpop.permute.xlu1 %6089 }
  0x8c   : > { %6274 = vrot.lane.b32.xlu0 %v6243_v7, %s8737_s29  ;;  %v6092_v28 = vunpack.i.h.bf16 %v6090_v13  ;;  %v6091_v29 = vunpack.i.l.bf16 %v6090_v13 }
  0x8d   : > { %1010 = vrot.lane.b32.xlu1 %v6447_v1, %s8739_s28  ;;  %v394_v18 = vsel %vm393_vm0, %v6081_v12, %v6082_v11 }
  0x8e   : > { %v6085_v14 = vpop.permute.xlu0 %6084  ;;  %v5895_v26 = vpack.c.bf16 %v394_v18, %v6447_v1  ;;  %v427_v40 = vsel %vm426_vm1, %v6091_v29, %v6092_v28 }
  0x8f   : > { %v6087_v15 = vunpack.i.h.bf16 %v6085_v14  ;;  %v6086_v16 = vunpack.i.l.bf16 %v6085_v14  ;;  %v425_v17 = vpop.permute.xlu1 %424 }
  0x90   : > { %6284 = vrot.lane.b32.xlu0 %v6549_v8, %s8737_s29 }
  0x91   : > { %v395_v19 = vsel %vm393_vm0, %v6082_v11, %v6086_v16  ;;  %v397_v20 = vsel %vm393_vm0, %v6087_v15, %v392_v9  ;;  %v396_v21 = vsel %vm393_vm0, %v6086_v16, %v6087_v15  ;;  %6289 = vrot.lane.b32.xlu1 %v6243_v7, %s8743_s8 }
  0x92   : > { %v6095_v22 = vpop.permute.xlu0 %6094  ;;  %v5893_v23 = vpack.c.bf16 %v395_v19, %v6449_v2  ;;  %v5941_v24 = vpack.c.bf16 %v397_v20, %v6459_v5  ;;  %v5943_v25 = vpack.c.bf16 %v396_v21, %v6457_v4 }
  0x93   : > { %v6105_v27 = vpop.permute.xlu1 %6104  ;;  %v6096_v30 = vunpack.i.l.bf16 %v6095_v22  ;;  %v6097_v34 = vunpack.i.h.bf16 %v6095_v22 }
  0x94   : > { %1043 = vrot.lane.b32.xlu0 %v6447_v1, %s8737_s29  ;;  %5894 = vmatprep.subr.bf16.mxu0 %v5893_v23  ;;  %v6107_v31 = vunpack.i.h.bf16 %v6105_v27  ;;  %v6106_v32 = vunpack.i.l.bf16 %v6105_v27  ;;  %s8747_s29 = smov 29  }
  0x95   : > { %5942 = vmatprep.subr.bf16.mxu1 %v5941_v24  ;;  %5896 = vmatpush1.bf16.msra.mxu0 %v5895_v26  ;;  %v428_v38 = vsel %vm426_vm1, %v6092_v28, %v6096_v30  ;;  %v430_v46 = vsel %vm426_vm1, %v6097_v34, %v425_v17  ;;  %v429_v50 = vsel %vm426_vm1, %v6096_v30, %v6097_v34 }
  0x96   : > { %5944 = vmatpush1.bf16.msra.mxu1 %v5943_v25  ;;  %6299 = vrot.lane.b32.xlu1 %v6549_v8, %s8743_s8  ;;  %v6100_v33 = vpop.permute.xlu0 %6099  ;;  %v462_v45 = vsel %vm459_vm2, %v6106_v32, %v6107_v31 }
  0x97   : > { %v6102_v35 = vunpack.i.h.bf16 %v6100_v33  ;;  %v6101_v36 = vunpack.i.l.bf16 %v6100_v33  ;;  %v6110_v37 = vpop.permute.xlu1 %6109  ;;  %v5947_v52 = vpack.c.bf16 %v462_v45, %v429_v50  ;;  %v349_v50 = vld [vmem:[%s8726_s3] sm:$0xff] }
  0x98   : > { %6294 = vrot.lane.b32.xlu0 %v6243_v7, %s8747_s29  ;;  %v6112_v55 = vunpack.i.h.bf16 %v6110_v37  ;;  %v6111_v56 = vunpack.i.l.bf16 %v6110_v37 }
  0x99   : > { %v461_v39 = vsel %vm459_vm2, %v6102_v35, %v6106_v32  ;;  %v460_v41 = vsel %vm459_vm2, %v6101_v36, %v6102_v35 }
  0x9a   : > { %1076 = vrot.lane.b32.xlu1 %v6447_v1, %s8743_s8  ;;  %v458_v42 = vpop.permute.xlu0 %457  ;;  %v5897_v43 = vpack.c.bf16 %v461_v39, %v428_v38  ;;  %v5899_v44 = vpack.c.bf16 %v460_v41, %v427_v40  ;;  %s8745_s8 = smov 28   ;;  %v493_v7 = vsel %vm8770_vm4, %v6111_v56, %v6112_v55 }
  0x9b   : > { %v463_v47 = vsel %vm459_vm2, %v6107_v31, %v458_v42  ;;  %v491_v49 = vpop.permute.xlu1 %490 }
  0x9c   : > { %v5945_v48 = vpack.c.bf16 %v463_v47, %v430_v46  ;;  %6304 = vrot.lane.b32.xlu0 %v6549_v8, %s8747_s29  ;;  %5898 = vmatprep.subr.bf16.mxu0 %v5897_v43 }
  0x9d   : > { %5900 = vmatpush1.bf16.msra.mxu0 %v5899_v44 }
  0x9e   : > { %1148 = vrot.lane.b32.xlu1 %v6459_v5, %s8745_s8  ;;  %v6115_v53 = vpop.permute.xlu0 %6114  ;;  %5946 = vmatprep.subr.bf16.mxu1 %v5945_v48 }
  0x9f   : > { %5948 = vmatpush1.bf16.msra.mxu1 %v5947_v52  ;;  %v6125_v54 = vpop.permute.xlu1 %6124  ;;  %v6116_v57 = vunpack.i.l.bf16 %v6115_v53  ;;  %v6117_v61 = vunpack.i.h.bf16 %v6115_v53 }
  0xa0   : > { %1109 = vrot.lane.b32.xlu0 %v6447_v1, %s8747_s29  ;;  %v6127_v58 = vunpack.i.h.bf16 %v6125_v54  ;;  %v6126_v59 = vunpack.i.l.bf16 %v6125_v54  ;;  %v8771_v54 = vmov 0  }
  0xa1   : > { %v494_v5 = vsel %vm8770_vm4, %v6112_v55, %v6116_v57  ;;  %v496_v12 = vsel %vm8770_vm4, %v6117_v61, %v491_v49  ;;  %v495_v15 = vsel %vm8770_vm4, %v6116_v57, %v6117_v61  ;;  %v350_v49 = vld [vmem:[%s8726_s3 + $0x8] sm:$0xff]  ;;  %6309 = vset.pattern.permute.xlu1 %v8771_v54  ;;  %6308 = vset.pattern.permute.xlu0 %v8771_v54 }
  0xa2   : > { %1144 = vrot.lane.b32.xlu1 %v6449_v2, %s8745_s8  ;;  %v6120_v60 = vpop.permute.xlu0 %6119  ;;  %v528_v11 = vsel %vm525_vm5, %v6126_v59, %v6127_v58 }
  0xa3   : > { %v6122_v62 = vunpack.i.h.bf16 %v6120_v60  ;;  %v6121_v63 = vunpack.i.l.bf16 %v6120_v60  ;;  %v6130_v3 = vpop.permute.xlu1 %6129  ;;  %v5951_v16 = vpack.c.bf16 %v528_v11, %v495_v15  ;;  %v351_v60 = vld [vmem:[%s8726_s3 + $0x10] sm:$0xff]  ;;  %v353_v11 = vld [vmem:[%s8726_s3 + $0x20] sm:$0xff] }
  0xa4   : > { %1150 = vrot.lane.b32.xlu0 %v6445_v0, %s8745_s8  ;;  %v6132_v18 = vunpack.i.h.bf16 %v6130_v3  ;;  %v6131_v19 = vunpack.i.l.bf16 %v6130_v3 }
  0xa5   : > { %v527_v6 = vsel %vm525_vm5, %v6122_v62, %v6126_v59  ;;  %v526_v8 = vsel %vm525_vm5, %v6121_v63, %v6122_v62 }
  0xa6   : > { %1142 = vrot.lane.b32.xlu1 %v6447_v1, %s8745_s8  ;;  %v524_v2 = vpop.permute.xlu0 %523  ;;  %v5901_v9 = vpack.c.bf16 %v527_v6, %v494_v5  ;;  %v5903_v10 = vpack.c.bf16 %v526_v8, %v493_v7  ;;  %v559_v29 = vsel %vm558_vm6, %v6131_v19, %v6132_v18  ;;  %v352_v5 = vld [vmem:[%s8726_s3 + $0x18] sm:$0xff] }
  0xa7   : > { %v529_v0 = vsel %vm525_vm5, %v6127_v58, %v524_v2  ;;  %v557_v14 = vpop.permute.xlu1 %556 }
  0xa8   : > { %v5949_v13 = vpack.c.bf16 %v529_v0, %v496_v12  ;;  %1146 = vrot.lane.b32.xlu0 %v6457_v4, %s8745_s8  ;;  %5902 = vmatprep.subr.bf16.mxu0 %v5901_v9  ;;  %v354_v0 = vld [vmem:[%s8726_s3 + $0x28] sm:$0xff] }
  0xa9   : > { %5904 = vmatpush1.bf16.msra.mxu0 %v5903_v10 }
  0xaa   : > { %v6135_v1 = vpop.permute.xlu0 %6134  ;;  %5950 = vmatprep.subr.bf16.mxu1 %v5949_v13  ;;  %1272 = vperm.xlu1 %6309, %v350_v49  }
  0xab   : > { %5952 = vmatpush1.bf16.msra.mxu1 %v5951_v16  ;;  %v6145_v17 = vpop.permute.xlu1 %6144  ;;  %v6136_v20 = vunpack.i.l.bf16 %v6135_v1  ;;  %v6137_v24 = vunpack.i.h.bf16 %v6135_v1  ;;  %v355_v1 = vld [vmem:[%s8726_s3 + $0x30] sm:$0xff] }
  0xac   : > { %v6147_v21 = vunpack.i.h.bf16 %v6145_v17  ;;  %v6146_v22 = vunpack.i.l.bf16 %v6145_v17  ;;  %1267 = vperm.xlu0 %6308, %v349_v50  }
  0xad   : > { %v560_v27 = vsel %vm558_vm6, %v6132_v18, %v6136_v20  ;;  %v562_v35 = vsel %vm558_vm6, %v6137_v24, %v557_v14  ;;  %v561_v39 = vsel %vm558_vm6, %v6136_v20, %v6137_v24  ;;  %v356_v20 = vld [vmem:[%s8726_s3 + $0x38] sm:$0xff] }
  0xae   : > { %v6140_v23 = vpop.permute.xlu0 %6139  ;;  %v594_v34 = vsel %vm591_vm7, %v6146_v22, %v6147_v21  ;;  %1277 = vperm.xlu1 %6309, %v351_v60  }
  0xaf   : > { %v6142_v25 = vunpack.i.h.bf16 %v6140_v23  ;;  %v6141_v26 = vunpack.i.l.bf16 %v6140_v23  ;;  %v6150_v4 = vpop.permute.xlu1 %6149  ;;  %v5955_v40 = vpack.c.bf16 %v594_v34, %v561_v39 }
  0xb0   : > { %v6152_v43 = vunpack.i.h.bf16 %v6150_v4  ;;  %v6151_v44 = vunpack.i.l.bf16 %v6150_v4  ;;  %1282 = vperm.xlu0 %6308, %v352_v5  }
  0xb1   : > { %v593_v28 = vsel %vm591_vm7, %v6142_v25, %v6146_v22  ;;  %v592_v30 = vsel %vm591_vm7, %v6141_v26, %v6142_v25 }
  0xb2   : > { %v590_v31 = vpop.permute.xlu0 %589  ;;  %v5905_v32 = vpack.c.bf16 %v593_v28, %v560_v27  ;;  %v5907_v33 = vpack.c.bf16 %v592_v30, %v559_v29  ;;  %v625_v58 = vsel %vm624_vm8, %v6151_v44, %v6152_v43  ;;  %1287 = vperm.xlu1 %6309, %v353_v11   ;;  %v357_v28 = vld [vmem:[%s8727_s4] sm:$0xff] }
  0xb3   : > { %v595_v36 = vsel %vm591_vm7, %v6147_v21, %v590_v31  ;;  %v623_v38 = vpop.permute.xlu1 %622 }
  0xb4   : > { %v5953_v37 = vpack.c.bf16 %v595_v36, %v562_v35  ;;  %5906 = vmatprep.subr.bf16.mxu0 %v5905_v32  ;;  %1292 = vperm.xlu0 %6308, %v354_v0  }
  0xb5   : > { %5908 = vmatpush1.bf16.msra.mxu0 %v5907_v33  ;;  %v358_v33 = vld [vmem:[%s8727_s4 + $0x8] sm:$0xff] }
  0xb6   : > { %v6155_v41 = vpop.permute.xlu0 %6154  ;;  %5954 = vmatprep.subr.bf16.mxu1 %v5953_v37  ;;  %1297 = vperm.xlu1 %6309, %v355_v1  }
  0xb7   : > { %5956 = vmatpush1.bf16.msra.mxu1 %v5955_v40  ;;  %v6165_v42 = vpop.permute.xlu1 %6164  ;;  %v6156_v45 = vunpack.i.l.bf16 %v6155_v41  ;;  %v6157_v51 = vunpack.i.h.bf16 %v6155_v41  ;;  %v359_v40 = vld [vmem:[%s8727_s4 + $0x10] sm:$0xff] }
  0xb8   : > { %v6167_v46 = vunpack.i.h.bf16 %v6165_v42  ;;  %v6166_v47 = vunpack.i.l.bf16 %v6165_v42  ;;  %1302 = vperm.xlu0 %6308, %v356_v20   ;;  %v360_v42 = vld [vmem:[%s8727_s4 + $0x18] sm:$0xff] }
  0xb9   : > { %v626_v56 = vsel %vm624_vm8, %v6152_v43, %v6156_v45  ;;  %v628_v6 = vsel %vm624_vm8, %v6157_v51, %v623_v38  ;;  %v627_v9 = vsel %vm624_vm8, %v6156_v45, %v6157_v51  ;;  %v362_v51 = vld [vmem:[%s8727_s4 + $0x28] sm:$0xff] }
  0xba   : > { %v6160_v48 = vpop.permute.xlu0 %6159  ;;  %v660_v3 = vsel %vm657_vm9, %v6166_v47, %v6167_v46  ;;  %1590 = vperm.xlu1 %6309, %v357_v28  }
  0xbb   : > { %v6162_v52 = vunpack.i.h.bf16 %v6160_v48  ;;  %v6161_v53 = vunpack.i.l.bf16 %v6160_v48  ;;  %v6170_v55 = vpop.permute.xlu1 %6169  ;;  %v5959_v10 = vpack.c.bf16 %v660_v3, %v627_v9 }
  0xbc   : > { %v6172_v14 = vunpack.i.h.bf16 %v6170_v55  ;;  %v6171_v15 = vunpack.i.l.bf16 %v6170_v55  ;;  %1595 = vperm.xlu0 %6308, %v358_v33  }
  0xbd   : > { %v659_v57 = vsel %vm657_vm9, %v6162_v52, %v6166_v47  ;;  %v658_v59 = vsel %vm657_vm9, %v6161_v53, %v6162_v52  ;;  %v361_v47 = vld [vmem:[%s8727_s4 + $0x20] sm:$0xff] }
  0xbe   : > { %v656_v61 = vpop.permute.xlu0 %655  ;;  %v5909_v62 = vpack.c.bf16 %v659_v57, %v626_v56  ;;  %v5911_v63 = vpack.c.bf16 %v658_v59, %v625_v58  ;;  %v691_v4 = vsel %vm690_vm10, %v6171_v15, %v6172_v14  ;;  %1600 = vperm.xlu1 %6309, %v359_v40  }
  0xbf   : > { %v661_v7 = vsel %vm657_vm9, %v6167_v46, %v656_v61  ;;  %v689_v2 = vpop.permute.xlu1 %688  ;;  %v363_v61 = vld [vmem:[%s8727_s4 + $0x30] sm:$0xff] }
  0xc0   : > { %v5957_v8 = vpack.c.bf16 %v661_v7, %v628_v6  ;;  %5910 = vmatprep.subr.bf16.mxu0 %v5909_v62  ;;  %1605 = vperm.xlu0 %6308, %v360_v42   ;;  %v364_v6 = vld [vmem:[%s8727_s4 + $0x38] sm:$0xff] }
  0xc1   : > { %5912 = vmatpush1.bf16.msra.mxu0 %v5911_v63 }
  0xc2   : > { %v6175_v12 = vpop.permute.xlu0 %6174  ;;  %5958 = vmatprep.subr.bf16.mxu1 %v5957_v8  ;;  %1610 = vperm.xlu1 %6309, %v361_v47  }
  0xc3   : > { %5960 = vmatpush1.bf16.msra.mxu1 %v5959_v10  ;;  %v6185_v13 = vpop.permute.xlu1 %6184  ;;  %v6176_v16 = vunpack.i.l.bf16 %v6175_v12  ;;  %v6177_v21 = vunpack.i.h.bf16 %v6175_v12 }
  0xc4   : > { %v6187_v17 = vunpack.i.h.bf16 %v6185_v13  ;;  %v6186_v18 = vunpack.i.l.bf16 %v6185_v13  ;;  %1615 = vperm.xlu0 %6308, %v362_v51  }
  0xc5   : > { %v692_v25 = vsel %vm690_vm10, %v6172_v14, %v6176_v16  ;;  %v694_v34 = vsel %vm690_vm10, %v6177_v21, %v689_v2  ;;  %v693_v38 = vsel %vm690_vm10, %v6176_v16, %v6177_v21 }
  0xc6   : > { %v6180_v19 = vpop.permute.xlu0 %6179  ;;  %v726_v32 = vsel %vm723_vm11, %v6186_v18, %v6187_v17  ;;  %1620 = vperm.xlu1 %6309, %v363_v61  }
  0xc7   : > { %v6182_v22 = vunpack.i.h.bf16 %v6180_v19  ;;  %v6181_v23 = vunpack.i.l.bf16 %v6180_v19  ;;  %v6190_v24 = vpop.permute.xlu1 %6189  ;;  %v5963_v39 = vpack.c.bf16 %v726_v32, %v693_v38 }
  0xc8   : > { %v6192_v44 = vunpack.i.h.bf16 %v6190_v24  ;;  %v6191_v45 = vunpack.i.l.bf16 %v6190_v24  ;;  %1625 = vperm.xlu0 %6308, %v364_v6  }
  0xc9   : > { %v725_v26 = vsel %vm723_vm11, %v6182_v22, %v6186_v18  ;;  %v724_v27 = vsel %vm723_vm11, %v6181_v23, %v6182_v22 }
  0xca   : > { %v722_v29 = vpop.permute.xlu0 %721  ;;  %v5913_v30 = vpack.c.bf16 %v725_v26, %v692_v25  ;;  %v5915_v31 = vpack.c.bf16 %v724_v27, %v691_v4  ;;  %v757_v59 = vsel %vm8754_vm12, %v6191_v45, %v6192_v44 }
  0xcb   : > { %v727_v35 = vsel %vm723_vm11, %v6187_v17, %v722_v29  ;;  %v755_v37 = vpop.permute.xlu1 %754 }
  0xcc   : > { %v5961_v36 = vpack.c.bf16 %v727_v35, %v694_v34  ;;  %5914 = vmatprep.subr.bf16.mxu0 %v5913_v30 }
  0xcd   : > { %5916 = vmatpush1.bf16.msra.mxu0 %v5915_v31 }
  0xce   : > { %v6195_v41 = vpop.permute.xlu0 %6194  ;;  %5962 = vmatprep.subr.bf16.mxu1 %v5961_v36 }
  0xcf   : > { %5964 = vmatpush1.bf16.msra.mxu1 %v5963_v39  ;;  %v6205_v43 = vpop.permute.xlu1 %6204  ;;  %v6196_v46 = vunpack.i.l.bf16 %v6195_v41  ;;  %v6197_v52 = vunpack.i.h.bf16 %v6195_v41 }
  0xd0   : > { %v6207_v48 = vunpack.i.h.bf16 %v6205_v43  ;;  %v6206_v49 = vunpack.i.l.bf16 %v6205_v43 }
  0xd1   : > { %v758_v57 = vsel %vm8754_vm12, %v6192_v44, %v6196_v46  ;;  %v760_v7 = vsel %vm8754_vm12, %v6197_v52, %v755_v37  ;;  %v759_v10 = vsel %vm8754_vm12, %v6196_v46, %v6197_v52  ;;  %vm8758_vm12 = vcmask 449536  }
  0xd2   : > { %v6200_v50 = vpop.permute.xlu0 %6199  ;;  %v792_v5 = vsel %vm8753_vm13, %v6206_v49, %v6207_v48 }
  0xd3   : > { %v6202_v53 = vunpack.i.h.bf16 %v6200_v50  ;;  %v6201_v55 = vunpack.i.l.bf16 %v6200_v50  ;;  %v6210_v56 = vpop.permute.xlu1 %6209  ;;  %v5967_v11 = vpack.c.bf16 %v792_v5, %v759_v10 }
  0xd4   : > { %v6212_v13 = vunpack.i.h.bf16 %v6210_v56  ;;  %v6211_v14 = vunpack.i.l.bf16 %v6210_v56 }
  0xd5   : > { %v791_v58 = vsel %vm8753_vm13, %v6202_v53, %v6206_v49  ;;  %v790_v60 = vsel %vm8753_vm13, %v6201_v55, %v6202_v53 }
  0xd6   : > { %v788_v62 = vpop.permute.xlu0 %787  ;;  %v5917_v63 = vpack.c.bf16 %v791_v58, %v758_v57  ;;  %v5919_v3 = vpack.c.bf16 %v790_v60, %v757_v59  ;;  %v823_v24 = vsel %vm8756_vm14, %v6211_v14, %v6212_v13 }
  0xd7   : > { %v793_v8 = vsel %vm8753_vm13, %v6207_v48, %v788_v62  ;;  %v821_v9 = vpop.permute.xlu1 %820  ;;  %vm8757_vm13 = vcmask 441344  }
  0xd8   : > { %v5965_v2 = vpack.c.bf16 %v793_v8, %v760_v7  ;;  %5918 = vmatprep.subr.bf16.mxu0 %v5917_v63 }
  0xd9   : > { %5920 = vmatpush1.bf16.msra.mxu0 %v5919_v3 }
  0xda   : > { %v6215_v12 = vpop.permute.xlu0 %6214  ;;  %5966 = vmatprep.subr.bf16.mxu1 %v5965_v2 }
  0xdb   : > { %5968 = vmatpush1.bf16.msra.mxu1 %v5967_v11  ;;  %v6225_v0 = vpop.permute.xlu1 %6224  ;;  %v6216_v15 = vunpack.i.l.bf16 %v6215_v12  ;;  %v6217_v18 = vunpack.i.h.bf16 %v6215_v12 }
  0xdc   : > { %v6227_v16 = vunpack.i.h.bf16 %v6225_v0  ;;  %v6226_v1 = vunpack.i.l.bf16 %v6225_v0 }
  0xdd   : > { %v824_v22 = vsel %vm8756_vm14, %v6212_v13, %v6216_v15  ;;  %v826_v29 = vsel %vm8756_vm14, %v6217_v18, %v821_v9  ;;  %v825_v33 = vsel %vm8756_vm14, %v6216_v15, %v6217_v18  ;;  %vm8759_vm14 = vcmask 424960  }
  0xde   : > { %v6220_v17 = vpop.permute.xlu0 %6219  ;;  %v858_v28 = vsel %vm8755_vm15, %v6226_v1, %v6227_v16 }
  0xdf   : > { %v6222_v19 = vunpack.i.h.bf16 %v6220_v17  ;;  %v6221_v20 = vunpack.i.l.bf16 %v6220_v17  ;;  %v6230_v21 = vpop.permute.xlu1 %6229  ;;  %v5971_v34 = vpack.c.bf16 %v858_v28, %v825_v33 }
  0xe0   : > { %v6232_v46 = vunpack.i.h.bf16 %v6230_v21  ;;  %v6231_v47 = vunpack.i.l.bf16 %v6230_v21 }
  0xe1   : > { %v857_v23 = vsel %vm8755_vm15, %v6222_v19, %v6226_v1  ;;  %v856_v25 = vsel %vm8755_vm15, %v6221_v20, %v6222_v19 }
  0xe2   : > { %v854_v26 = vpop.permute.xlu0 %853  ;;  %v5921_v4 = vpack.c.bf16 %v857_v23, %v824_v22  ;;  %v5923_v27 = vpack.c.bf16 %v856_v25, %v823_v24  ;;  %v889_v60 = vsel %vm8758_vm12, %v6231_v47, %v6232_v46 }
  0xe3   : > { %v859_v30 = vsel %vm8755_vm15, %v6227_v16, %v854_v26  ;;  %v887_v32 = vpop.permute.xlu1 %886  ;;  %vm8760_vm15 = vcmask 433152  }
  0xe4   : > { %v5969_v31 = vpack.c.bf16 %v859_v30, %v826_v29  ;;  %5922 = vmatprep.subr.bf16.mxu0 %v5921_v4 }
  0xe5   : > { %5924 = vmatpush1.bf16.msra.mxu0 %v5923_v27 }
  0xe6   : > { %v6235_v35 = vpop.permute.xlu0 %6234  ;;  %5970 = vmatprep.subr.bf16.mxu1 %v5969_v31 }
  0xe7   : > { %v6237_v36 = vunpack.i.h.bf16 %v6235_v35  ;;  %5972 = vmatpush1.bf16.msra.mxu1 %v5971_v34  ;;  %v6245_v37 = vpop.permute.xlu1 %6244  ;;  %v6236_v40 = vunpack.i.l.bf16 %v6235_v35 }
  0xe8   : > { %v6247_v38 = vunpack.i.h.bf16 %v6245_v37  ;;  %v6246_v39 = vunpack.i.l.bf16 %v6245_v37 }
  0xe9   : > { %v892_v44 = vsel %vm8758_vm12, %v6237_v36, %v887_v32  ;;  %v890_v55 = vsel %vm8758_vm12, %v6232_v46, %v6236_v40  ;;  %v891_v56 = vsel %vm8758_vm12, %v6236_v40, %v6237_v36  ;;  %vm8761_vm12 = vcmask 252928  }
  0xea   : > { %v6240_v41 = vpop.permute.xlu0 %6239  ;;  %v925_v45 = vsel %vm8757_vm13, %v6246_v39, %v6247_v38 }
  0xeb   : > { %v6242_v42 = vunpack.i.h.bf16 %v6240_v41  ;;  %v6241_v43 = vunpack.i.l.bf16 %v6240_v41  ;;  %v6250_v48 = vpop.permute.xlu1 %6249  ;;  %v5973_v49 = vpack.c.bf16 %v925_v45, %v892_v44 }
  0xec   : > { %v6252_v61 = vunpack.i.h.bf16 %v6250_v48  ;;  %v6251_v62 = vunpack.i.l.bf16 %v6250_v48 }
  0xed   : > { %5974 = vmatprep.subr.bf16.mxu1 %v5973_v49  ;;  %v922_v51 = vsel %vm8757_vm13, %v6241_v43, %v6242_v42 }
  0xee   : > { %v916_v50 = vpop.permute.xlu0 %915  ;;  %v5927_v63 = vpack.c.bf16 %v922_v51, %v889_v60  ;;  %v958_v9 = vsel %vm8760_vm15, %v6251_v62, %v6252_v61 }
  0xef   : > { %v923_v52 = vsel %vm8757_vm13, %v6242_v42, %v916_v50  ;;  %v924_v53 = vsel %vm8757_vm13, %v916_v50, %v6246_v39  ;;  %v6260_v57 = vpop.permute.xlu1 %6259  ;;  %vm8769_vm13 = vcmask 261120  }
  0xf0   : > { %v5925_v58 = vpack.c.bf16 %v923_v52, %v890_v55  ;;  %v5975_v59 = vpack.c.bf16 %v924_v53, %v891_v56  ;;  %v6262_v8 = vunpack.i.h.bf16 %v6260_v57  ;;  %v6261_v2 = vunpack.i.l.bf16 %v6260_v57 }
  0xf2   : > { %v6255_v3 = vpop.permute.xlu0 %6254  ;;  %5926 = vmatprep.subr.bf16.mxu0 %v5925_v58  ;;  %5976 = vmatpush1.bf16.msra.mxu1 %v5975_v59  ;;  %v956_v15 = vsel %vm8760_vm15, %v6261_v2, %v6262_v8  ;;  %v957_v1 = vsel %vm8760_vm15, %v6262_v8, %v6251_v62 }
  0xf3   : > { %v6257_v5 = vunpack.i.h.bf16 %v6255_v3  ;;  %v6256_v6 = vunpack.i.l.bf16 %v6255_v3  ;;  %5928 = vmatpush1.bf16.msra.mxu0 %v5927_v63  ;;  %v945_v7 = vpop.permute.xlu1 %944 }
  0xf4   : > { %v955_v21 = vsel %vm8760_vm15, %v945_v7, %v6261_v2  ;;  %vm8767_vm15 = vcmask 236544  }
  0xf5   : > { %v991_v10 = vsel %vm8759_vm14, %v6256_v6, %v6257_v5 }
  0xf6   : > { %v6265_v11 = vpop.permute.xlu0 %6264  ;;  %v5977_v12 = vpack.c.bf16 %v991_v10, %v958_v9 }
  0xf7   : > { %v6267_v0 = vunpack.i.h.bf16 %v6265_v11  ;;  %v6266_v13 = vunpack.i.l.bf16 %v6265_v11  ;;  %v6270_v14 = vpop.permute.xlu1 %6269 }
  0xf8   : > { %5978 = vmatprep.subr.bf16.mxu1 %v5977_v12  ;;  %v6272_v25 = vunpack.i.h.bf16 %v6270_v14  ;;  %v6271_v26 = vunpack.i.l.bf16 %v6270_v14 }
  0xf9   : > { %v989_v16 = vsel %vm8759_vm14, %v6266_v13, %v6267_v0  ;;  %v990_v17 = vsel %vm8759_vm14, %v6267_v0, %v6256_v6 }
  0xfa   : > { %v978_v18 = vpop.permute.xlu0 %977  ;;  %v5929_v19 = vpack.c.bf16 %v989_v16, %v956_v15  ;;  %v5979_v20 = vpack.c.bf16 %v990_v17, %v957_v1  ;;  %v1024_v32 = vsel %vm8769_vm13, %v6271_v26, %v6272_v25  ;;  %v337_v25 = vld [vmem:[%s8725_s2 + $0x20] sm:$0xff] }
  0xfb   : > { %v988_v22 = vsel %vm8759_vm14, %v978_v18, %v6266_v13  ;;  %v6280_v24 = vpop.permute.xlu1 %6279  ;;  %vm8768_vm14 = vcmask 244736   ;;  %v333_v18 = vld [vmem:[%s8725_s2] sm:$0xff] }
  0xfc   : > { %v5931_v23 = vpack.c.bf16 %v988_v22, %v955_v21  ;;  %5930 = vmatprep.subr.bf16.mxu0 %v5929_v19  ;;  %5980 = vmatpush1.bf16.msra.mxu1 %v5979_v20  ;;  %v6282_v30 = vunpack.i.h.bf16 %v6280_v24  ;;  %v6281_v31 = vunpack.i.l.bf16 %v6280_v24  ;;  %v336_v21 = vld [vmem:[%s8725_s2 + $0x18] sm:$0xff]  ;;  %v338_v24 = vld [vmem:[%s8725_s2 + $0x28] sm:$0xff] }
  0xfe   : > { %v6275_v4 = vpop.permute.xlu0 %6274  ;;  %5932 = vmatpush1.bf16.msra.mxu0 %v5931_v23  ;;  %v1022_v39 = vsel %vm8769_vm13, %v6281_v31, %v6282_v30  ;;  %v1023_v41 = vsel %vm8769_vm13, %v6282_v30, %v6271_v26  ;;  %v335_v23 = vld [vmem:[%s8725_s2 + $0x10] sm:$0xff]  ;;  %v340_v26 = vld [vmem:[%s8725_s2 + $0x38] sm:$0xff] }
  0xff   : > { %v6277_v27 = vunpack.i.h.bf16 %v6275_v4  ;;  %v6276_v28 = vunpack.i.l.bf16 %v6275_v4  ;;  %v1011_v29 = vpop.permute.xlu1 %1010  ;;  %v339_v4 = vld [vmem:[%s8725_s2 + $0x30] sm:$0xff] }
 0x100   : > { %v1021_v46 = vsel %vm8769_vm13, %v1011_v29, %v6281_v31  ;;  %v344_v29 = vld [vmem:[%s8725_s2 + $0x58] sm:$0xff]  ;;  %v343_v30 = vld [vmem:[%s8725_s2 + $0x50] sm:$0xff]  ;;  %v346_v31 = vld [vmem:[%s8725_s2 + $0x68] sm:$0xff] }
 0x101   : > { %v1057_v33 = vsel %vm8761_vm12, %v6276_v28, %v6277_v27  ;;  %v342_v27 = vld [vmem:[%s8725_s2 + $0x48] sm:$0xff] }
 0x102   : > { %v6285_v34 = vpop.permute.xlu0 %6284  ;;  %v5981_v35 = vpack.c.bf16 %v1057_v33, %v1024_v32  ;;  %v345_v32 = vld [vmem:[%s8725_s2 + $0x60] sm:$0xff]  ;;  %v348_v33 = vld [vmem:[%s8725_s2 + $0x78] sm:$0xff] }
 0x103   : > { %v6287_v36 = vunpack.i.h.bf16 %v6285_v34  ;;  %v6286_v37 = vunpack.i.l.bf16 %v6285_v34  ;;  %v6290_v38 = vpop.permute.xlu1 %6289  ;;  %v347_v34 = vld [vmem:[%s8725_s2 + $0x70] sm:$0xff] }
 0x104   : > { %5982 = vmatprep.subr.bf16.mxu1 %v5981_v35  ;;  %v6292_v50 = vunpack.i.h.bf16 %v6290_v38  ;;  %v6291_v51 = vunpack.i.l.bf16 %v6290_v38 }
 0x105   : > { %v1055_v40 = vsel %vm8761_vm12, %v6286_v37, %v6287_v36  ;;  %v1056_v42 = vsel %vm8761_vm12, %v6287_v36, %v6276_v28  ;;  %v341_v28 = vld [vmem:[%s8725_s2 + $0x40] sm:$0xff] }
 0x106   : > { %v1044_v43 = vpop.permute.xlu0 %1043  ;;  %v5933_v44 = vpack.c.bf16 %v1055_v40, %v1022_v39  ;;  %v5983_v45 = vpack.c.bf16 %v1056_v42, %v1023_v41  ;;  %v1090_v59 = vsel %vm8768_vm14, %v6291_v51, %v6292_v50  ;;  %v1694_v39 = vlaneseq }
 0x107   : > { %v1054_v47 = vsel %vm8761_vm12, %v1044_v43, %v6286_v37  ;;  %vm8766_vm12 = vcmask 228352  }
 0x108   : > { %v5935_v48 = vpack.c.bf16 %v1054_v47, %v1021_v46  ;;  %v6300_v49 = vpop.permute.xlu1 %6299  ;;  %5934 = vmatprep.subr.bf16.mxu0 %v5933_v44  ;;  %5984 = vmatpush1.bf16.msra.mxu1 %v5983_v45  ;;  %v1695_v41 = vshrl.u32 %v1694_v39, 7  ;;  %v1692_v45 = vld [vmem:[%s8724_s1] sm:$0xf] }
 0x109   : > { %v6302_v57 = vunpack.i.h.bf16 %v6300_v49  ;;  %v6301_v58 = vunpack.i.l.bf16 %v6300_v49 }
 0x10a   : > { %v6295_v52 = vpop.permute.xlu0 %6294  ;;  %5936 = vmatpush1.bf16.msra.mxu0 %v5935_v48  ;;  %v1704_v44 = vsub.s32 2, %v1695_v41  ;;  %v1696_v46 = vsub.s32 0, %v1695_v41  ;;  %v1708_v47 = vsub.s32 3, %v1695_v41  ;;  %v1700_v48 = vsub.s32 1, %v1695_v41 }
 0x10b   : > { %v6297_v53 = vunpack.i.h.bf16 %v6295_v52  ;;  %v6296_v55 = vunpack.i.l.bf16 %v6295_v52  ;;  %v1088_v6 = vsel %vm8768_vm14, %v6301_v58, %v6302_v57  ;;  %v1089_v8 = vsel %vm8768_vm14, %v6302_v57, %v6291_v51 }
 0x10c   : > { %v1077_v56 = vpop.permute.xlu1 %1076  ;;  %v6821_v52 = vrot.slane %v1692_v45, %v1704_v44 }
 0x10d   : > { %v1123_v60 = vsel %vm8767_vm15, %v6296_v55, %v6297_v53  ;;  %v1087_v12 = vsel %vm8768_vm14, %v1077_v56, %v6301_v58  ;;  %v6823_v58 = vrot.slane %v1692_v45, %v1696_v46 }
 0x10e   : > { %v6305_v61 = vpop.permute.xlu0 %6304  ;;  %v5985_v62 = vpack.c.bf16 %v1123_v60, %v1090_v59  ;;  %v6825_v60 = vrot.slane %v1692_v45, %v1708_v47 }
 0x10f   : > { %v6307_v63 = vunpack.i.h.bf16 %v6305_v61  ;;  %v6306_v3 = vunpack.i.l.bf16 %v6305_v61 }
 0x110   : > { %v1149_v5 = vpop.permute.xlu1 %1148  ;;  %5986 = vmatprep.subr.bf16.mxu1 %v5985_v62 }
 0x111   : > { %v1121_v7 = vsel %vm8767_vm15, %v6306_v3, %v6307_v63  ;;  %v1122_v2 = vsel %vm8767_vm15, %v6307_v63, %v6296_v55 }
 0x112   : > { %v1110_v9 = vpop.permute.xlu0 %1109  ;;  %v5937_v10 = vpack.c.bf16 %v1121_v7, %v1088_v6  ;;  %v5987_v11 = vpack.c.bf16 %v1122_v2, %v1089_v8 }
 0x113   : > { %v1120_v0 = vsel %vm8767_vm15, %v1110_v9, %v6306_v3  ;;  %v6827_v3 = vrot.slane %v1692_v45, %v1700_v48 }
 0x114   : > { %v5939_v13 = vpack.c.bf16 %v1120_v0, %v1087_v12  ;;  %v1145_v14 = vpop.permute.xlu1 %1144  ;;  %5938 = vmatprep.subr.bf16.mxu0 %v5937_v10  ;;  %5988 = vmatpush1.bf16.msra.mxu1 %v5987_v11 }
 0x116   : > { %v1151_v15 = vpop.permute.xlu0 %1150  ;;  %5940 = vmatpush1.bf16.msra.mxu0 %v5939_v13 }
 0x117   : > { %v1156_v16 = vsel %vm8766_vm12, %v1149_v5, %v1151_v15 }
 0x118   : > { %1491 = vmatprep.subr.mxu1 %v1156_v16  ;;  %v1143_v1 = vpop.permute.xlu1 %1142 }
 0x119   : > { %v1153_v22 = vsel %vm8766_vm12, %v1143_v1, %v1145_v14 }
 0x11a   : > { %v1147_v17 = vpop.permute.xlu0 %1146 }
 0x11b   : > { %v1154_v19 = vsel %vm8766_vm12, %v1145_v14, %v1147_v17  ;;  %v1155_v20 = vsel %vm8766_vm12, %v1147_v17, %v1149_v5 }
 0x11c   : > { %1378 = vmatprep.subr.mxu0 %v1154_v19  ;;  %1492 = vmatpush1.msra.mxu1 %v1155_v20 }
 0x11d   : > { %1379 = vmatpush1.msra.mxu0 %v1153_v22  ;;  %1508 = vmatmul.mubr.f32.vlgmr.msra.gmra.mrb[0].mxu1 %v333_v18 }
 0x11e   : > { %1395 = vmatmul.mubr.f32.vlgmr.msra.gmra.mrb[0].mxu0 %v333_v18  ;;  %5648 = vmatprep.mubr.msk.f32.mxu1 %vm1305_vm3, %v336_v21 }
 0x11f   : > { %5640 = vmatprep.mubr.msk.f32.mxu0 %vm1305_vm3, %v336_v21 }
 0x121   : > { %1514 = vmatmul.mubr.f32.gmra.mrb[2].mxu1 %v335_v23 }
 0x122   : > { %1401 = vmatmul.mubr.f32.gmra.mrb[2].mxu0 %v335_v23  ;;  %5649 = vmatprep.mubr.msk.f32.mxu1 %vm1305_vm3, %v338_v24 }
 0x123   : > { %5641 = vmatprep.mubr.msk.f32.mxu0 %vm1305_vm3, %v338_v24 }
 0x125   : > { %1520 = vmatmul.mubr.f32.gmra.mrb[4].mxu1 %v337_v25 }
 0x126   : > { %1407 = vmatmul.mubr.f32.gmra.mrb[4].mxu0 %v337_v25  ;;  %5650 = vmatprep.mubr.msk.f32.mxu1 %vm1305_vm3, %v340_v26 }
 0x127   : > { %5642 = vmatprep.mubr.msk.f32.mxu0 %vm1305_vm3, %v340_v26 }
 0x129   : > { %1526 = vmatmul.mubr.f32.gmra.mrb[6].mxu1 %v339_v4  ;;  %v1273_v35 = vpop.permute.xlu1 %1272 }
 0x12a   : > { %1413 = vmatmul.mubr.f32.gmra.mrb[6].mxu0 %v339_v4  ;;  %5651 = vmatprep.mubr.msk.f32.mxu1 %vm1305_vm3, %v342_v27 }
 0x12b   : > { %5643 = vmatprep.mubr.msk.f32.mxu0 %vm1305_vm3, %v342_v27  ;;  %v1268_v36 = vpop.permute.xlu0 %1267 }
 0x12d   : > { %1532 = vmatmul.mubr.f32.gmra.mrb[8].mxu1 %v341_v28  ;;  %v6806_v37 = vpop.permute.xlu1 %1277 }
 0x12e   : > { %1419 = vmatmul.mubr.f32.gmra.mrb[8].mxu0 %v341_v28  ;;  %5652 = vmatprep.mubr.msk.f32.mxu1 %vm1305_vm3, %v344_v29 }
 0x12f   : > { %5644 = vmatprep.mubr.msk.f32.mxu0 %vm1305_vm3, %v344_v29  ;;  %v6808_v38 = vpop.permute.xlu0 %1282 }
 0x131   : > { %1538 = vmatmul.mubr.f32.gmra.mrb[10].mxu1 %v343_v30  ;;  %v6810_v40 = vpop.permute.xlu1 %1287 }
 0x132   : > { %1425 = vmatmul.mubr.f32.gmra.mrb[10].mxu0 %v343_v30  ;;  %5653 = vmatprep.mubr.msk.f32.mxu1 %vm1305_vm3, %v346_v31 }
 0x133   : > { %5645 = vmatprep.mubr.msk.f32.mxu0 %vm1305_vm3, %v346_v31  ;;  %v6812_v42 = vpop.permute.xlu0 %1292 }
 0x135   : > { %1544 = vmatmul.mubr.f32.gmra.mrb[12].mxu1 %v345_v32  ;;  %v6814_v43 = vpop.permute.xlu1 %1297 }
 0x136   : > { %1431 = vmatmul.mubr.f32.gmra.mrb[12].mxu0 %v345_v32  ;;  %5654 = vmatprep.mubr.msk.f32.mxu1 %vm1305_vm3, %v348_v33 }
 0x137   : > { %5646 = vmatprep.mubr.msk.f32.mxu0 %vm1305_vm3, %v348_v33  ;;  %v6819_v49 = vpop.permute.xlu0 %1302 }
 0x139   : > { %1550 = vmatmul.mubr.f32.gmra.mrb[14].mxu1 %v347_v34  ;;  %v1591_v56 = vpop.permute.xlu1 %1590 }
 0x13a   : > { %1437 = vmatmul.mubr.f32.gmra.mrb[14].mxu0 %v347_v34 }
 0x13b   : > { %v1596_v15 = vpop.permute.xlu0 %1595 }
 0x13d   : > { %v1601_v32 = vpop.permute.xlu1 %1600 }
 0x1f0   : > { %v1509_v50 = vpop.f32.mrb[0].mxu1 }
 0x1f1   : > { %v1510_v51 = vadd.f32 %v1509_v50, %v1268_v36  ;;  %v1396_v53 = vpop.f32.mrb[0].mxu0  ;;  %v1511_v55 = vpop.f32.mrb[1].mxu1 }
 0x1f2   : > { %v1397_v57 = vadd.f32 %v1396_v53, %v1268_v36  ;;  %v1512_v59 = vadd.f32 %v1511_v55, %v1268_v36  ;;  %v1398_v61 = vpop.f32.mrb[1].mxu0 }
 0x1f3   : > { %vm1558_vm3 = vcmp.gt.f32.partialorder %v1510_v51, 0.0  ;;  %v1630_v62 = vmul.f32 %v1591_v56, %v1510_v51  ;;  %v1399_v63 = vadd.f32 %v1398_v61, %v1268_v36 }
 0x1f4   : > { %vm1556_vm12 = vcmp.gt.f32.partialorder %v1397_v57, 0.0  ;;  %v1628_v5 = vmul.f32 %v1591_v56, %v1397_v57  ;;  %vm1559_vm15 = vcmp.gt.f32.partialorder %v1512_v59, 0.0  ;;  %v1631_v6 = vmul.f32 %v1591_v56, %v1512_v59  ;;  %v1515_v7 = vpop.f32.mrb[2].mxu1 }
 0x1f5   : > { %v1662_v8 = vsel %vm1558_vm3, %v1510_v51, %v1630_v62  ;;  %vm1557_vm14 = vcmp.gt.f32.partialorder %v1399_v63, 0.0  ;;  %v1629_v2 = vmul.f32 %v1591_v56, %v1399_v63  ;;  %v1516_v9 = vadd.f32 %v1515_v7, %v1273_v35  ;;  %v1402_v10 = vpop.f32.mrb[2].mxu0  ;;  %v1517_v11 = vpop.f32.mrb[3].mxu1 }
 0x1f6   : > { %v1660_v12 = vsel %vm1556_vm12, %v1397_v57, %v1628_v5  ;;  %v1663_v0 = vsel %vm1559_vm15, %v1512_v59, %v1631_v6  ;;  %v1403_v13 = vadd.f32 %v1402_v10, %v1273_v35  ;;  %v1404_v14 = vpop.f32.mrb[3].mxu0  ;;  %v1716_v16 = vmul.f32 %v6821_v52, %v1662_v8 }
 0x1f7   : > { %v1714_v1 = vmul.f32 %v6823_v58, %v1660_v12  ;;  %v1661_v17 = vsel %vm1557_vm14, %v1399_v63, %v1629_v2  ;;  %vm1562_vm13 = vcmp.gt.f32.partialorder %v1516_v9, 0.0  ;;  %v1717_v18 = vmul.f32 %v6825_v60, %v1663_v0  ;;  %v1606_v0 = vpop.permute.xlu0 %1605 }
 0x1f8   : > { %v1634_v19 = vmul.f32 %v1596_v15, %v1516_v9  ;;  %vm1560_vm3 = vcmp.gt.f32.partialorder %v1403_v13, 0.0  ;;  %v1632_v20 = vmul.f32 %v1596_v15, %v1403_v13  ;;  %v1521_v21 = vpop.f32.mrb[4].mxu1  ;;  %v1715_v22 = vmul.f32 %v6827_v3, %v1661_v17 }
 0x1f9   : > { %v1518_v23 = vadd.f32 %v1517_v11, %v1273_v35  ;;  %v1405_v24 = vadd.f32 %v1404_v14, %v1273_v35  ;;  %v1522_v25 = vadd.f32 %v1521_v21, %v6806_v37  ;;  %v1408_v26 = vpop.f32.mrb[4].mxu0  ;;  %v1523_v4 = vpop.f32.mrb[5].mxu1 }
 0x1fa   : > { %v1666_v27 = vsel %vm1562_vm13, %v1516_v9, %v1634_v19  ;;  %v1664_v28 = vsel %vm1560_vm3, %v1403_v13, %v1632_v20  ;;  %v1409_v29 = vadd.f32 %v1408_v26, %v6806_v37  ;;  %v1524_v30 = vadd.f32 %v1523_v4, %v6806_v37  ;;  %v1410_v31 = vpop.f32.mrb[5].mxu0  ;;  %v1611_v4 = vpop.permute.xlu1 %1610 }
 0x1fb   : > { %v1720_v33 = vmul.f32 %v6821_v52, %v1666_v27  ;;  %v1718_v34 = vmul.f32 %v6823_v58, %v1664_v28  ;;  %vm1563_vm12 = vcmp.gt.f32.partialorder %v1518_v23, 0.0  ;;  %v1635_v36 = vmul.f32 %v1596_v15, %v1518_v23 }
 0x1fc   : > { %vm1561_vm14 = vcmp.gt.f32.partialorder %v1405_v24, 0.0  ;;  %v1633_v35 = vmul.f32 %v1596_v15, %v1405_v24  ;;  %vm1566_vm15 = vcmp.gt.f32.partialorder %v1522_v25, 0.0  ;;  %v1638_v39 = vmul.f32 %v1601_v32, %v1522_v25  ;;  %v1527_v41 = vpop.f32.mrb[6].mxu1 }
 0x1fd   : > { %v6838_v44 = vpack.c.bf16 %v1720_v33, %v1716_v16  ;;  %v6840_v45 = vpack.c.bf16 %v1718_v34, %v1714_v1  ;;  %v1667_v46 = vsel %vm1563_vm12, %v1518_v23, %v1635_v36  ;;  %vm1564_vm13 = vcmp.gt.f32.partialorder %v1409_v29, 0.0  ;;  %v1414_v47 = vpop.f32.mrb[6].mxu0  ;;  %v1529_v48 = vpop.f32.mrb[7].mxu1 }
 0x1fe   : > { %v1721_v50 = vmul.f32 %v6825_v60, %v1667_v46  ;;  %v1665_v51 = vsel %vm1561_vm14, %v1405_v24, %v1633_v35  ;;  %v1670_v53 = vsel %vm1566_vm15, %v1522_v25, %v1638_v39  ;;  %v1636_v55 = vmul.f32 %v1601_v32, %v1409_v29  ;;  %v1416_v56 = vpop.f32.mrb[7].mxu0 }
 0x1ff   : > { %v1719_v57 = vmul.f32 %v6827_v3, %v1665_v51  ;;  %v1724_v59 = vmul.f32 %v6821_v52, %v1670_v53  ;;  %vm1567_vm3 = vcmp.gt.f32.partialorder %v1524_v30, 0.0  ;;  %v1639_v61 = vmul.f32 %v1601_v32, %v1524_v30  ;;  %2510 = vrot.lane.b32.xlu0 %v6838_v44, %s6360_s15  ;;  %1836 = vrot.lane.b32.xlu1 %v6840_v45, %s6354_s9 }
 0x200   : > { %v6849_v62 = vpack.c.bf16 %v1721_v50, %v1717_v18  ;;  %v1668_v63 = vsel %vm1564_vm13, %v1409_v29, %v1636_v55  ;;  %v1411_v5 = vadd.f32 %v1410_v31, %v6806_v37  ;;  %v1528_v6 = vadd.f32 %v1527_v41, %v6808_v38  ;;  %v1533_v7 = vpop.f32.mrb[8].mxu1 }
 0x201   : > { %v6853_v8 = vpack.c.bf16 %v1719_v57, %v1715_v22  ;;  %v1722_v2 = vmul.f32 %v6823_v58, %v1668_v63  ;;  %v1671_v9 = vsel %vm1567_vm3, %v1524_v30, %v1639_v61  ;;  %v1415_v10 = vadd.f32 %v1414_v47, %v6808_v38  ;;  %v1420_v11 = vpop.f32.mrb[8].mxu0  ;;  %v1535_v12 = vpop.f32.mrb[9].mxu1 }
 0x202   : > { %8807 = vst [vmem:[#allocation5_spill] sm:$0xff] %v6849_v62  ;;  %v1725_v13 = vmul.f32 %v6825_v60, %v1671_v9  ;;  %vm1565_vm12 = vcmp.gt.f32.partialorder %v1411_v5, 0.0  ;;  %v1637_v14 = vmul.f32 %v1601_v32, %v1411_v5  ;;  %vm1570_vm14 = vcmp.gt.f32.partialorder %v1528_v6, 0.0  ;;  %v1422_v15 = vpop.f32.mrb[9].mxu0 }
 0x203   : > { %v1642_v37 = vmul.f32 %v1606_v0, %v1528_v6  ;;  %vm1568_vm15 = vcmp.gt.f32.partialorder %v1415_v10, 0.0  ;;  %v1640_v16 = vmul.f32 %v1606_v0, %v1415_v10  ;;  %v1530_v1 = vadd.f32 %v1529_v48, %v6808_v38  ;;  %2611 = vrot.lane.b32.xlu0 %v6838_v44, %s6361_s16  ;;  %1840 = vrot.lane.b32.xlu1 %v6838_v44, %s6354_s9 }
 0x204   : > { %v1669_v17 = vsel %vm1565_vm12, %v1411_v5, %v1637_v14  ;;  %v1417_v18 = vadd.f32 %v1416_v56, %v6808_v38  ;;  %v1534_v19 = vadd.f32 %v1533_v7, %v6810_v40  ;;  %v1421_v20 = vadd.f32 %v1420_v11, %v6810_v40  ;;  %v1539_v21 = vpop.f32.mrb[10].mxu1  ;;  %v1616_v5 = vpop.permute.xlu0 %1615 }
 0x205   : > { %v1723_v22 = vmul.f32 %v6827_v3, %v1669_v17  ;;  %v1674_v23 = vsel %vm1570_vm14, %v1528_v6, %v1642_v37  ;;  %v1672_v24 = vsel %vm1568_vm15, %v1415_v10, %v1640_v16  ;;  %vm1571_vm13 = vcmp.gt.f32.partialorder %v1530_v1, 0.0  ;;  %v1426_v25 = vpop.f32.mrb[10].mxu0  ;;  %v1541_v26 = vpop.f32.mrb[11].mxu1 }
 0x206   : > { %v1728_v27 = vmul.f32 %v6821_v52, %v1674_v23  ;;  %v1726_v28 = vmul.f32 %v6823_v58, %v1672_v24  ;;  %v1643_v29 = vmul.f32 %v1606_v0, %v1530_v1  ;;  %vm1569_vm3 = vcmp.gt.f32.partialorder %v1417_v18, 0.0  ;;  %v1428_v38 = vpop.f32.mrb[11].mxu0 }
 0x207   : > { %v1641_v30 = vmul.f32 %v1606_v0, %v1417_v18  ;;  %vm1574_vm12 = vcmp.gt.f32.partialorder %v1534_v19, 0.0  ;;  %v1646_v31 = vmul.f32 %v1611_v4, %v1534_v19  ;;  %vm1572_vm4 = vcmp.gt.f32.partialorder %v1421_v20, 0.0  ;;  %2712 = vrot.lane.b32.xlu0 %v6838_v44, %s6362_s17  ;;  %1937 = vrot.lane.b32.xlu1 %v6840_v45, %s6355_s10 }
 0x208   : > { %v6873_v32 = vpack.c.bf16 %v1728_v27, %v1724_v59  ;;  %v6875_v33 = vpack.c.bf16 %v1726_v28, %v1722_v2  ;;  %v1675_v34 = vsel %vm1571_vm13, %v1530_v1, %v1643_v29  ;;  %v1644_v36 = vmul.f32 %v1611_v4, %v1421_v20  ;;  %v1545_v35 = vpop.f32.mrb[12].mxu1  ;;  %v1621_v27 = vpop.permute.xlu1 %1620 }
 0x209   : > { %v1729_v39 = vmul.f32 %v6825_v60, %v1675_v34  ;;  %v1673_v41 = vsel %vm1569_vm3, %v1417_v18, %v1641_v30  ;;  %v1678_v46 = vsel %vm1574_vm12, %v1534_v19, %v1646_v31  ;;  %v1536_v47 = vadd.f32 %v1535_v12, %v6810_v40  ;;  %v1432_v48 = vpop.f32.mrb[12].mxu0  ;;  %v1547_v50 = vpop.f32.mrb[13].mxu1 }
 0x20a   : > { %v1727_v51 = vmul.f32 %v6827_v3, %v1673_v41  ;;  %v1732_v53 = vmul.f32 %v6821_v52, %v1678_v46  ;;  %v1676_v55 = vsel %vm1572_vm4, %v1421_v20, %v1644_v36  ;;  %v1423_v56 = vadd.f32 %v1422_v15, %v6810_v40  ;;  %v1434_v57 = vpop.f32.mrb[13].mxu0 }
 0x20b   : > { %v6884_v59 = vpack.c.bf16 %v1729_v39, %v1725_v13  ;;  %v1730_v61 = vmul.f32 %v6823_v58, %v1676_v55  ;;  %vm1575_vm14 = vcmp.gt.f32.partialorder %v1536_v47, 0.0  ;;  %v1647_v63 = vmul.f32 %v1611_v4, %v1536_v47  ;;  %2506 = vrot.lane.b32.xlu0 %v6840_v45, %s6360_s15  ;;  %1941 = vrot.lane.b32.xlu1 %v6838_v44, %s6355_s10 }
 0x20c   : > { %v6891_v6 = vpack.c.bf16 %v1727_v51, %v1723_v22  ;;  %vm1573_vm15 = vcmp.gt.f32.partialorder %v1423_v56, 0.0  ;;  %v1645_v7 = vmul.f32 %v1611_v4, %v1423_v56  ;;  %v1540_v40 = vadd.f32 %v1539_v21, %v6812_v42  ;;  %v1551_v2 = vpop.f32.mrb[14].mxu1 }
 0x20d   : > { %8808 = vst [vmem:[#allocation6_spill] sm:$0xff] %v6884_v59  ;;  %v1679_v9 = vsel %vm1575_vm14, %v1536_v47, %v1647_v63  ;;  %v1427_v10 = vadd.f32 %v1426_v25, %v6812_v42  ;;  %v1542_v11 = vadd.f32 %v1541_v26, %v6812_v42  ;;  %v1429_v12 = vadd.f32 %v1428_v38, %v6812_v42  ;;  %v1438_v0 = vpop.f32.mrb[14].mxu0  ;;  %v1553_v13 = vpop.f32.mrb[15].mxu1 }
 0x20e   : > { %v1733_v14 = vmul.f32 %v6825_v60, %v1679_v9  ;;  %v1677_v15 = vsel %vm1573_vm15, %v1423_v56, %v1645_v7  ;;  %vm1578_vm4 = vcmp.gt.f32.partialorder %v1540_v40, 0.0  ;;  %v1650_v37 = vmul.f32 %v1616_v5, %v1540_v40  ;;  %v1440_v16 = vpop.f32.mrb[15].mxu0  ;;  %v1626_v56 = vpop.permute.xlu0 %1625 }
 0x20f   : > { %v1731_v1 = vmul.f32 %v6827_v3, %v1677_v15  ;;  %vm1576_vm13 = vcmp.gt.f32.partialorder %v1427_v10, 0.0  ;;  %v1648_v17 = vmul.f32 %v1616_v5, %v1427_v10  ;;  %vm1579_vm3 = vcmp.gt.f32.partialorder %v1542_v11, 0.0  ;;  %1838 = vrot.lane.b32.xlu0 %v6853_v8, %s6354_s9  ;;  %2038 = vrot.lane.b32.xlu1 %v6840_v45, %s6356_s11 }
 0x210   : > { %v1682_v42 = vsel %vm1578_vm4, %v1540_v40, %v1650_v37  ;;  %v1651_v18 = vmul.f32 %v1616_v5, %v1542_v11  ;;  %vm1577_vm12 = vcmp.gt.f32.partialorder %v1429_v12, 0.0  ;;  %v1649_v19 = vmul.f32 %v1616_v5, %v1429_v12 }
 0x211   : > { %v1736_v20 = vmul.f32 %v6821_v52, %v1682_v42  ;;  %v1680_v21 = vsel %vm1576_vm13, %v1427_v10, %v1648_v17  ;;  %v1546_v22 = vadd.f32 %v1545_v35, %v6814_v43  ;;  %v1433_v23 = vadd.f32 %v1432_v48, %v6814_v43 }
 0x212   : > { %v1734_v24 = vmul.f32 %v6823_v58, %v1680_v21  ;;  %v1683_v25 = vsel %vm1579_vm3, %v1542_v11, %v1651_v18  ;;  %v1681_v26 = vsel %vm1577_vm12, %v1429_v12, %v1649_v19  ;;  %v1548_v4 = vadd.f32 %v1547_v50, %v6814_v43 }
 0x213   : > { %v6908_v28 = vpack.c.bf16 %v1736_v20, %v1732_v53  ;;  %v1737_v29 = vmul.f32 %v6825_v60, %v1683_v25  ;;  %v1735_v38 = vmul.f32 %v6827_v3, %v1681_v26  ;;  %vm1582_vm14 = vcmp.gt.f32.partialorder %v1546_v22, 0.0  ;;  %1842 = vrot.lane.b32.xlu0 %v6849_v62, %s6354_s9  ;;  %2042 = vrot.lane.b32.xlu1 %v6838_v44, %s6356_s11 }
 0x214   : > { %v6916_v30 = vpack.c.bf16 %v1734_v24, %v1730_v61  ;;  %v1654_v31 = vmul.f32 %v1621_v27, %v1546_v22  ;;  %vm1580_vm15 = vcmp.gt.f32.partialorder %v1433_v23, 0.0  ;;  %v1652_v34 = vmul.f32 %v1621_v27, %v1433_v23 }
 0x215   : > { %v6918_v36 = vpack.c.bf16 %v1737_v29, %v1733_v14  ;;  %v6920_v35 = vpack.c.bf16 %v1735_v38, %v1731_v1  ;;  %vm1583_vm4 = vcmp.gt.f32.partialorder %v1548_v4, 0.0  ;;  %v1655_v39 = vmul.f32 %v1621_v27, %v1548_v4 }
 0x216   : > { %v1686_v41 = vsel %vm1582_vm14, %v1546_v22, %v1654_v31  ;;  %v1684_v46 = vsel %vm1580_vm15, %v1433_v23, %v1652_v34  ;;  %v1435_v47 = vadd.f32 %v1434_v57, %v6814_v43  ;;  %v1552_v48 = vadd.f32 %v1551_v2, %v6819_v49 }
 0x217   : > { %8809 = vst [vmem:[#allocation7_spill] sm:$0xff] %v6918_v36  ;;  %v1740_v50 = vmul.f32 %v6821_v52, %v1686_v41  ;;  %v1738_v51 = vmul.f32 %v6823_v58, %v1684_v46  ;;  %v1687_v53 = vsel %vm1583_vm4, %v1548_v4, %v1655_v39  ;;  %v1439_v55 = vadd.f32 %v1438_v0, %v6819_v49 }
 0x218   : > { %1939 = vrot.lane.b32.xlu0 %v6853_v8, %s6355_s10  ;;  %v1741_v61 = vmul.f32 %v6825_v60, %v1687_v53  ;;  %vm1581_vm13 = vcmp.gt.f32.partialorder %v1435_v47, 0.0  ;;  %v1653_v63 = vmul.f32 %v1621_v27, %v1435_v47  ;;  %vm1586_vm3 = vcmp.gt.f32.partialorder %v1552_v48, 0.0  ;;  %2139 = vrot.lane.b32.xlu1 %v6840_v45, %s6357_s12 }
 0x219   : > { %v1658_v43 = vmul.f32 %v1626_v56, %v1552_v48  ;;  %vm1584_vm12 = vcmp.gt.f32.partialorder %v1439_v55, 0.0  ;;  %v1656_v57 = vmul.f32 %v1626_v56, %v1439_v55  ;;  %v1554_v5 = vadd.f32 %v1553_v13, %v6819_v49 }
 0x21a   : > { %v1685_v7 = vsel %vm1581_vm13, %v1435_v47, %v1653_v63  ;;  %v1441_v40 = vadd.f32 %v1440_v16, %v6819_v49 }
 0x21b   : > { %v1739_v2 = vmul.f32 %v6827_v3, %v1685_v7  ;;  %v1690_v9 = vsel %vm1586_vm3, %v1552_v48, %v1658_v43  ;;  %v1688_v10 = vsel %vm1584_vm12, %v1439_v55, %v1656_v57  ;;  %vm1587_vm14 = vcmp.gt.f32.partialorder %v1554_v5, 0.0 }
 0x21c   : > { %1943 = vrot.lane.b32.xlu0 %v6849_v62, %s6355_s10  ;;  %v1744_v11 = vmul.f32 %v6821_v52, %v1690_v9  ;;  %v1742_v12 = vmul.f32 %v6823_v58, %v1688_v10  ;;  %v1659_v0 = vmul.f32 %v1626_v56, %v1554_v5  ;;  %vm1585_vm15 = vcmp.gt.f32.partialorder %v1441_v40, 0.0  ;;  %2143 = vrot.lane.b32.xlu1 %v6838_v44, %s6357_s12 }
 0x21d   : > { %v1657_v13 = vmul.f32 %v1626_v56, %v1441_v40 }
 0x21e   : > { %v6941_v14 = vpack.c.bf16 %v1744_v11, %v1740_v50  ;;  %v6943_v49 = vpack.c.bf16 %v1742_v12, %v1738_v51  ;;  %v1691_v15 = vsel %vm1587_vm14, %v1554_v5, %v1659_v0 }
 0x21f   : > { %v1745_v37 = vmul.f32 %v6825_v60, %v1691_v15  ;;  %v1689_v16 = vsel %vm1585_vm15, %v1441_v40, %v1657_v13 }
 0x220   : > { %2040 = vrot.lane.b32.xlu0 %v6853_v8, %s6356_s11  ;;  %v1743_v52 = vmul.f32 %v6827_v3, %v1689_v16  ;;  %2304 = vrot.lane.b32.xlu1 %v6840_v45, %s6358_s13 }
 0x221   : > { %v6951_v58 = vpack.c.bf16 %v1745_v37, %v1741_v61 }
 0x222   : > { %v6953_v1 = vpack.c.bf16 %v1743_v52, %v1739_v2 }
 0x223   : > { %8810 = vst [vmem:[#allocation8_spill] sm:$0xff] %v6951_v58 }
 0x224   : > { %2044 = vrot.lane.b32.xlu0 %v6849_v62, %s6356_s11  ;;  %2308 = vrot.lane.b32.xlu1 %v6838_v44, %s6358_s13 }
 0x228   : > { %2141 = vrot.lane.b32.xlu0 %v6853_v8, %s6357_s12  ;;  %2405 = vrot.lane.b32.xlu1 %v6840_v45, %s6359_s14 }
 0x22c   : > { %2145 = vrot.lane.b32.xlu0 %v6849_v62, %s6357_s12  ;;  %2409 = vrot.lane.b32.xlu1 %v6838_v44, %s6359_s14 }
 0x230   : > { %2306 = vrot.lane.b32.xlu0 %v6853_v8, %s6358_s13  ;;  %2512 = vrot.lane.b32.xlu1 %v6849_v62, %s6360_s15 }
 0x234   : > { %2310 = vrot.lane.b32.xlu0 %v6849_v62, %s6358_s13  ;;  %2613 = vrot.lane.b32.xlu1 %v6849_v62, %s6361_s16 }
 0x238   : > { %2407 = vrot.lane.b32.xlu0 %v6853_v8, %s6359_s14  ;;  %2508 = vrot.lane.b32.xlu1 %v6853_v8, %s6360_s15 }
 0x23c   : > { %2411 = vrot.lane.b32.xlu0 %v6849_v62, %s6359_s14  ;;  %2714 = vrot.lane.b32.xlu1 %v6849_v62, %s6362_s17 }
 0x240   : > { %2518 = vrot.lane.b32.xlu0 %v6873_v32, %s6360_s15  ;;  %1844 = vrot.lane.b32.xlu1 %v6875_v33, %s6354_s9 }
 0x244   : > { %2619 = vrot.lane.b32.xlu0 %v6873_v32, %s6361_s16  ;;  %1848 = vrot.lane.b32.xlu1 %v6873_v32, %s6354_s9 }
 0x248   : > { %2720 = vrot.lane.b32.xlu0 %v6873_v32, %s6362_s17  ;;  %1945 = vrot.lane.b32.xlu1 %v6875_v33, %s6355_s10 }
 0x24c   : > { %2514 = vrot.lane.b32.xlu0 %v6875_v33, %s6360_s15  ;;  %1949 = vrot.lane.b32.xlu1 %v6873_v32, %s6355_s10 }
 0x250   : > { %1846 = vrot.lane.b32.xlu0 %v6891_v6, %s6354_s9  ;;  %2046 = vrot.lane.b32.xlu1 %v6875_v33, %s6356_s11 }
 0x254   : > { %1850 = vrot.lane.b32.xlu0 %v6884_v59, %s6354_s9  ;;  %2050 = vrot.lane.b32.xlu1 %v6873_v32, %s6356_s11 }
 0x258   : > { %1947 = vrot.lane.b32.xlu0 %v6891_v6, %s6355_s10  ;;  %2147 = vrot.lane.b32.xlu1 %v6875_v33, %s6357_s12 }
 0x25c   : > { %1951 = vrot.lane.b32.xlu0 %v6884_v59, %s6355_s10  ;;  %2151 = vrot.lane.b32.xlu1 %v6873_v32, %s6357_s12 }
 0x260   : > { %2048 = vrot.lane.b32.xlu0 %v6891_v6, %s6356_s11  ;;  %2312 = vrot.lane.b32.xlu1 %v6875_v33, %s6358_s13 }
 0x264   : > { %2052 = vrot.lane.b32.xlu0 %v6884_v59, %s6356_s11  ;;  %2316 = vrot.lane.b32.xlu1 %v6873_v32, %s6358_s13 }
 0x268   : > { %2149 = vrot.lane.b32.xlu0 %v6891_v6, %s6357_s12  ;;  %2413 = vrot.lane.b32.xlu1 %v6875_v33, %s6359_s14 }
 0x26c   : > { %2153 = vrot.lane.b32.xlu0 %v6884_v59, %s6357_s12  ;;  %2417 = vrot.lane.b32.xlu1 %v6873_v32, %s6359_s14 }
 0x270   : > { %2314 = vrot.lane.b32.xlu0 %v6891_v6, %s6358_s13  ;;  %2520 = vrot.lane.b32.xlu1 %v6884_v59, %s6360_s15 }
 0x271   : > { %v7035_v60 = vpop.permute.xlu0 %2510  ;;  %v7037_v3 = vpop.permute.xlu1 %1836 }
 0x274   : > { %2318 = vrot.lane.b32.xlu0 %v6884_v59, %s6358_s13  ;;  %2621 = vrot.lane.b32.xlu1 %v6884_v59, %s6361_s16 }
 0x275   : > { %v7043_v17 = vpop.permute.xlu0 %2611  ;;  %v7045_v42 = vpop.permute.xlu1 %1840 }
 0x278   : > { %2415 = vrot.lane.b32.xlu0 %v6891_v6, %s6359_s14  ;;  %2516 = vrot.lane.b32.xlu1 %v6891_v6, %s6360_s15 }
 0x279   : > { %v7051_v18 = vpop.permute.xlu0 %2712  ;;  %v7053_v19 = vpop.permute.xlu1 %1937 }
 0x27a   : > { %8811 = vst [vmem:[#allocation9_spill] sm:$0xff] %v7053_v19 }
 0x27c   : > { %2419 = vrot.lane.b32.xlu0 %v6884_v59, %s6359_s14  ;;  %2722 = vrot.lane.b32.xlu1 %v6884_v59, %s6362_s17 }
 0x27d   : > { %v7059_v20 = vpop.permute.xlu0 %2506  ;;  %v7061_v21 = vpop.permute.xlu1 %1941 }
 0x27e   : > { %8812 = vst [vmem:[#allocation10_spill] sm:$0xff] %v7061_v21 }
 0x280   : > { %2526 = vrot.lane.b32.xlu0 %v6908_v28, %s6360_s15  ;;  %1852 = vrot.lane.b32.xlu1 %v6916_v30, %s6354_s9 }
 0x281   : > { %v7067_v22 = vpop.permute.xlu0 %1838  ;;  %v7069_v23 = vpop.permute.xlu1 %2038 }
 0x282   : > { %8813 = vst [vmem:[#allocation11_spill] sm:$0xff] %v7069_v23 }
 0x284   : > { %2627 = vrot.lane.b32.xlu0 %v6908_v28, %s6361_s16  ;;  %1856 = vrot.lane.b32.xlu1 %v6908_v28, %s6354_s9 }
 0x285   : > { %v7075_v24 = vpop.permute.xlu0 %1842  ;;  %v7077_v25 = vpop.permute.xlu1 %2042 }
 0x286   : > { %8814 = vst [vmem:[#allocation12_spill] sm:$0xff] %v7075_v24  ;;  %8815 = vst [vmem:[#allocation13_spill] sm:$0xff] %v7077_v25 }
 0x288   : > { %2728 = vrot.lane.b32.xlu0 %v6908_v28, %s6362_s17  ;;  %1953 = vrot.lane.b32.xlu1 %v6916_v30, %s6355_s10 }
 0x28a   : > { %v7083_v26 = vpop.permute.xlu0 %1939  ;;  %v7085_v4 = vpop.permute.xlu1 %2139 }
 0x28b   : > { %8816 = vst [vmem:[#allocation14_spill] sm:$0xff] %v7083_v26  ;;  %8817 = vst [vmem:[#allocation15_spill] sm:$0xff] %v7085_v4 }
 0x28c   : > { %1854 = vrot.lane.b32.xlu0 %v6920_v35, %s6354_s9  ;;  %1957 = vrot.lane.b32.xlu1 %v6908_v28, %s6355_s10 }
 0x28e   : > { %v7091_v27 = vpop.permute.xlu0 %1943  ;;  %v7093_v29 = vpop.permute.xlu1 %2143 }
 0x28f   : > { %8818 = vst [vmem:[#allocation16_spill] sm:$0xff] %v7091_v27  ;;  %8819 = vst [vmem:[#allocation17_spill] sm:$0xff] %v7093_v29 }
 0x290   : > { %1858 = vrot.lane.b32.xlu0 %v6918_v36, %s6354_s9  ;;  %2054 = vrot.lane.b32.xlu1 %v6916_v30, %s6356_s11 }
 0x292   : > { %v7099_v38 = vpop.permute.xlu0 %2040  ;;  %v2305_v31 = vpop.permute.xlu1 %2304 }
 0x293   : > { %8820 = vst [vmem:[#allocation18_spill] sm:$0xff] %v7099_v38 }
 0x294   : > { %1955 = vrot.lane.b32.xlu0 %v6920_v35, %s6355_s10  ;;  %2058 = vrot.lane.b32.xlu1 %v6908_v28, %s6356_s11 }
 0x296   : > { %v7105_v34 = vpop.permute.xlu0 %2044  ;;  %v2309_v39 = vpop.permute.xlu1 %2308 }
 0x297   : > { %8821 = vst [vmem:[#allocation19_spill] sm:$0xff] %v7105_v34 }
 0x298   : > { %1959 = vrot.lane.b32.xlu0 %v6918_v36, %s6355_s10  ;;  %2155 = vrot.lane.b32.xlu1 %v6916_v30, %s6357_s12 }
 0x29a   : > { %v7111_v41 = vpop.permute.xlu0 %2141  ;;  %v7113_v46 = vpop.permute.xlu1 %2405 }
 0x29b   : > { %8822 = vst [vmem:[#allocation20_spill] sm:$0xff] %v7111_v41 }
 0x29c   : > { %2056 = vrot.lane.b32.xlu0 %v6920_v35, %s6356_s11  ;;  %2159 = vrot.lane.b32.xlu1 %v6908_v28, %s6357_s12 }
 0x29e   : > { %v7119_v47 = vpop.permute.xlu0 %2145  ;;  %v7121_v48 = vpop.permute.xlu1 %2409 }
 0x29f   : > { %8823 = vst [vmem:[#allocation21_spill] sm:$0xff] %v7119_v47 }
 0x2a0   : > { %2060 = vrot.lane.b32.xlu0 %v6918_v36, %s6356_s11  ;;  %2320 = vrot.lane.b32.xlu1 %v6916_v30, %s6358_s13 }
 0x2a2   : > { %v2307_v50 = vpop.permute.xlu0 %2306  ;;  %v2513_v51 = vpop.permute.xlu1 %2512 }
 0x2a3   : > { %v2338_v53 = vsel %vm525_vm5, %v2307_v50, %v2309_v39  ;;  %v2337_v55 = vsel %vm525_vm5, %v2305_v31, %v2307_v50  ;;  %v2541_v56 = vsel %vm591_vm7, %v7035_v60, %v2513_v51 }
 0x2a4   : > { %2157 = vrot.lane.b32.xlu0 %v6920_v35, %s6357_s12  ;;  %2861 = vmatprep.subr.bf16.mxu0 %v2338_v53 }
 0x2a5   : > { %2324 = vrot.lane.b32.xlu1 %v6908_v28, %s6358_s13  ;;  %2862 = vmatpush1.bf16.msra.mxu0 %v2337_v55 }
 0x2a6   : > { %5698 = vmatprep.subr.bf16.mxu1 %v2541_v56  ;;  %v2311_v61 = vpop.permute.xlu0 %2310  ;;  %v7136_v43 = vpop.permute.xlu1 %2613 }
 0x2a7   : > { %v2339_v63 = vsel %vm525_vm5, %v2309_v39, %v2311_v61 }
 0x2a8   : > { %2161 = vrot.lane.b32.xlu0 %v6918_v36, %s6357_s12  ;;  %5699 = vmatpush3.bf16.msra.mxu1 %v2339_v63 }
 0x2a9   : > { %2421 = vrot.lane.b32.xlu1 %v6916_v30, %s6359_s14 }
 0x2aa   : > { %v7142_v57 = vpop.permute.xlu0 %2407  ;;  %v7144_v5 = vpop.permute.xlu1 %2508 }
 0x2ac   : > { %2322 = vrot.lane.b32.xlu0 %v6920_v35, %s6358_s13 }
 0x2ad   : > { %2425 = vrot.lane.b32.xlu1 %v6908_v28, %s6359_s14 }
 0x2ae   : > { %v7150_v7 = vpop.permute.xlu0 %2411  ;;  %v7152_v40 = vpop.permute.xlu1 %2714 }
 0x2b0   : > { %2326 = vrot.lane.b32.xlu0 %v6918_v36, %s6358_s13 }
 0x2b1   : > { %2528 = vrot.lane.b32.xlu1 %v6918_v36, %s6360_s15 }
 0x2b2   : > { %v7158_v2 = vpop.permute.xlu0 %2518  ;;  %v7160_v9 = vpop.permute.xlu1 %1844 }
 0x2b4   : > { %2423 = vrot.lane.b32.xlu0 %v6920_v35, %s6359_s14 }
 0x2b5   : > { %2629 = vrot.lane.b32.xlu1 %v6918_v36, %s6361_s16 }
 0x2b6   : > { %v7166_v10 = vpop.permute.xlu0 %2619  ;;  %v7168_v11 = vpop.permute.xlu1 %1848 }
 0x2b8   : > { %2427 = vrot.lane.b32.xlu0 %v6918_v36, %s6359_s14 }
 0x2b9   : > { %2524 = vrot.lane.b32.xlu1 %v6920_v35, %s6360_s15 }
 0x2ba   : > { %v7174_v12 = vpop.permute.xlu0 %2720  ;;  %v7176_v0 = vpop.permute.xlu1 %1945 }
 0x2bb   : > { %8824 = vst [vmem:[#allocation22_spill] sm:$0xff] %v7176_v0 }
 0x2bc   : > { %2534 = vrot.lane.b32.xlu0 %v6941_v14, %s6360_s15 }
 0x2bd   : > { %2730 = vrot.lane.b32.xlu1 %v6918_v36, %s6362_s17 }
 0x2be   : > { %v7182_v13 = vpop.permute.xlu0 %2514  ;;  %v7184_v15 = vpop.permute.xlu1 %1949 }
 0x2bf   : > { %8825 = vst [vmem:[#allocation23_spill] sm:$0xff] %v7184_v15 }
 0x2c0   : > { %2433 = vrot.lane.b32.xlu0 %v6941_v14, %s6359_s14 }
 0x2c1   : > { %1860 = vrot.lane.b32.xlu1 %v6943_v49, %s6354_s9 }
 0x2c2   : > { %v7190_v37 = vpop.permute.xlu0 %1846  ;;  %v7192_v16 = vpop.permute.xlu1 %2046 }
 0x2c3   : > { %8826 = vst [vmem:[#allocation24_spill] sm:$0xff] %v7192_v16 }
 0x2c4   : > { %2429 = vrot.lane.b32.xlu0 %v6943_v49, %s6359_s14 }
 0x2c5   : > { %1864 = vrot.lane.b32.xlu1 %v6941_v14, %s6354_s9 }
 0x2c6   : > { %v7198_v52 = vpop.permute.xlu0 %1850  ;;  %v7200_v31 = vpop.permute.xlu1 %2050 }
 0x2c7   : > { %8827 = vst [vmem:[#allocation25_spill] sm:$0xff] %v7198_v52  ;;  %8828 = vst [vmem:[#allocation26_spill] sm:$0xff] %v7200_v31 }
 0x2c8   : > { %1862 = vrot.lane.b32.xlu0 %v6953_v1, %s6354_s9 }
 0x2c9   : > { %1961 = vrot.lane.b32.xlu1 %v6943_v49, %s6355_s10 }
 0x2ca   : > { %v7206_v39 = vpop.permute.xlu0 %1947  ;;  %v7208_v50 = vpop.permute.xlu1 %2147 }
 0x2cb   : > { %8829 = vst [vmem:[#allocation27_spill] sm:$0xff] %v7206_v39  ;;  %8830 = vst [vmem:[#allocation28_spill] sm:$0xff] %v7208_v50 }
 0x2cc   : > { %1866 = vrot.lane.b32.xlu0 %v6951_v58, %s6354_s9 }
 0x2cd   : > { %1965 = vrot.lane.b32.xlu1 %v6941_v14, %s6355_s10 }
 0x2ce   : > { %v7214_v51 = vpop.permute.xlu0 %1951  ;;  %v7216_v53 = vpop.permute.xlu1 %2151 }
 0x2cf   : > { %8831 = vst [vmem:[#allocation29_spill] sm:$0xff] %v7214_v51  ;;  %8832 = vst [vmem:[#allocation30_spill] sm:$0xff] %v7216_v53 }
 0x2d0   : > { %1963 = vrot.lane.b32.xlu0 %v6953_v1, %s6355_s10 }
 0x2d1   : > { %2062 = vrot.lane.b32.xlu1 %v6943_v49, %s6356_s11 }
 0x2d2   : > { %v7222_v55 = vpop.permute.xlu0 %2048  ;;  %v2313_v56 = vpop.permute.xlu1 %2312 }
 0x2d3   : > { %8833 = vst [vmem:[#allocation31_spill] sm:$0xff] %v7222_v55 }
 0x2d4   : > { %1967 = vrot.lane.b32.xlu0 %v6951_v58, %s6355_s10 }
 0x2d5   : > { %2066 = vrot.lane.b32.xlu1 %v6941_v14, %s6356_s11 }
 0x2d6   : > { %v7228_v61 = vpop.permute.xlu0 %2052  ;;  %v2317_v63 = vpop.permute.xlu1 %2316 }
 0x2d7   : > { %8834 = vst [vmem:[#allocation32_spill] sm:$0xff] %v7228_v61 }
 0x2d8   : > { %2064 = vrot.lane.b32.xlu0 %v6953_v1, %s6356_s11 }
 0x2d9   : > { %2163 = vrot.lane.b32.xlu1 %v6943_v49, %s6357_s12 }
 0x2da   : > { %v7234_v54 = vpop.permute.xlu0 %2149  ;;  %v7236_v47 = vpop.permute.xlu1 %2413 }
 0x2db   : > { %8835 = vst [vmem:[#allocation33_spill] sm:$0xff] %v7234_v54 }
 0x2dc   : > { %2068 = vrot.lane.b32.xlu0 %v6951_v58, %s6356_s11  ;;  %s8865_s11 = smov 78  }
 0x2dd   : > { %2167 = vrot.lane.b32.xlu1 %v6941_v14, %s6357_s12 }
 0x2de   : > { %v7242_v52 = vpop.permute.xlu0 %2153  ;;  %v7244_v61 = vpop.permute.xlu1 %2417 }
 0x2df   : > { %8836 = vst [vmem:[#allocation34_spill] sm:$0xff] %v7242_v52 }
 0x2e0   : > { %2165 = vrot.lane.b32.xlu0 %v6953_v1, %s6357_s12 }
 0x2e1   : > { %2328 = vrot.lane.b32.xlu1 %v6943_v49, %s6358_s13 }
 0x2e2   : > { %v2315_v24 = vpop.permute.xlu0 %2314  ;;  %v2521_v34 = vpop.permute.xlu1 %2520 }
 0x2e3   : > { %v2341_v51 = vsel %vm525_vm5, %v2315_v24, %v2317_v63  ;;  %v2340_v27 = vsel %vm525_vm5, %v2313_v56, %v2315_v24  ;;  %v2544_v52 = vsel %vm591_vm7, %v7158_v2, %v2521_v34 }
 0x2e4   : > { %2169 = vrot.lane.b32.xlu0 %v6951_v58, %s6357_s12  ;;  %2863 = vmatprep.subr.bf16.mxu0 %v2341_v51  ;;  %v6312_v51 = vld [vmem:[%s8728_s5 + $0x1c] ss:$12 sps:$4 sm:$0xff]   ;;  %s8868_s12 = smov 77  }
 0x2e5   : > { %2332 = vrot.lane.b32.xlu1 %v6941_v14, %s6358_s13  ;;  %2864 = vmatpush1.bf16.msra.mxu0 %v2340_v27 }
 0x2e6   : > { %5700 = vmatprep.subr.bf16.mxu1 %v2544_v52  ;;  %v2319_v50 = vpop.permute.xlu0 %2318  ;;  %v7259_v53 = vpop.permute.xlu1 %2621  ;;  %2979 = vmatprep.mubr.bf16.mxu1 %v6312_v51 }
 0x2e7   : > { %v2342_v54 = vsel %vm525_vm5, %v2317_v63, %v2319_v50  ;;  %2893 = vmatprep.mubr.bf16.mxu0 %v6312_v51 }
 0x2e8   : > { %2330 = vrot.lane.b32.xlu0 %v6953_v1, %s6358_s13  ;;  %5701 = vmatpush3.bf16.msra.mxu1 %v2342_v54 }
 0x2e9   : > { %2635 = vrot.lane.b32.xlu1 %v6941_v14, %s6361_s16 }
 0x2ea   : > { %v7265_v24 = vpop.permute.xlu0 %2415  ;;  %v7267_v34 = vpop.permute.xlu1 %2516 }
 0x2ec   : > { %2334 = vrot.lane.b32.xlu0 %v6951_v58, %s6358_s13 }
 0x2ed   : > { %2536 = vrot.lane.b32.xlu1 %v6951_v58, %s6360_s15 }
 0x2ee   : > { %v7273_v27 = vpop.permute.xlu0 %2419  ;;  %v7275_v52 = vpop.permute.xlu1 %2722 }
 0x2f0   : > { %2637 = vrot.lane.b32.xlu0 %v6951_v58, %s6361_s16 }
 0x2f1   : > { %2431 = vrot.lane.b32.xlu1 %v6953_v1, %s6359_s14 }
 0x2f2   : > { %v7281_v54 = vpop.permute.xlu0 %2526  ;;  %v7283_v50 = vpop.permute.xlu1 %1852 }
 0x2f3   : > { %8837 = vst [vmem:[#allocation35_spill] sm:$0xff] %v7283_v50 }
 0x2f4   : > { %2522 = vrot.lane.b32.xlu0 %v6916_v30, %s6360_s15 }
 0x2f5   : > { %2435 = vrot.lane.b32.xlu1 %v6951_v58, %s6359_s14 }
 0x2f6   : > { %v7292_v56 = vpop.permute.xlu0 %2627  ;;  %v7294_v63 = vpop.permute.xlu1 %1856 }
 0x2f8   : > { %2736 = vrot.lane.b32.xlu0 %v6941_v14, %s6362_s17 }
 0x2f9   : > { %2532 = vrot.lane.b32.xlu1 %v6953_v1, %s6360_s15 }
 0x2fa   : > { %v7300_v4 = vpop.permute.xlu0 %2728  ;;  %v7302_v36 = vpop.permute.xlu1 %1953 }
 0x2fb   : > { %8838 = vst [vmem:[#allocation36_spill] sm:$0xff] %v7302_v36 }
 0x2fc   : > { %2530 = vrot.lane.b32.xlu0 %v6943_v49, %s6360_s15  ;;  %s8869_s15 = smov 76  }
 0x2fd   : > { %2738 = vrot.lane.b32.xlu1 %v6951_v58, %s6362_s17 }
 0x2fe   : > { %v7308_v41 = vpop.permute.xlu0 %1854  ;;  %v7310_v51 = vpop.permute.xlu1 %1957 }
 0x2ff   : > { %8839 = vst [vmem:[#allocation37_spill] sm:$0xff] %v7310_v51 }
 0x300   : > { %2607 = vrot.lane.b32.xlu0 %v6840_v45, %s6361_s16 }
 0x301   : > { %2609 = vrot.lane.b32.xlu1 %v6853_v8, %s6361_s16 }
 0x302   : > { %v7316_v29 = vpop.permute.xlu0 %1858  ;;  %v7318_v16 = vpop.permute.xlu1 %2054 }
 0x303   : > { %8840 = vst [vmem:[#allocation38_spill] sm:$0xff] %v7316_v29  ;;  %8841 = vst [vmem:[#allocation39_spill] sm:$0xff] %v7318_v16 }
 0x304   : > { %2615 = vrot.lane.b32.xlu0 %v6875_v33, %s6361_s16 }
 0x305   : > { %2617 = vrot.lane.b32.xlu1 %v6891_v6, %s6361_s16 }
 0x306   : > { %v7324_v58 = vpop.permute.xlu0 %1955  ;;  %v7326_v59 = vpop.permute.xlu1 %2058 }
 0x307   : > { %8842 = vst [vmem:[#allocation40_spill] sm:$0xff] %v7324_v58  ;;  %8843 = vst [vmem:[#allocation41_spill] sm:$0xff] %v7326_v59 }
 0x308   : > { %2623 = vrot.lane.b32.xlu0 %v6916_v30, %s6361_s16 }
 0x309   : > { %2625 = vrot.lane.b32.xlu1 %v6920_v35, %s6361_s16 }
 0x30a   : > { %v7332_v55 = vpop.permute.xlu0 %1959  ;;  %v7334_v29 = vpop.permute.xlu1 %2155 }
 0x30b   : > { %8844 = vst [vmem:[#allocation42_spill] sm:$0xff] %v7332_v55  ;;  %8845 = vst [vmem:[#allocation43_spill] sm:$0xff] %v7334_v29 }
 0x30c   : > { %2631 = vrot.lane.b32.xlu0 %v6943_v49, %s6361_s16 }
 0x30d   : > { %2633 = vrot.lane.b32.xlu1 %v6953_v1, %s6361_s16 }
 0x30e   : > { %v7340_v16 = vpop.permute.xlu0 %2056  ;;  %v7342_v31 = vpop.permute.xlu1 %2159 }
 0x30f   : > { %8846 = vst [vmem:[#allocation44_spill] sm:$0xff] %v7340_v16  ;;  %8847 = vst [vmem:[#allocation45_spill] sm:$0xff] %v7342_v31 }
 0x310   : > { %2708 = vrot.lane.b32.xlu0 %v6840_v45, %s6362_s17 }
 0x311   : > { %2710 = vrot.lane.b32.xlu1 %v6853_v8, %s6362_s17 }
 0x312   : > { %v7348_v59 = vpop.permute.xlu0 %2060  ;;  %v2321_v55 = vpop.permute.xlu1 %2320 }
 0x313   : > { %8848 = vst [vmem:[#allocation46_spill] sm:$0xff] %v7348_v59 }
 0x314   : > { %2716 = vrot.lane.b32.xlu0 %v6875_v33, %s6362_s17 }
 0x315   : > { %2718 = vrot.lane.b32.xlu1 %v6891_v6, %s6362_s17 }
 0x316   : > { %v7354_v29 = vpop.permute.xlu0 %2157 }
 0x317   : > { %8849 = vst [vmem:[#allocation47_spill] sm:$0xff] %v7354_v29  ;;  %v2325_v16 = vpop.permute.xlu1 %2324 }
 0x318   : > { %2724 = vrot.lane.b32.xlu0 %v6916_v30, %s6362_s17 }
 0x319   : > { %2726 = vrot.lane.b32.xlu1 %v6920_v35, %s6362_s17 }
 0x31a   : > { %v7360_v31 = vpop.permute.xlu0 %2161 }
 0x31b   : > { %8850 = vst [vmem:[#allocation48_spill] sm:$0xff] %v7360_v31  ;;  %v7362_v23 = vpop.permute.xlu1 %2421 }
 0x31c   : > { %2732 = vrot.lane.b32.xlu0 %v6943_v49, %s6362_s17 }
 0x31d   : > { %2734 = vrot.lane.b32.xlu1 %v6953_v1, %s6362_s17 }
 0x31e   : > { %v2323_v59 = vpop.permute.xlu0 %2322 }
 0x31f   : > { %v7368_v38 = vpop.permute.xlu1 %2425  ;;  %v2344_v29 = vsel %vm525_vm5, %v2323_v59, %v2325_v16  ;;  %v2343_v25 = vsel %vm525_vm5, %v2321_v55, %v2323_v59 }
 0x320   : > { %3251 = vrot.lane.b32.xlu0 %v6838_v44, %s6363_s18  ;;  %2865 = vmatprep.subr.bf16.mxu0 %v2344_v29 }
 0x321   : > { %3249 = vrot.lane.b32.xlu1 %v6853_v8, %s6363_s18  ;;  %2866 = vmatpush1.bf16.msra.mxu0 %v2343_v25 }
 0x322   : > { %v2327_v31 = vpop.permute.xlu0 %2326 }
 0x323   : > { %v2529_v62 = vpop.permute.xlu1 %2528  ;;  %v2345_v58 = vsel %vm525_vm5, %v2325_v16, %v2327_v31 }
 0x324   : > { %3257 = vrot.lane.b32.xlu0 %v6891_v6, %s6363_s18  ;;  %v2547_v36 = vsel %vm591_vm7, %v7281_v54, %v2529_v62 }
 0x325   : > { %3247 = vrot.lane.b32.xlu1 %v6840_v45, %s6363_s18  ;;  %5702 = vmatprep.subr.bf16.mxu1 %v2547_v36 }
 0x326   : > { %v7383_v59 = vpop.permute.xlu0 %2423  ;;  %5703 = vmatpush3.bf16.msra.mxu1 %v2345_v58 }
 0x327   : > { %v7385_v29 = vpop.permute.xlu1 %2629 }
 0x328   : > { %3255 = vrot.lane.b32.xlu0 %v6875_v33, %s6363_s18 }
 0x329   : > { %3259 = vrot.lane.b32.xlu1 %v6873_v32, %s6363_s18 }
 0x32a   : > { %v7391_v25 = vpop.permute.xlu0 %2427 }
 0x32b   : > { %v7393_v62 = vpop.permute.xlu1 %2524 }
 0x32c   : > { %3267 = vrot.lane.b32.xlu0 %v6908_v28, %s6363_s18 }
 0x32d   : > { %3265 = vrot.lane.b32.xlu1 %v6920_v35, %s6363_s18 }
 0x32e   : > { %v7399_v36 = vpop.permute.xlu0 %2534 }
 0x32f   : > { %v7401_v58 = vpop.permute.xlu1 %2730 }
 0x330   : > { %3273 = vrot.lane.b32.xlu0 %v6953_v1, %s6363_s18 }
 0x331   : > { %3263 = vrot.lane.b32.xlu1 %v6916_v30, %s6363_s18 }
 0x332   : > { %v7407_v16 = vpop.permute.xlu0 %2433 }
 0x333   : > { %v7409_v31 = vpop.permute.xlu1 %1860 }
 0x334   : > { %8851 = vst [vmem:[#allocation49_spill] sm:$0xff] %v7409_v31  ;;  %3271 = vrot.lane.b32.xlu0 %v6943_v49, %s6363_s18 }
 0x335   : > { %3275 = vrot.lane.b32.xlu1 %v6941_v14, %s6363_s18 }
 0x336   : > { %v7415_v55 = vpop.permute.xlu0 %2429 }
 0x337   : > { %v7417_v51 = vpop.permute.xlu1 %1864 }
 0x338   : > { %8852 = vst [vmem:[#allocation50_spill] sm:$0xff] %v7417_v51  ;;  %3352 = vrot.lane.b32.xlu0 %v6838_v44, %s6364_s19 }
 0x339   : > { %3350 = vrot.lane.b32.xlu1 %v6853_v8, %s6364_s19 }
 0x33a   : > { %v7423_v0 = vpop.permute.xlu0 %1862 }
 0x33b   : > { %8853 = vst [vmem:[#allocation51_spill] sm:$0xff] %v7423_v0  ;;  %v7425_v39 = vpop.permute.xlu1 %1961 }
 0x33c   : > { %8854 = vst [vmem:[#allocation52_spill] sm:$0xff] %v7425_v39  ;;  %3358 = vrot.lane.b32.xlu0 %v6891_v6, %s6364_s19 }
 0x33d   : > { %3348 = vrot.lane.b32.xlu1 %v6840_v45, %s6364_s19 }
 0x33e   : > { %v7431_v15 = vpop.permute.xlu0 %1866 }
 0x33f   : > { %8855 = vst [vmem:[#allocation53_spill] sm:$0xff] %v7431_v15  ;;  %v7433_v19 = vpop.permute.xlu1 %1965 }
 0x340   : > { %8856 = vst [vmem:[#allocation54_spill] sm:$0xff] %v7433_v19  ;;  %3356 = vrot.lane.b32.xlu0 %v6875_v33, %s6364_s19 }
 0x341   : > { %3360 = vrot.lane.b32.xlu1 %v6873_v32, %s6364_s19 }
 0x342   : > { %v7439_v26 = vpop.permute.xlu0 %1963 }
 0x343   : > { %8857 = vst [vmem:[#allocation55_spill] sm:$0xff] %v7439_v26  ;;  %v7441_v21 = vpop.permute.xlu1 %2062 }
 0x344   : > { %8858 = vst [vmem:[#allocation56_spill] sm:$0xff] %v7441_v21  ;;  %3368 = vrot.lane.b32.xlu0 %v6908_v28, %s6364_s19 }
 0x345   : > { %3366 = vrot.lane.b32.xlu1 %v6920_v35, %s6364_s19 }
 0x346   : > { %v7447_v39 = vpop.permute.xlu0 %1967 }
 0x347   : > { %8859 = vst [vmem:[#allocation57_spill] sm:$0xff] %v7447_v39  ;;  %v7449_v15 = vpop.permute.xlu1 %2066 }
 0x348   : > { %8860 = vst [vmem:[#allocation58_spill] sm:$0xff] %v7449_v15  ;;  %3374 = vrot.lane.b32.xlu0 %v6953_v1, %s6364_s19 }
 0x349   : > { %3364 = vrot.lane.b32.xlu1 %v6916_v30, %s6364_s19 }
 0x34a   : > { %v7455_v19 = vpop.permute.xlu0 %2064 }
 0x34b   : > { %8861 = vst [vmem:[#allocation59_spill] sm:$0xff] %v7455_v19  ;;  %v7457_v26 = vpop.permute.xlu1 %2163 }
 0x34c   : > { %8862 = vst [vmem:[#allocation60_spill] sm:$0xff] %v7457_v26  ;;  %3372 = vrot.lane.b32.xlu0 %v6943_v49, %s6364_s19 }
 0x34d   : > { %3376 = vrot.lane.b32.xlu1 %v6941_v14, %s6364_s19 }
 0x34e   : > { %v7463_v21 = vpop.permute.xlu0 %2068 }
 0x34f   : > { %8863 = vst [vmem:[#allocation61_spill] sm:$0xff] %v7463_v21  ;;  %v7465_v39 = vpop.permute.xlu1 %2167 }
 0x350   : > { %8864 = vst [vmem:[#allocation62_spill] sm:$0xff] %v7465_v39  ;;  %3453 = vrot.lane.b32.xlu0 %v6838_v44, %s8865_s11 }
 0x351   : > { %3451 = vrot.lane.b32.xlu1 %v6853_v8, %s8865_s11 }
 0x352   : > { %v7471_v15 = vpop.permute.xlu0 %2165 }
 0x353   : > { %8866 = vst [vmem:[#allocation63_spill] sm:$0xff] %v7471_v15  ;;  %v2329_v19 = vpop.permute.xlu1 %2328 }
 0x354   : > { %3459 = vrot.lane.b32.xlu0 %v6891_v6, %s8865_s11 }
 0x355   : > { %3449 = vrot.lane.b32.xlu1 %v6840_v45, %s8865_s11 }
 0x356   : > { %v7477_v26 = vpop.permute.xlu0 %2169 }
 0x357   : > { %8867 = vst [vmem:[#allocation64_spill] sm:$0xff] %v7477_v26  ;;  %v2333_v21 = vpop.permute.xlu1 %2332  ;;  %v2439_v26 = vsel %vm558_vm6, %v7142_v57, %v7121_v48 }
 0x358   : > { %3457 = vrot.lane.b32.xlu0 %v6875_v33, %s8865_s11 }
 0x359   : > { %3461 = vrot.lane.b32.xlu1 %v6873_v32, %s8865_s11 }
 0x35a   : > { %v2331_v39 = vpop.permute.xlu0 %2330 }
 0x35b   : > { %v7483_v31 = vpop.permute.xlu1 %2635  ;;  %v2347_v15 = vsel %vm525_vm5, %v2331_v39, %v2333_v21  ;;  %v2346_v0 = vsel %vm525_vm5, %v2329_v19, %v2331_v39  ;;  %v2438_v19 = vsel %vm558_vm6, %v7113_v46, %v7142_v57  ;;  %v2642_v46 = vsel %vm624_vm8, %v7043_v17, %v7136_v43 }
 0x35c   : > { %3469 = vrot.lane.b32.xlu0 %v6908_v28, %s8865_s11  ;;  %2867 = vmatprep.subr.bf16.mxu0 %v2347_v15  ;;  %v2440_v43 = vsel %vm558_vm6, %v7121_v48, %v7150_v7  ;;  %v2443_v7 = vsel %vm558_vm6, %v7244_v61, %v7273_v27  ;;  %v2446_v27 = vsel %vm558_vm6, %v7368_v38, %v7391_v25 }
 0x35d   : > { %3467 = vrot.lane.b32.xlu1 %v6920_v35, %s8865_s11  ;;  %2868 = vmatpush1.bf16.msra.mxu0 %v2346_v0  ;;  %v2442_v0 = vsel %vm558_vm6, %v7265_v24, %v7244_v61  ;;  %v2540_v61 = vsel %vm591_vm7, %v7144_v5, %v7035_v60  ;;  %v2543_v60 = vsel %vm591_vm7, %v7267_v34, %v7158_v2  ;;  %v6379_v2 = vmov 0.0  }
 0x35e   : > { %v2335_v51 = vpop.permute.xlu0 %2334  ;;  %2869 = vmatprep.subr.bf16.mxu0 %v2439_v26 }
 0x35f   : > { %v2537_v50 = vpop.permute.xlu1 %2536  ;;  %v2348_v26 = vsel %vm525_vm5, %v2333_v21, %v2335_v51  ;;  %v2445_v21 = vsel %vm558_vm6, %v7383_v59, %v7368_v38  ;;  %vm6380_vm5 = vmmov 0  }
 0x360   : > { %3475 = vrot.lane.b32.xlu0 %v6953_v1, %s8865_s11  ;;  %v2550_v15 = vsel %vm591_vm7, %v7399_v36, %v2537_v50  ;;  %v2441_v50 = vsel %vm558_vm6, %v7236_v47, %v7265_v24  ;;  %v2444_v24 = vsel %vm558_vm6, %v7362_v23, %v7383_v59 }
 0x361   : > { %3465 = vrot.lane.b32.xlu1 %v6916_v30, %s8865_s11  ;;  %2870 = vmatpush1.bf16.msra.mxu0 %v2438_v19  ;;  %v2645_v19 = vsel %vm624_vm8, %v7166_v10, %v7259_v53 }
 0x362   : > { %5704 = vmatprep.subr.bf16.mxu1 %v2550_v15  ;;  %v2638_v39 = vpop.permute.xlu0 %2637  ;;  %2871 = vmatprep.subr.bf16.mxu0 %v2442_v0  ;;  %v2648_v15 = vsel %vm624_vm8, %v7292_v56, %v7385_v29 }
 0x363   : > { %5705 = vmatpush3.bf16.msra.mxu1 %v2348_v26  ;;  %v2432_v57 = vpop.permute.xlu1 %2431  ;;  %v2651_v0 = vsel %vm624_vm8, %v7483_v31, %v2638_v39  ;;  %v7572_v39 = vld [vmem:[%s8728_s5 + $0x18] ss:$12 sps:$4 sm:$0xff]  }
 0x364   : > { %5706 = vmatprep.subr.bf16.mxu1 %v2642_v46  ;;  %3473 = vrot.lane.b32.xlu0 %v6943_v49, %s8865_s11  ;;  %v2448_v48 = vsel %vm558_vm6, %v2432_v57, %v7407_v16  ;;  %v2447_v59 = vsel %vm558_vm6, %v7415_v55, %v2432_v57  ;;  %v2539_v55 = vsel %vm591_vm7, %v7059_v20, %v7144_v5 }
 0x365   : > { %3477 = vrot.lane.b32.xlu1 %v6941_v14, %s8865_s11  ;;  %2872 = vmatpush1.bf16.msra.mxu0 %v2441_v50  ;;  %v2542_v5 = vsel %vm591_vm7, %v7182_v13, %v7267_v34  ;;  %v2743_v46 = vsel %vm657_vm9, %v7051_v18, %v7152_v40 }
 0x366   : > { %v2523_v51 = vpop.permute.xlu0 %2522  ;;  %2873 = vmatprep.subr.bf16.mxu0 %v2445_v21 }
 0x367   : > { %5707 = vmatpush3.bf16.msra.mxu1 %v2440_v43  ;;  %v2436_v47 = vpop.permute.xlu1 %2435  ;;  %v2545_v34 = vsel %vm591_vm7, %v2523_v51, %v7393_v62 }
 0x368   : > { %5708 = vmatprep.subr.bf16.mxu1 %v2645_v19  ;;  %3554 = vrot.lane.b32.xlu0 %v6838_v44, %s8868_s12  ;;  %v2449_v38 = vsel %vm558_vm6, %v7407_v16, %v2436_v47  ;;  %v2546_v16 = vsel %vm591_vm7, %v7393_v62, %v7281_v54  ;;  %v2746_v54 = vsel %vm657_vm9, %v7174_v12, %v7275_v52  ;;  %vm2857_vm6 = vcmask 523264  }
 0x369   : > { %3552 = vrot.lane.b32.xlu1 %v6853_v8, %s8868_s12  ;;  %2874 = vmatpush1.bf16.msra.mxu0 %v2444_v24  ;;  %v2749_v52 = vsel %vm657_vm9, %v7300_v4, %v7401_v58  ;;  %v7627_v24 = vld [vmem:[%s8728_s5 + $0x20] ss:$12 sps:$4 sm:$0xff]  }
 0x36a   : > { %v7538_v53 = vpop.permute.xlu0 %2736  ;;  %2875 = vmatprep.subr.bf16.mxu0 %v2448_v48 }
 0x36b   : > { %5709 = vmatpush3.bf16.msra.mxu1 %v2443_v7  ;;  %v2533_v23 = vpop.permute.xlu1 %2532  ;;  %v7632_v7 = vld [vmem:[%s8728_s5 + $0x4] ss:$12 sps:$4 sm:$0xff]  }
 0x36c   : > { %5710 = vmatprep.subr.bf16.mxu1 %v2648_v15  ;;  %3560 = vrot.lane.b32.xlu0 %v6891_v6, %s8868_s12  ;;  %v2549_v40 = vsel %vm591_vm7, %v2533_v23, %v7399_v36 }
 0x36d   : > { %3550 = vrot.lane.b32.xlu1 %v6840_v45, %s8868_s12  ;;  %2876 = vmatpush1.bf16.msra.mxu0 %v2447_v59 }
 0x36e   : > { %v2531_v29 = vpop.permute.xlu0 %2530  ;;  %2877 = vmatprep.subr.bf16.mxu0 %v2540_v61 }
 0x36f   : > { %5711 = vmatpush3.bf16.msra.mxu1 %v2446_v27  ;;  %v2739_v26 = vpop.permute.xlu1 %2738  ;;  %v2548_v21 = vsel %vm591_vm7, %v2531_v29, %v2533_v23  ;;  %vm8905_vm7 = vcmask 1014784  }
 0x370   : > { %5712 = vmatprep.subr.bf16.mxu1 %v2651_v0  ;;  %3558 = vrot.lane.b32.xlu0 %v6875_v33, %s8868_s12  ;;  %v2752_v58 = vsel %vm657_vm9, %v7538_v53, %v2739_v26  ;;  %vm8912_vm4 = vmmov %vm8905_vm7 }
 0x371   : > { %3562 = vrot.lane.b32.xlu1 %v6873_v32, %s8868_s12  ;;  %2878 = vmatpush1.bf16.msra.mxu0 %v2539_v55  ;;  %vm8915_vm3 = vmmov %vm8912_vm4 }
 0x372   : > { %v2608_v25 = vpop.permute.xlu0 %2607  ;;  %2879 = vmatprep.subr.bf16.mxu0 %v2543_v60  ;;  %vm8918_vm12 = vmmov %vm8915_vm3 }
 0x373   : > { %5713 = vmatpush3.bf16.msra.mxu1 %v2449_v38  ;;  %v2610_v20 = vpop.permute.xlu1 %2609 }
 0x374   : > { %3570 = vrot.lane.b32.xlu0 %v6908_v28, %s8868_s12  ;;  %5833 = vmatprep.subr.bf16.mxu1 %v6379_v2  ;;  %v2641_v36 = vsel %vm624_vm8, %v2610_v20, %v7043_v17  ;;  %v2640_v19 = vsel %vm624_vm8, %v2608_v25, %v2610_v20  ;;  %v8870_v25 = vmov 0   ;;  %v1870_v20 = vsel %vm393_vm0, %v7067_v22, %v7045_v42 }
 0x375   : > { %3568 = vrot.lane.b32.xlu1 %v6920_v35, %s8868_s12  ;;  %2880 = vmatpush1.bf16.msra.mxu0 %v2542_v5 }
 0x376   : > { %v2616_v57 = vpop.permute.xlu0 %2615  ;;  %2881 = vmatprep.subr.bf16.mxu0 %v2546_v16  ;;  %2980 = vmatmul.mubr.bf16.vlgmr.msra.gmra.mrb[16].mxu1 %v7572_v39 }
 0x377   : > { %5834 = vmatpush3.bf16.msra.mxu1 %v2743_v46  ;;  %v2618_v13 = vpop.permute.xlu1 %2617  ;;  %5841 = vmatprep.mubr.msk.bf16.mxu1 %vm6380_vm5, %v6379_v2  ;;  %v1869_v46 = vsel %vm393_vm0, %v7037_v3, %v7067_v22  ;;  %v1872_v22 = vsel %vm393_vm0, %v7160_v9, %v7190_v37  ;;  %v8872_v9 = vld [vmem:[#allocation35_spill] sm:$0xff] }
 0x378   : > { %3576 = vrot.lane.b32.xlu0 %v6953_v1, %s8868_s12  ;;  %5835 = vmatprep.subr.bf16.mxu1 %v6379_v2  ;;  %v2644_v17 = vsel %vm624_vm8, %v2618_v13, %v7166_v10  ;;  %v2643_v10 = vsel %vm624_vm8, %v2616_v57, %v2618_v13  ;;  %v1873_v57 = vsel %vm393_vm0, %v7190_v37, %v7168_v11 }
 0x379   : > { %3566 = vrot.lane.b32.xlu1 %v6916_v30, %s8868_s12  ;;  %2882 = vmatpush1.bf16.msra.mxu0 %v2545_v34  ;;  %v1875_v37 = vsel %vm393_vm0, %v8872_v9, %v7308_v41 }
 0x37a   : > { %v2624_v50 = vpop.permute.xlu0 %2623  ;;  %2883 = vmatprep.subr.bf16.mxu0 %v2549_v40  ;;  %v1876_v40 = vsel %vm393_vm0, %v7308_v41, %v7294_v63 }
 0x37b   : > { %5836 = vmatpush3.bf16.msra.mxu1 %v2746_v54  ;;  %v2626_v62 = vpop.permute.xlu1 %2625 }
 0x37c   : > { %3574 = vrot.lane.b32.xlu0 %v6943_v49, %s8868_s12  ;;  %5837 = vmatprep.subr.bf16.mxu1 %v6379_v2  ;;  %v2647_v15 = vsel %vm624_vm8, %v2626_v62, %v7292_v56  ;;  %v2646_v61 = vsel %vm624_vm8, %v2624_v50, %v2626_v62 }
 0x37d   : > { %3578 = vrot.lane.b32.xlu1 %v6941_v14, %s8868_s12  ;;  %2884 = vmatpush1.bf16.msra.mxu0 %v2548_v21  ;;  %v7723_v21 = vld [vmem:[%s8728_s5 + $0x34] ss:$12 sps:$4 sm:$0xff]  }
 0x37e   : > { %v2632_v43 = vpop.permute.xlu0 %2631  ;;  %2885 = vmatprep.subr.bf16.mxu0 %v2641_v36  ;;  %v8873_v36 = vld [vmem:[#allocation50_spill] sm:$0xff] }
 0x37f   : > { %5838 = vmatpush3.bf16.msra.mxu1 %v2749_v52  ;;  %v2634_v51 = vpop.permute.xlu1 %2633  ;;  %v8874_v52 = vld [vmem:[#allocation51_spill] sm:$0xff] }
 0x380   : > { %3655 = vrot.lane.b32.xlu0 %v6838_v44, %s8869_s15  ;;  %5839 = vmatprep.subr.bf16.mxu1 %v6379_v2  ;;  %v2650_v56 = vsel %vm624_vm8, %v2634_v51, %v7483_v31  ;;  %v2649_v0 = vsel %vm624_vm8, %v2632_v43, %v2634_v51  ;;  %v1879_v43 = vsel %vm393_vm0, %v8874_v52, %v8873_v36  ;;  %vm8907_vm8 = vcmask 637952  }
 0x381   : > { %3653 = vrot.lane.b32.xlu1 %v6853_v8, %s8869_s15  ;;  %2886 = vmatpush1.bf16.msra.mxu0 %v2640_v19  ;;  %vm8913_vm13 = vmmov %vm8907_vm8 }
 0x382   : > { %v2709_v47 = vpop.permute.xlu0 %2708  ;;  %2887 = vmatprep.subr.bf16.mxu0 %v2644_v17  ;;  %v8875_v17 = vld [vmem:[#allocation49_spill] sm:$0xff]  ;;  %vm8920_vm14 = vmmov %vm8907_vm8 }
 0x383   : > { %5840 = vmatpush3.bf16.msra.mxu1 %v2752_v58  ;;  %v2711_v48 = vpop.permute.xlu1 %2710  ;;  %v1878_v58 = vsel %vm393_vm0, %v8875_v17, %v8874_v52  ;;  %vm8921_vm15 = vmmov %vm8907_vm8 }
 0x384   : > { %3047 = vmatprep.subr.bf16.mxu1 %v6853_v8  ;;  %3661 = vrot.lane.b32.xlu0 %v6891_v6, %s8869_s15  ;;  %v2742_v26 = vsel %vm657_vm9, %v2711_v48, %v7051_v18  ;;  %v2741_v60 = vsel %vm657_vm9, %v2709_v47, %v2711_v48  ;;  %v8876_v48 = vld [vmem:[#allocation10_spill] sm:$0xff] }
 0x385   : > { %3651 = vrot.lane.b32.xlu1 %v6840_v45, %s8869_s15  ;;  %2888 = vmatpush1.bf16.msra.mxu0 %v2643_v10  ;;  %v8877_v10 = vld [vmem:[#allocation14_spill] sm:$0xff] }
 0x386   : > { %v2717_v23 = vpop.permute.xlu0 %2716  ;;  %2889 = vmatprep.subr.bf16.mxu0 %v2647_v15  ;;  %5842 = vmatmul.mubr.msk.bf16.vlgmr.msra.gmra.mrb[20].mxu1 %vm2857_vm6, %v7627_v24  ;;  %v1971_v15 = vsel %vm426_vm1, %v8877_v10, %v8876_v48 }
 0x387   : > { %3048 = vmatpush1.bf16.msra.mxu1 %v6840_v45  ;;  %v2719_v59 = vpop.permute.xlu1 %2718  ;;  %3079 = vmatprep.mubr.bf16.mxu1 %v7632_v7 }
 0x388   : > { %3049 = vmatprep.subr.bf16.mxu1 %v6891_v6  ;;  %3659 = vrot.lane.b32.xlu0 %v6875_v33, %s8869_s15  ;;  %v2745_v18 = vsel %vm657_vm9, %v2719_v59, %v7174_v12 }
 0x389   : > { %3663 = vrot.lane.b32.xlu1 %v6873_v32, %s8869_s15  ;;  %2890 = vmatpush1.bf16.msra.mxu0 %v2646_v61  ;;  %v8878_v61 = vld [vmem:[#allocation9_spill] sm:$0xff] }
 0x38a   : > { %v2725_v27 = vpop.permute.xlu0 %2724  ;;  %2891 = vmatprep.subr.bf16.mxu0 %v2650_v56  ;;  %v1970_v56 = vsel %vm426_vm1, %v8878_v61, %v8877_v10  ;;  %v8894_v61 = vld [vmem:[#allocation31_spill] sm:$0xff] }
 0x38b   : > { %3050 = vmatpush1.bf16.msra.mxu1 %v6875_v33  ;;  %v2727_v29 = vpop.permute.xlu1 %2726 }
 0x38c   : > { %3051 = vmatprep.subr.bf16.mxu1 %v6920_v35  ;;  %3671 = vrot.lane.b32.xlu0 %v6908_v28, %s8869_s15  ;;  %v2748_v16 = vsel %vm657_vm9, %v2727_v29, %v7300_v4  ;;  %v2747_v4 = vsel %vm657_vm9, %v2725_v27, %v2727_v29  ;;  %v8879_v29 = vld [vmem:[#allocation23_spill] sm:$0xff] }
 0x38d   : > { %3669 = vrot.lane.b32.xlu1 %v6920_v35, %s8869_s15  ;;  %2892 = vmatpush1.bf16.msra.mxu0 %v2649_v0  ;;  %v8880_v0 = vld [vmem:[#allocation27_spill] sm:$0xff] }
 0x38e   : > { %v2733_v31 = vpop.permute.xlu0 %2732  ;;  %2904 = vmatprep.subr.bf16.mxu0 %v2742_v26  ;;  %v1974_v26 = vsel %vm426_vm1, %v8880_v0, %v8879_v29 }
 0x38f   : > { %3052 = vmatpush1.bf16.msra.mxu1 %v6916_v30  ;;  %v2735_v55 = vpop.permute.xlu1 %2734 }
 0x390   : > { %3053 = vmatprep.subr.bf16.mxu1 %v6953_v1  ;;  %3677 = vrot.lane.b32.xlu0 %v6953_v1, %s8869_s15  ;;  %v2751_v3 = vsel %vm657_vm9, %v2735_v55, %v7538_v53  ;;  %v2750_v53 = vsel %vm657_vm9, %v2733_v31, %v2735_v55 }
 0x391   : > { %3667 = vrot.lane.b32.xlu1 %v6916_v30, %s8869_s15  ;;  %2894 = vmatmul.mubr.bf16.vlgmr.msra.gmra.mrb[16].mxu0 %v7572_v39  ;;  %v2744_v39 = vsel %vm657_vm9, %v2717_v23, %v2719_v59  ;;  %vm8909_vm9 = vmmov %vm8905_vm7 }
 0x392   : > { %2905 = vmatpush1.bf16.msra.mxu0 %v2741_v60  ;;  %v7671_v38 = vpop.permute.xlu0 %3251  ;;  %2936 = vmatprep.mubr.bf16.mxu0 %v8870_v25 }
 0x393   : > { %2906 = vmatprep.subr.bf16.mxu0 %v2745_v18  ;;  %3054 = vmatpush1.bf16.msra.mxu1 %v6943_v49  ;;  %v3250_v5 = vpop.permute.xlu1 %3249 }
 0x394   : > { %3055 = vmatprep.subr.bf16.mxu1 %v1870_v20  ;;  %3675 = vrot.lane.b32.xlu0 %v6943_v49, %s8869_s15  ;;  %v3281_v62 = vsel %vm690_vm10, %v3250_v5, %v7671_v38  ;;  %v8881_v20 = vld [vmem:[#allocation22_spill] sm:$0xff] }
 0x395   : > { %3679 = vrot.lane.b32.xlu1 %v6941_v14, %s8869_s15 }
 0x396   : > { %2907 = vmatpush1.bf16.msra.mxu0 %v2744_v39  ;;  %v3258_v12 = vpop.permute.xlu0 %3257  ;;  %v8882_v39 = vld [vmem:[#allocation37_spill] sm:$0xff] }
 0x397   : > { %2908 = vmatprep.subr.bf16.mxu0 %v2748_v16  ;;  %3056 = vmatpush1.bf16.msra.mxu1 %v1869_v46  ;;  %v3248_v13 = vpop.permute.xlu1 %3247 }
 0x398   : > { %3057 = vmatprep.subr.bf16.mxu1 %v1873_v57  ;;  %4013 = vrot.lane.b32.xlu0 %v6838_v44, %s8871_s22  ;;  %v3280_v41 = vsel %vm690_vm10, %v3248_v13, %v3250_v5  ;;  %v1973_v5 = vsel %vm426_vm1, %v8881_v20, %v8880_v0  ;;  %v8895_v0 = vld [vmem:[#allocation6_spill] sm:$0xff] }
 0x399   : > { %4011 = vrot.lane.b32.xlu1 %v6853_v8, %s8871_s22 }
 0x39a   : > { %2909 = vmatpush1.bf16.msra.mxu0 %v2747_v4  ;;  %v3256_v34 = vpop.permute.xlu0 %3255 }
 0x39b   : > { %2910 = vmatprep.subr.bf16.mxu0 %v2751_v3  ;;  %3058 = vmatpush1.bf16.msra.mxu1 %v1872_v22  ;;  %v7706_v54 = vpop.permute.xlu1 %3259  ;;  %v8885_v22 = vld [vmem:[#allocation54_spill] sm:$0xff] }
 0x39c   : > { %3059 = vmatprep.subr.bf16.mxu1 %v1876_v40  ;;  %4019 = vrot.lane.b32.xlu0 %v6891_v6, %s8871_s22  ;;  %v3284_v47 = vsel %vm690_vm10, %v3258_v12, %v7706_v54  ;;  %v8886_v40 = vld [vmem:[#allocation55_spill] sm:$0xff] }
 0x39d   : > { %4009 = vrot.lane.b32.xlu1 %v6840_v45, %s8871_s22 }
 0x39e   : > { %2911 = vmatpush1.bf16.msra.mxu0 %v2750_v53  ;;  %v7713_v50 = vpop.permute.xlu0 %3267  ;;  %v1980_v53 = vsel %vm426_vm1, %v8886_v40, %v8885_v22 }
 0x39f   : > { %3060 = vmatpush1.bf16.msra.mxu1 %v1875_v37  ;;  %3803 = vmatprep.subr.bf16.mxu0 %v3281_v62  ;;  %v3266_v51 = vpop.permute.xlu1 %3265  ;;  %v8887_v62 = vld [vmem:[#allocation5_spill] sm:$0xff] }
 0x3a0   : > { %3061 = vmatprep.subr.bf16.mxu1 %v1879_v43  ;;  %4017 = vrot.lane.b32.xlu0 %v6875_v33, %s8871_s22  ;;  %v3287_v27 = vsel %vm690_vm10, %v3266_v51, %v7713_v50  ;;  %v8888_v43 = vld [vmem:[#allocation52_spill] sm:$0xff] }
 0x3a1   : > { %4021 = vrot.lane.b32.xlu1 %v6873_v32, %s8871_s22  ;;  %5662 = vmatmul.mubr.msk.bf16.vlgmr.msra.gmra.mrb[16].mxu0 %vm2857_vm6, %v7627_v24  ;;  %v3283_v24 = vsel %vm690_vm10, %v3256_v34, %v3258_v12  ;;  %v8883_v12 = vld [vmem:[#allocation40_spill] sm:$0xff] }
 0x3a2   : > { %3804 = vmatpush1.bf16.msra.mxu0 %v3280_v41  ;;  %v3274_v19 = vpop.permute.xlu0 %3273  ;;  %3835 = vmatprep.mubr.bf16.mxu0 %v7723_v21  ;;  %v1977_v16 = vsel %vm426_vm1, %v8883_v12, %v8882_v39  ;;  %v8884_v34 = vld [vmem:[#allocation36_spill] sm:$0xff]  ;;  %v8889_v41 = vld [vmem:[#allocation13_spill] sm:$0xff] }
 0x3a3   : > { %3062 = vmatpush1.bf16.msra.mxu1 %v1878_v58  ;;  %3805 = vmatprep.subr.bf16.mxu0 %v3284_v47  ;;  %v3264_v23 = vpop.permute.xlu1 %3263  ;;  %v1976_v3 = vsel %vm426_vm1, %v8884_v34, %v8883_v12  ;;  %v8898_v12 = vld [vmem:[#allocation44_spill] sm:$0xff] }
 0x3a4   : > { %3063 = vmatprep.subr.bf16.mxu1 %v1971_v15  ;;  %4029 = vrot.lane.b32.xlu0 %v6908_v28, %s8871_s22  ;;  %v3286_v60 = vsel %vm690_vm10, %v3264_v23, %v3266_v51  ;;  %v1979_v51 = vsel %vm426_vm1, %v8888_v43, %v8886_v40  ;;  %v8892_v23 = vld [vmem:[#allocation11_spill] sm:$0xff] }
 0x3a5   : > { %4027 = vrot.lane.b32.xlu1 %v6920_v35, %s8871_s22  ;;  %v8901_v40 = vld [vmem:[#allocation59_spill] sm:$0xff] }
 0x3a6   : > { %3806 = vmatpush1.bf16.msra.mxu0 %v3283_v24  ;;  %v3272_v59 = vpop.permute.xlu0 %3271 }
 0x3a7   : > { %3064 = vmatpush1.bf16.msra.mxu1 %v1970_v56  ;;  %3807 = vmatprep.subr.bf16.mxu0 %v3287_v27  ;;  %v7757_v31 = vpop.permute.xlu1 %3275  ;;  %v3289_v13 = vsel %vm690_vm10, %v3272_v59, %v3274_v19  ;;  %v8893_v59 = vld [vmem:[#allocation26_spill] sm:$0xff] }
 0x3a8   : > { %3065 = vmatprep.subr.bf16.mxu1 %v1974_v26  ;;  %4035 = vrot.lane.b32.xlu0 %v6953_v1, %s8871_s22  ;;  %v3290_v55 = vsel %vm690_vm10, %v3274_v19, %v7757_v31  ;;  %v8890_v19 = vld [vmem:[#allocation18_spill] sm:$0xff]  ;;  %v2075_v56 = vsel %vm459_vm2, %v8894_v61, %v8893_v59 }
 0x3a9   : > { %4025 = vrot.lane.b32.xlu1 %v6916_v30, %s8871_s22  ;;  %v2072_v17 = vsel %vm459_vm2, %v8890_v19, %v8889_v41  ;;  %v2071_v24 = vsel %vm459_vm2, %v8892_v23, %v8890_v19 }
 0x3aa   : > { %3808 = vmatpush1.bf16.msra.mxu0 %v3286_v60  ;;  %v7766_v18 = vpop.permute.xlu0 %3352  ;;  %v8896_v60 = vld [vmem:[#allocation24_spill] sm:$0xff] }
 0x3ab   : > { %3066 = vmatpush1.bf16.msra.mxu1 %v1973_v5  ;;  %3809 = vmatprep.subr.bf16.mxu0 %v3290_v55  ;;  %v3351_v46 = vpop.permute.xlu1 %3350  ;;  %v2074_v20 = vsel %vm459_vm2, %v8896_v60, %v8894_v61  ;;  %v8897_v5 = vld [vmem:[#allocation41_spill] sm:$0xff]  ;;  %v8906_v61 = vld [vmem:[#allocation7_spill] sm:$0xff]  ;;  %v8910_v60 = vld [vmem:[#allocation30_spill] sm:$0xff] }
 0x3ac   : > { %3067 = vmatprep.subr.bf16.mxu1 %v1977_v16  ;;  %4033 = vrot.lane.b32.xlu0 %v6943_v49, %s8871_s22  ;;  %v3382_v57 = vsel %vm723_vm11, %v3351_v46, %v7766_v18  ;;  %v2078_v16 = vsel %vm459_vm2, %v8898_v12, %v8897_v5 }
 0x3ad   : > { %4037 = vrot.lane.b32.xlu1 %v6941_v14, %s8871_s22 }
 0x3ae   : > { %3810 = vmatpush1.bf16.msra.mxu0 %v3289_v13  ;;  %v3359_v4 = vpop.permute.xlu0 %3358 }
 0x3af   : > { %3068 = vmatpush1.bf16.msra.mxu1 %v1976_v3  ;;  %3811 = vmatprep.subr.bf16.mxu0 %v3382_v57  ;;  %v3349_v9 = vpop.permute.xlu1 %3348  ;;  %v8900_v3 = vld [vmem:[#allocation58_spill] sm:$0xff] }
 0x3b0   : > { %3069 = vmatprep.subr.bf16.mxu1 %v1980_v53  ;;  %v3381_v37 = vsel %vm723_vm11, %v3349_v9, %v3351_v46  ;;  %3253 = vrot.lane.b32.xlu0 %v8887_v62, %s6363_s18  ;;  %v2081_v53 = vsel %vm459_vm2, %v8901_v40, %v8900_v3 }
 0x3b1   : > { %3455 = vrot.lane.b32.xlu1 %v8887_v62, %s8865_s11 }
 0x3b2   : > { %3812 = vmatpush1.bf16.msra.mxu0 %v3381_v37  ;;  %v3357_v52 = vpop.permute.xlu0 %3356 }
 0x3b3   : > { %3070 = vmatpush1.bf16.msra.mxu1 %v1979_v51  ;;  %v7798_v58 = vpop.permute.xlu1 %3360  ;;  %v3384_v10 = vsel %vm723_vm11, %v3357_v52, %v3359_v4  ;;  %v8902_v51 = vld [vmem:[#allocation56_spill] sm:$0xff] }
 0x3b4   : > { %3071 = vmatprep.subr.bf16.mxu1 %v2072_v17  ;;  %4114 = vrot.lane.b32.xlu0 %v6838_v44, %s8891_s30  ;;  %v3385_v47 = vsel %vm723_vm11, %v3359_v4, %v7798_v58  ;;  %v8899_v4 = vld [vmem:[#allocation39_spill] sm:$0xff]  ;;  %v2080_v19 = vsel %vm459_vm2, %v8902_v51, %v8901_v40  ;;  %v7855_v17 = vld [vmem:[%s8728_s5] ss:$12 sps:$4 sm:$0xff]  }
 0x3b5   : > { %4112 = vrot.lane.b32.xlu1 %v6853_v8, %s8891_s30  ;;  %3813 = vmatprep.subr.bf16.mxu0 %v3385_v47  ;;  %v2077_v34 = vsel %vm459_vm2, %v8899_v4, %v8898_v12  ;;  %v8903_v47 = vld [vmem:[#allocation17_spill] sm:$0xff]  ;;  %v8917_v40 = vld [vmem:[#allocation47_spill] sm:$0xff] }
 0x3b6   : > { %v7807_v15 = vpop.permute.xlu0 %3368  ;;  %3814 = vmatpush1.bf16.msra.mxu0 %v3384_v10  ;;  %v8904_v10 = vld [vmem:[#allocation20_spill] sm:$0xff] }
 0x3b7   : > { %3072 = vmatpush1.bf16.msra.mxu1 %v2071_v24  ;;  %v3367_v27 = vpop.permute.xlu1 %3366  ;;  %v2173_v23 = vsel %vm8905_vm7, %v8904_v10, %v8903_v47  ;;  %vm8923_vm7 = vmmov %vm8915_vm3 }
 0x3b8   : > { %3073 = vmatprep.subr.bf16.mxu1 %v2075_v56  ;;  %3463 = vrot.lane.b32.xlu0 %v8895_v0, %s8865_s11  ;;  %v3388_v26 = vsel %vm723_vm11, %v3367_v27, %v7807_v15 }
 0x3b9   : > { %4110 = vrot.lane.b32.xlu1 %v6840_v45, %s8891_s30  ;;  %3815 = vmatprep.subr.bf16.mxu0 %v3388_v26  ;;  %v8908_v26 = vld [vmem:[#allocation15_spill] sm:$0xff] }
 0x3ba   : > { %v3375_v55 = vpop.permute.xlu0 %3374 }
 0x3bb   : > { %3074 = vmatpush1.bf16.msra.mxu1 %v2074_v20  ;;  %v3365_v46 = vpop.permute.xlu1 %3364  ;;  %v8911_v20 = vld [vmem:[#allocation33_spill] sm:$0xff] }
 0x3bc   : > { %3075 = vmatprep.subr.bf16.mxu1 %v2078_v16  ;;  %v3387_v57 = vsel %vm723_vm11, %v3365_v46, %v3367_v27  ;;  %4120 = vrot.lane.b32.xlu0 %v6891_v6, %s8891_s30  ;;  %v2176_v12 = vsel %vm8912_vm4, %v8911_v20, %v8910_v60  ;;  %vm8929_vm4 = vmmov %vm8915_vm3 }
 0x3bd   : > { %3261 = vrot.lane.b32.xlu1 %v8895_v0, %s6363_s18  ;;  %3816 = vmatpush1.bf16.msra.mxu0 %v3387_v57 }
 0x3be   : > { %v3373_v13 = vpop.permute.xlu0 %3372 }
 0x3bf   : > { %3076 = vmatpush1.bf16.msra.mxu1 %v2077_v34  ;;  %v7838_v9 = vpop.permute.xlu1 %3376  ;;  %v3390_v52 = vsel %vm723_vm11, %v3373_v13, %v3375_v55  ;;  %v8914_v13 = vld [vmem:[#allocation28_spill] sm:$0xff]  ;;  %v8916_v34 = vld [vmem:[#allocation45_spill] sm:$0xff] }
 0x3c0   : > { %3077 = vmatprep.subr.bf16.mxu1 %v2081_v53  ;;  %4118 = vrot.lane.b32.xlu0 %v6875_v33, %s8891_s30  ;;  %v3391_v37 = vsel %vm723_vm11, %v3375_v55, %v7838_v9  ;;  %v2172_v55 = vsel %vm8909_vm9, %v8908_v26, %v8904_v10  ;;  %v2175_v4 = vsel %vm8915_vm3, %v8914_v13, %v8911_v20  ;;  %v8925_v26 = vld [vmem:[#allocation63_spill] sm:$0xff]  ;;  %vm8927_vm9 = vmmov %vm8913_vm13  ;;  %v8930_v13 = vld [vmem:[#allocation16_spill] sm:$0xff] }
 0x3c1   : > { %4122 = vrot.lane.b32.xlu1 %v6873_v32, %s8891_s30  ;;  %3817 = vmatprep.subr.bf16.mxu0 %v3391_v37  ;;  %v2179_v53 = vsel %vm8918_vm12, %v8917_v40, %v8916_v34 }
 0x3c2   : > { %v7847_v43 = vpop.permute.xlu0 %3453  ;;  %3818 = vmatpush1.bf16.msra.mxu0 %v3390_v52  ;;  %v8919_v52 = vld [vmem:[#allocation8_spill] sm:$0xff] }
 0x3c3   : > { %3078 = vmatpush1.bf16.msra.mxu1 %v2080_v19  ;;  %v3452_v24 = vpop.permute.xlu1 %3451 }
 0x3c4   : > { %3090 = vmatprep.subr.bf16.mxu1 %v2173_v23  ;;  %3269 = vrot.lane.b32.xlu0 %v8906_v61, %s6363_s18  ;;  %v3483_v56 = vsel %vm8907_vm8, %v3452_v24, %v7847_v43  ;;  %v8922_v23 = vld [vmem:[#allocation43_spill] sm:$0xff]  ;;  %vm8926_vm8 = vmmov %vm8915_vm3 }
 0x3c5   : > { %3471 = vrot.lane.b32.xlu1 %v8906_v61, %s8865_s11  ;;  %3819 = vmatprep.subr.bf16.mxu0 %v3483_v56  ;;  %v8924_v56 = vld [vmem:[#allocation62_spill] sm:$0xff]  ;;  %vm8933_vm3 = vmmov %vm8927_vm9 }
 0x3c6   : > { %v3460_v27 = vpop.permute.xlu0 %3459  ;;  %3080 = vmatmul.mubr.bf16.vlgmr.msra.gmra.mrb[24].mxu1 %v7855_v17  ;;  %vm8934_vm12 = vmmov %vm8933_vm3 }
 0x3c7   : > { %3091 = vmatpush1.bf16.msra.mxu1 %v2172_v55  ;;  %v3450_v16 = vpop.permute.xlu1 %3449  ;;  %3122 = vmatprep.mubr.bf16.mxu1 %v8870_v25  ;;  %v2182_v55 = vsel %vm8926_vm8, %v8925_v26, %v8924_v56 }
 0x3c8   : > { %3092 = vmatprep.subr.bf16.mxu1 %v2176_v12  ;;  %v3482_v46 = vsel %vm8913_vm13, %v3450_v16, %v3452_v24  ;;  %4130 = vrot.lane.b32.xlu0 %v6908_v28, %s8891_s30  ;;  %v2178_v24 = vsel %vm8923_vm7, %v8922_v23, %v8917_v40  ;;  %v8928_v16 = vld [vmem:[#allocation60_spill] sm:$0xff]  ;;  %vm8931_vm13 = vmmov %vm8927_vm9 }
 0x3c9   : > { %4128 = vrot.lane.b32.xlu1 %v6920_v35, %s8891_s30  ;;  %3820 = vmatpush1.bf16.msra.mxu0 %v3482_v46  ;;  %v2181_v46 = vsel %vm8929_vm4, %v8928_v16, %v8925_v26  ;;  %v8938_v16 = vld [vmem:[#allocation57_spill] sm:$0xff] }
 0x3ca   : > { %v3458_v57 = vpop.permute.xlu0 %3457 }
 0x3cb   : > { %3093 = vmatpush1.bf16.msra.mxu1 %v2175_v4  ;;  %v7885_v37 = vpop.permute.xlu1 %3461  ;;  %v3485_v19 = vsel %vm8921_vm15, %v3458_v57, %v3460_v27  ;;  %v7914_v57 = vld [vmem:[%s8728_s5 + $0x8] ss:$12 sps:$4 sm:$0xff]   ;;  %v1972_v4 = vsel %vm426_vm1, %v8876_v48, %v8930_v13 }
 0x3cc   : > { %3094 = vmatprep.subr.bf16.mxu1 %v2179_v53  ;;  %3479 = vrot.lane.b32.xlu0 %v8919_v52, %s8865_s11  ;;  %v3486_v51 = vsel %vm8920_vm14, %v3460_v27, %v7885_v37  ;;  %vm8937_vm14 = vcmask 629760  }
 0x3cd   : > { %4126 = vrot.lane.b32.xlu1 %v6916_v30, %s8891_s30  ;;  %3821 = vmatprep.subr.bf16.mxu0 %v3486_v51  ;;  %vm8939_vm15 = vmmov %vm8937_vm14 }
 0x3ce   : > { %v7894_v10 = vpop.permute.xlu0 %3469  ;;  %3822 = vmatpush1.bf16.msra.mxu0 %v3485_v19  ;;  %v8932_v19 = vld [vmem:[#allocation29_spill] sm:$0xff] }
 0x3cf   : > { %3095 = vmatpush1.bf16.msra.mxu1 %v2178_v24  ;;  %v3468_v20 = vpop.permute.xlu1 %3467  ;;  %v1975_v48 = vsel %vm426_vm1, %v8879_v29, %v8932_v19  ;;  %v8935_v29 = vld [vmem:[#allocation42_spill] sm:$0xff] }
 0x3d0   : > { %3096 = vmatprep.subr.bf16.mxu1 %v2182_v55  ;;  %4136 = vrot.lane.b32.xlu0 %v6953_v1, %s8891_s30  ;;  %v3489_v27 = vsel %vm8927_vm9, %v3468_v20, %v7894_v10 }
 0x3d1   : > { %3277 = vrot.lane.b32.xlu1 %v8919_v52, %s6363_s18  ;;  %3823 = vmatprep.subr.bf16.mxu0 %v3489_v27  ;;  %s8936_s18 = smov 54  }
 0x3d2   : > { %v3476_v12 = vpop.permute.xlu0 %3475 }
 0x3d3   : > { %3097 = vmatpush1.bf16.msra.mxu1 %v2181_v46  ;;  %v3466_v40 = vpop.permute.xlu1 %3465  ;;  %v1981_v46 = vsel %vm426_vm1, %v8885_v22, %v8938_v16  ;;  %v8947_v16 = vld [vmem:[#allocation46_spill] sm:$0xff] }
 0x3d4   : > { %5725 = vmatprep.subr.bf16.mxu1 %v1972_v4  ;;  %v3488_v53 = vsel %vm8931_vm13, %v3466_v40, %v3468_v20  ;;  %4134 = vrot.lane.b32.xlu0 %v6943_v49, %s8891_s30  ;;  %v8940_v40 = vld [vmem:[#allocation19_spill] sm:$0xff] }
 0x3d5   : > { %4138 = vrot.lane.b32.xlu1 %v6941_v14, %s8891_s30  ;;  %3824 = vmatpush1.bf16.msra.mxu0 %v3488_v53  ;;  %v2073_v53 = vsel %vm459_vm2, %v8889_v41, %v8940_v40  ;;  %v8950_v40 = vld [vmem:[#allocation61_spill] sm:$0xff] }
 0x3d6   : > { %v3474_v51 = vpop.permute.xlu0 %3473  ;;  %5667 = vmatmul.mubr.msk.bf16.vlgmr.msra.gmra.mrb[24].mxu1 %vm2857_vm6, %v7914_v57 }
 0x3d7   : > { %5726 = vmatpush3.bf16.msra.mxu1 %v6838_v44  ;;  %v7930_v23 = vpop.permute.xlu1 %3477  ;;  %3165 = vmatprep.mubr.bf16.mxu1 %v7632_v7  ;;  %v3491_v26 = vsel %vm8934_vm12, %v3474_v51, %v3476_v12  ;;  %v1978_v7 = vsel %vm426_vm1, %v8882_v39, %v8935_v29  ;;  %vm8941_vm1 = vmmov %vm8937_vm14 }
 0x3d8   : > { %5727 = vmatprep.subr.bf16.mxu1 %v1975_v48  ;;  %3354 = vrot.lane.b32.xlu0 %v8887_v62, %s6364_s19  ;;  %v3492_v24 = vsel %vm8933_vm3, %v3476_v12, %v7930_v23  ;;  %vm8942_vm7 = vmmov %vm8941_vm1  ;;  %v8943_v48 = vld [vmem:[#allocation12_spill] sm:$0xff] }
 0x3d9   : > { %3556 = vrot.lane.b32.xlu1 %v8887_v62, %s8868_s12  ;;  %3825 = vmatprep.subr.bf16.mxu0 %v3492_v24  ;;  %v1871_v24 = vsel %vm393_vm0, %v7045_v42, %v8943_v48  ;;  %vm8945_vm8 = vmmov %vm8941_vm1  ;;  %v8946_v42 = vld [vmem:[#allocation25_spill] sm:$0xff] }
 0x3da   : > { %v7940_v55 = vpop.permute.xlu0 %3554  ;;  %3826 = vmatpush1.bf16.msra.mxu0 %v3491_v26  ;;  %v8944_v26 = vld [vmem:[#allocation32_spill] sm:$0xff]  ;;  %vm8948_vm9 = vmmov %vm8941_vm1 }
 0x3db   : > { %5728 = vmatpush3.bf16.msra.mxu1 %v6873_v32  ;;  %v3553_v20 = vpop.permute.xlu1 %3552  ;;  %v2076_v29 = vsel %vm459_vm2, %v8893_v59, %v8944_v26  ;;  %v2079_v59 = vsel %vm459_vm2, %v8897_v5, %v8947_v16  ;;  %v2082_v5 = vsel %vm459_vm2, %v8900_v3, %v8950_v40  ;;  %vm8951_vm4 = vmmov %vm8941_vm1  ;;  %vm8954_vm2 = vcmask 621568   ;;  %v8966_v40 = vld [vmem:[#allocation64_spill] sm:$0xff] }
 0x3dc   : > { %5729 = vmatprep.subr.bf16.mxu1 %v1978_v7  ;;  %4215 = vrot.lane.b32.xlu0 %v6838_v44, %s8936_s18  ;;  %v3584_v27 = vsel %vm8937_vm14, %v3553_v20, %v7940_v55  ;;  %vm8952_vm13 = vmmov %vm8941_vm1 }
 0x3dd   : > { %4213 = vrot.lane.b32.xlu1 %v6853_v8, %s8936_s18  ;;  %3827 = vmatprep.subr.bf16.mxu0 %v3584_v27  ;;  %v1874_v27 = vsel %vm393_vm0, %v7168_v11, %v8946_v42  ;;  %vm8957_vm3 = vmmov %vm8954_vm2 }
 0x3de   : > { %v3561_v12 = vpop.permute.xlu0 %3560  ;;  %vm8960_vm14 = vmmov %vm8954_vm2 }
 0x3df   : > { %5730 = vmatpush3.bf16.msra.mxu1 %v6908_v28  ;;  %v3551_v39 = vpop.permute.xlu1 %3550 }
 0x3e0   : > { %5731 = vmatprep.subr.bf16.mxu1 %v1981_v46  ;;  %v3583_v13 = vsel %vm8939_vm15, %v3551_v39, %v3553_v20  ;;  %3564 = vrot.lane.b32.xlu0 %v8895_v0, %s8868_s12  ;;  %vm8961_vm15 = vmmov %vm8954_vm2 }
 0x3e1   : > { %4211 = vrot.lane.b32.xlu1 %v6840_v45, %s8936_s18  ;;  %3828 = vmatpush1.bf16.msra.mxu0 %v3583_v13  ;;  %v8949_v13 = vld [vmem:[#allocation38_spill] sm:$0xff] }
 0x3e2   : > { %v3559_v4 = vpop.permute.xlu0 %3558  ;;  %v1877_v11 = vsel %vm393_vm0, %v7294_v63, %v8949_v13  ;;  %v8953_v63 = vld [vmem:[#allocation53_spill] sm:$0xff] }
 0x3e3   : > { %5732 = vmatpush3.bf16.msra.mxu1 %v6941_v14  ;;  %v7965_v51 = vpop.permute.xlu1 %3562  ;;  %v3586_v19 = vsel %vm8942_vm7, %v3559_v4, %v3561_v12  ;;  %v1880_v48 = vsel %vm393_vm0, %v8873_v36, %v8953_v63  ;;  %v8955_v36 = vld [vmem:[#allocation21_spill] sm:$0xff]  ;;  %vm8956_vm0 = vcmask 1014784   ;;  %vm8965_vm7 = vmmov %vm8954_vm2 }
 0x3e4   : > { %5733 = vmatprep.subr.bf16.mxu1 %v2073_v53  ;;  %4221 = vrot.lane.b32.xlu0 %v6891_v6, %s8936_s18  ;;  %v3587_v22 = vsel %vm8941_vm1, %v3561_v12, %v7965_v51  ;;  %vm8959_vm12 = vmmov %vm8956_vm0 }
 0x3e5   : > { %3362 = vrot.lane.b32.xlu1 %v8895_v0, %s6364_s19  ;;  %3829 = vmatprep.subr.bf16.mxu0 %v3587_v22  ;;  %vm8963_vm1 = vmmov %vm8956_vm0 }
 0x3e6   : > { %v7977_v41 = vpop.permute.xlu0 %3570  ;;  %3830 = vmatpush1.bf16.msra.mxu0 %v3586_v19 }
 0x3e7   : > { %5734 = vmatpush3.bf16.msra.mxu1 %v1871_v24  ;;  %v3569_v7 = vpop.permute.xlu1 %3568  ;;  %v8022_v24 = vld [vmem:[%s8728_s5 + $0x30] ss:$12 sps:$4 sm:$0xff]  }
 0x3e8   : > { %5735 = vmatprep.subr.bf16.mxu1 %v2076_v29  ;;  %4219 = vrot.lane.b32.xlu0 %v6875_v33, %s8936_s18  ;;  %v3590_v20 = vsel %vm8945_vm8, %v3569_v7, %v7977_v41  ;;  %vm8967_vm8 = vmmov %vm8956_vm0 }
 0x3e9   : > { %4223 = vrot.lane.b32.xlu1 %v6873_v32, %s8936_s18  ;;  %3831 = vmatprep.subr.bf16.mxu0 %v3590_v20 }
 0x3ea   : > { %v3577_v12 = vpop.permute.xlu0 %3576 }
 0x3eb   : > { %5736 = vmatpush3.bf16.msra.mxu1 %v1874_v27  ;;  %v3567_v46 = vpop.permute.xlu1 %3566 }
 0x3ec   : > { %5737 = vmatprep.subr.bf16.mxu1 %v2079_v59  ;;  %v3589_v39 = vsel %vm8948_vm9, %v3567_v46, %v3569_v7  ;;  %3370 = vrot.lane.b32.xlu0 %v8906_v61, %s6364_s19  ;;  %v2174_v7 = vsel %vm8956_vm0, %v8903_v47, %v8955_v36  ;;  %v8958_v47 = vld [vmem:[#allocation34_spill] sm:$0xff]  ;;  %vm8968_vm9 = vmmov %vm8954_vm2 }
 0x3ed   : > { %3572 = vrot.lane.b32.xlu1 %v8906_v61, %s8868_s12  ;;  %3832 = vmatpush1.bf16.msra.mxu0 %v3589_v39 }
 0x3ee   : > { %v3575_v4 = vpop.permute.xlu0 %3574 }
 0x3ef   : > { %5738 = vmatpush3.bf16.msra.mxu1 %v1877_v11  ;;  %v8005_v53 = vpop.permute.xlu1 %3578  ;;  %v3592_v19 = vsel %vm8952_vm13, %v3575_v4, %v3577_v12  ;;  %vm8970_vm13 = vmmov %vm8954_vm2 }
 0x3f0   : > { %5739 = vmatprep.subr.bf16.mxu1 %v2082_v5  ;;  %4231 = vrot.lane.b32.xlu0 %v6908_v28, %s8936_s18  ;;  %v3593_v22 = vsel %vm8951_vm4, %v3577_v12, %v8005_v53  ;;  %vm8969_vm4 = vmmov %vm8954_vm2 }
 0x3f1   : > { %4229 = vrot.lane.b32.xlu1 %v6920_v35, %s8936_s18  ;;  %3833 = vmatprep.subr.bf16.mxu0 %v3593_v22 }
 0x3f2   : > { %v8017_v3 = vpop.permute.xlu0 %3655  ;;  %3834 = vmatpush1.bf16.msra.mxu0 %v3592_v19 }
 0x3f3   : > { %5740 = vmatpush3.bf16.msra.mxu1 %v1880_v48  ;;  %v3654_v26 = vpop.permute.xlu1 %3653 }
 0x3f4   : > { %3580 = vrot.lane.b32.xlu0 %v8919_v52, %s8868_s12  ;;  %5845 = vmatprep.subr.bf16.mxu1 %v6379_v2  ;;  %v3685_v29 = vsel %vm8954_vm2, %v3654_v26, %v8017_v3  ;;  %vm8971_vm2 = vcmask 457728  }
 0x3f5   : > { %4227 = vrot.lane.b32.xlu1 %v6916_v30, %s8936_s18  ;;  %3846 = vmatprep.subr.bf16.mxu0 %v3685_v29  ;;  %vm8972_vm0 = vmmov %vm8971_vm2 }
 0x3f6   : > { %v3662_v20 = vpop.permute.xlu0 %3661  ;;  %3166 = vmatmul.mubr.bf16.vlgmr.msra.gmra.mrb[28].mxu1 %v7855_v17  ;;  %3836 = vmatmul.mubr.bf16.vlgmr.msra.gmra.mrb[20].mxu0 %v8022_v24  ;;  %v2177_v17 = vsel %vm8959_vm12, %v8910_v60, %v8958_v47  ;;  %v8962_v60 = vld [vmem:[#allocation48_spill] sm:$0xff]  ;;  %vm8974_vm12 = vmmov %vm8972_vm0 }
 0x3f7   : > { %5846 = vmatpush3.bf16.msra.mxu1 %v2174_v7  ;;  %v3652_v42 = vpop.permute.xlu1 %3651  ;;  %3878 = vmatprep.mubr.bf16.mxu0 %v8870_v25  ;;  %v2180_v39 = vsel %vm8963_vm1, %v8916_v34, %v8962_v60  ;;  %v2183_v34 = vsel %vm8967_vm8, %v8924_v56, %v8966_v40  ;;  %v8133_v40 = vld [vmem:[%s8728_s5 + $0x4c] ss:$12 sps:$4 sm:$0xff]   ;;  %vm8977_vm1 = vmmov %vm8972_vm0  ;;  %vm8980_vm8 = vcmask 637952  }
 0x3f8   : > { %v3684_v27 = vsel %vm8957_vm3, %v3652_v42, %v3654_v26  ;;  %4237 = vrot.lane.b32.xlu0 %v6953_v1, %s8936_s18  ;;  %5847 = vmatprep.subr.bf16.mxu1 %v6379_v2  ;;  %vm8973_vm3 = vmmov %vm8972_vm0 }
 0x3f9   : > { %3378 = vrot.lane.b32.xlu1 %v8919_v52, %s6364_s19  ;;  %3847 = vmatpush1.bf16.msra.mxu0 %v3684_v27  ;;  %s8964_s19 = smov 53  }
 0x3fa   : > { %v3660_v12 = vpop.permute.xlu0 %3659  ;;  %5853 = vmatprep.mubr.msk.bf16.mxu1 %vm6380_vm5, %v6379_v2 }
 0x3fb   : > { %5848 = vmatpush3.bf16.msra.mxu1 %v2177_v17  ;;  %v8048_v16 = vpop.permute.xlu1 %3663  ;;  %v3687_v46 = vsel %vm8961_vm15, %v3660_v12, %v3662_v20  ;;  %vm8976_vm15 = vmmov %vm8972_vm0 }
 0x3fc   : > { %4235 = vrot.lane.b32.xlu0 %v6943_v49, %s8936_s18  ;;  %5849 = vmatprep.subr.bf16.mxu1 %v6379_v2  ;;  %v3688_v59 = vsel %vm8960_vm14, %v3662_v20, %v8048_v16  ;;  %vm8975_vm14 = vmmov %vm8972_vm0 }
 0x3fd   : > { %4239 = vrot.lane.b32.xlu1 %v6941_v14, %s8936_s18  ;;  %3848 = vmatprep.subr.bf16.mxu0 %v3688_v59 }
 0x3fe   : > { %v8061_v13 = vpop.permute.xlu0 %3671  ;;  %3849 = vmatpush1.bf16.msra.mxu0 %v3687_v46 }
 0x3ff   : > { %5850 = vmatpush3.bf16.msra.mxu1 %v2180_v39  ;;  %v3670_v11 = vpop.permute.xlu1 %3669 }
 0x400   : > { %4314 = vrot.lane.b32.xlu0 %v6853_v8, %s8964_s19  ;;  %5851 = vmatprep.subr.bf16.mxu1 %v6379_v2  ;;  %v3691_v4 = vsel %vm8965_vm7, %v3670_v11, %v8061_v13  ;;  %vm8978_vm7 = vmmov %vm8972_vm0 }
 0x401   : > { %3657 = vrot.lane.b32.xlu1 %v8887_v62, %s8869_s15  ;;  %3850 = vmatprep.subr.bf16.mxu0 %v3691_v4 }
 0x402   : > { %v3678_v5 = vpop.permute.xlu0 %3677 }
 0x403   : > { %5852 = vmatpush3.bf16.msra.mxu1 %v2183_v34  ;;  %v3668_v22 = vpop.permute.xlu1 %3667 }
 0x404   : > { %v3690_v19 = vsel %vm8968_vm9, %v3668_v22, %v3670_v11  ;;  %4312 = vrot.lane.b32.xlu0 %v6840_v45, %s8964_s19  ;;  %vm8981_vm9 = vcmask 449536  }
 0x405   : > { %4316 = vrot.lane.b32.xlu1 %v6838_v44, %s8964_s19  ;;  %3851 = vmatpush1.bf16.msra.mxu0 %v3690_v19 }
 0x406   : > { %v3676_v63 = vpop.permute.xlu0 %3675  ;;  %5854 = vmatmul.mubr.msk.bf16.vlgmr.msra.gmra.mrb[32].mxu1 %vm2857_vm6, %v7914_v57  ;;  %v8095_v57 = vld [vmem:[%s8728_s5 + $0x38] ss:$12 sps:$4 sm:$0xff]  }
 0x407   : > { %v8080_v48 = vpop.permute.xlu1 %3679  ;;  %3921 = vmatprep.mubr.bf16.mxu1 %v7723_v21  ;;  %v3693_v26 = vsel %vm8970_vm13, %v3676_v63, %v3678_v5  ;;  %vm8983_vm13 = vmmov %vm8981_vm9 }
 0x408   : > { %4322 = vrot.lane.b32.xlu0 %v6891_v6, %s8964_s19  ;;  %v3694_v56 = vsel %vm8969_vm4, %v3678_v5, %v8080_v48  ;;  %vm8982_vm4 = vmmov %vm8980_vm8 }
 0x409   : > { %3665 = vrot.lane.b32.xlu1 %v8895_v0, %s8869_s15  ;;  %3852 = vmatprep.subr.bf16.mxu0 %v3694_v56 }
 0x40a   : > { %v8090_v29 = vpop.permute.xlu0 %4013  ;;  %3853 = vmatpush1.bf16.msra.mxu0 %v3693_v26 }
 0x40b   : > { %v4012_v21 = vpop.permute.xlu1 %4011 }
 0x40c   : > { %4320 = vrot.lane.b32.xlu0 %v6875_v33, %s8964_s19  ;;  %v4043_v36 = vsel %vm8971_vm2, %v4012_v21, %v8090_v29  ;;  %vm8984_vm2 = vmmov %vm8981_vm9 }
 0x40d   : > { %4324 = vrot.lane.b32.xlu1 %v6873_v32, %s8964_s19  ;;  %4565 = vmatprep.subr.bf16.mxu0 %v4043_v36 }
 0x40e   : > { %v4020_v7 = vpop.permute.xlu0 %4019  ;;  %5676 = vmatmul.mubr.msk.bf16.vlgmr.msra.gmra.mrb[20].mxu0 %vm2857_vm6, %v8095_v57 }
 0x40f   : > { %v4010_v20 = vpop.permute.xlu1 %4009  ;;  %4597 = vmatprep.mubr.bf16.mxu0 %v8133_v40 }
 0x410   : > { %v4042_v42 = vsel %vm8972_vm0, %v4010_v20, %v4012_v21  ;;  %4330 = vrot.lane.b32.xlu0 %v6920_v35, %s8964_s19  ;;  %vm8985_vm0 = vmmov %vm8984_vm2 }
 0x411   : > { %3673 = vrot.lane.b32.xlu1 %v8906_v61, %s8869_s15  ;;  %4566 = vmatpush1.bf16.msra.mxu0 %v4042_v42 }
 0x412   : > { %v4018_v27 = vpop.permute.xlu0 %4017 }
 0x413   : > { %v8110_v47 = vpop.permute.xlu1 %4021  ;;  %v4045_v12 = vsel %vm8974_vm12, %v4018_v27, %v4020_v7  ;;  %vm8987_vm12 = vmmov %vm8985_vm0 }
 0x414   : > { %4328 = vrot.lane.b32.xlu0 %v6916_v30, %s8964_s19  ;;  %v4046_v17 = vsel %vm8973_vm3, %v4020_v7, %v8110_v47  ;;  %vm8986_vm3 = vmmov %vm8982_vm4 }
 0x415   : > { %4332 = vrot.lane.b32.xlu1 %v6908_v28, %s8964_s19  ;;  %4567 = vmatprep.subr.bf16.mxu0 %v4046_v17 }
 0x416   : > { %v8119_v59 = vpop.permute.xlu0 %4029  ;;  %4568 = vmatpush1.bf16.msra.mxu0 %v4045_v12 }
 0x417   : > { %v4028_v46 = vpop.permute.xlu1 %4027 }
 0x418   : > { %4338 = vrot.lane.b32.xlu0 %v6953_v1, %s8964_s19  ;;  %v4049_v60 = vsel %vm8975_vm14, %v4028_v46, %v8119_v59  ;;  %vm8988_vm14 = vmmov %vm8986_vm3 }
 0x419   : > { %3681 = vrot.lane.b32.xlu1 %v8919_v52, %s8869_s15  ;;  %4569 = vmatprep.subr.bf16.mxu0 %v4049_v60  ;;  %s8979_s15 = smov 52  }
 0x41a   : > { %v4036_v39 = vpop.permute.xlu0 %4035 }
 0x41b   : > { %v4026_v11 = vpop.permute.xlu1 %4025 }
 0x41c   : > { %v4048_v4 = vsel %vm8976_vm15, %v4026_v11, %v4028_v46  ;;  %4336 = vrot.lane.b32.xlu0 %v6943_v49, %s8964_s19  ;;  %vm8989_vm15 = vmmov %vm8985_vm0 }
 0x41d   : > { %4340 = vrot.lane.b32.xlu1 %v6941_v14, %s8964_s19  ;;  %4570 = vmatpush1.bf16.msra.mxu0 %v4048_v4 }
 0x41e   : > { %v4034_v34 = vpop.permute.xlu0 %4033 }
 0x41f   : > { %v8138_v5 = vpop.permute.xlu1 %4037  ;;  %v4051_v19 = vsel %vm8978_vm7, %v4034_v34, %v4036_v39  ;;  %vm8991_vm7 = vmmov %vm8985_vm0 }
 0x420   : > { %4015 = vrot.lane.b32.xlu0 %v8887_v62, %s8871_s22  ;;  %v4052_v22 = vsel %vm8977_vm1, %v4036_v39, %v8138_v5  ;;  %vm8990_vm1 = vmmov %vm8985_vm0 }
 0x421   : > { %4217 = vrot.lane.b32.xlu1 %v8887_v62, %s8936_s18  ;;  %4571 = vmatprep.subr.bf16.mxu0 %v4052_v22 }
 0x422   : > { %v3254_v63 = vpop.permute.xlu0 %3253  ;;  %4572 = vmatpush1.bf16.msra.mxu0 %v4051_v19 }
 0x423   : > { %v3456_v56 = vpop.permute.xlu1 %3455  ;;  %v3282_v21 = vsel %vm690_vm10, %v7671_v38, %v3254_v63 }
 0x424   : > { %4417 = vrot.lane.b32.xlu0 %v6838_v44, %s8979_s15  ;;  %v3484_v26 = vsel %vm8980_vm8, %v7847_v43, %v3456_v56  ;;  %vm8994_vm8 = vcmask 441344  }
 0x425   : > { %4415 = vrot.lane.b32.xlu1 %v6853_v8, %s8979_s15  ;;  %5752 = vmatprep.subr.bf16.mxu1 %v3484_v26 }
 0x426   : > { %v8155_v36 = vpop.permute.xlu0 %4114  ;;  %5753 = vmatpush3.bf16.msra.mxu1 %v3282_v21 }
 0x427   : > { %v4113_v7 = vpop.permute.xlu1 %4112 }
 0x428   : > { %4225 = vrot.lane.b32.xlu0 %v8895_v0, %s8936_s18  ;;  %v4144_v20 = vsel %vm8981_vm9, %v4113_v7, %v8155_v36 }
 0x429   : > { %4413 = vrot.lane.b32.xlu1 %v6840_v45, %s8979_s15  ;;  %4573 = vmatprep.subr.bf16.mxu0 %v4144_v20 }
 0x42a   : > { %v3464_v43 = vpop.permute.xlu0 %3463 }
 0x42b   : > { %v4111_v38 = vpop.permute.xlu1 %4110  ;;  %v3487_v42 = vsel %vm8982_vm4, %v7885_v37, %v3464_v43  ;;  %vm8996_vm4 = vmmov %vm8994_vm8 }
 0x42c   : > { %v4143_v27 = vsel %vm8983_vm13, %v4111_v38, %v4113_v7  ;;  %4423 = vrot.lane.b32.xlu0 %v6891_v6, %s8979_s15  ;;  %5754 = vmatprep.subr.bf16.mxu1 %v3487_v42  ;;  %vm8997_vm13 = vmmov %vm8996_vm4 }
 0x42d   : > { %4023 = vrot.lane.b32.xlu1 %v8895_v0, %s8871_s22  ;;  %4574 = vmatpush1.bf16.msra.mxu0 %v4143_v27 }
 0x42e   : > { %v4121_v17 = vpop.permute.xlu0 %4120 }
 0x42f   : > { %v3262_v12 = vpop.permute.xlu1 %3261 }
 0x430   : > { %v3285_v46 = vsel %vm690_vm10, %v7706_v54, %v3262_v12  ;;  %4421 = vrot.lane.b32.xlu0 %v6875_v33, %s8979_s15 }
 0x431   : > { %4425 = vrot.lane.b32.xlu1 %v6873_v32, %s8979_s15  ;;  %5755 = vmatpush3.bf16.msra.mxu1 %v3285_v46 }
 0x432   : > { %v4119_v37 = vpop.permute.xlu0 %4118 }
 0x433   : > { %v8176_v60 = vpop.permute.xlu1 %4122  ;;  %v4146_v11 = vsel %vm8985_vm0, %v4119_v37, %v4121_v17 }
 0x434   : > { %4031 = vrot.lane.b32.xlu0 %v8906_v61, %s8871_s22  ;;  %v4147_v39 = vsel %vm8984_vm2, %v4121_v17, %v8176_v60  ;;  %vm8998_vm2 = vmmov %vm8996_vm4 }
 0x435   : > { %4233 = vrot.lane.b32.xlu1 %v8906_v61, %s8936_s18  ;;  %4575 = vmatprep.subr.bf16.mxu0 %v4147_v39 }
 0x436   : > { %v3270_v54 = vpop.permute.xlu0 %3269  ;;  %4576 = vmatpush1.bf16.msra.mxu0 %v4146_v11 }
 0x437   : > { %v3472_v4 = vpop.permute.xlu1 %3471  ;;  %v3288_v22 = vsel %vm690_vm10, %v7713_v50, %v3270_v54 }
 0x438   : > { %4433 = vrot.lane.b32.xlu0 %v6908_v28, %s8979_s15  ;;  %v3490_v34 = vsel %vm8986_vm3, %v7894_v10, %v3472_v4  ;;  %vm9000_vm3 = vmmov %vm8998_vm2 }
 0x439   : > { %4431 = vrot.lane.b32.xlu1 %v6920_v35, %s8979_s15  ;;  %5756 = vmatprep.subr.bf16.mxu1 %v3490_v34 }
 0x43a   : > { %v8193_v19 = vpop.permute.xlu0 %4130  ;;  %5757 = vmatpush3.bf16.msra.mxu1 %v3288_v22 }
 0x43b   : > { %v4129_v63 = vpop.permute.xlu1 %4128 }
 0x43c   : > { %4241 = vrot.lane.b32.xlu0 %v8919_v52, %s8936_s18  ;;  %v4150_v56 = vsel %vm8987_vm12, %v4129_v63, %v8193_v19  ;;  %s9050_s18 = smov 28  }
 0x43d   : > { %4429 = vrot.lane.b32.xlu1 %v6916_v30, %s8979_s15  ;;  %4577 = vmatprep.subr.bf16.mxu0 %v4150_v56 }
 0x43e   : > { %v3480_v10 = vpop.permute.xlu0 %3479 }
 0x43f   : > { %v4127_v50 = vpop.permute.xlu1 %4126  ;;  %v3493_v26 = vsel %vm8988_vm14, %v7930_v23, %v3480_v10  ;;  %vm9002_vm14 = vmmov %vm8998_vm2 }
 0x440   : > { %v4149_v21 = vsel %vm8989_vm15, %v4127_v50, %v4129_v63  ;;  %4439 = vrot.lane.b32.xlu0 %v6953_v1, %s8979_s15  ;;  %5758 = vmatprep.subr.bf16.mxu1 %v3493_v26  ;;  %vm9004_vm15 = vmmov %vm8998_vm2 }
 0x441   : > { %4039 = vrot.lane.b32.xlu1 %v8919_v52, %s8871_s22  ;;  %4578 = vmatpush1.bf16.msra.mxu0 %v4149_v21  ;;  %s9016_s22 = smov 30  }
 0x442   : > { %v4137_v7 = vpop.permute.xlu0 %4136 }
 0x443   : > { %v3278_v20 = vpop.permute.xlu1 %3277 }
 0x444   : > { %v3291_v43 = vsel %vm690_vm10, %v7757_v31, %v3278_v20  ;;  %4437 = vrot.lane.b32.xlu0 %v6943_v49, %s8979_s15  ;;  %vm8993_vm10 = vcmask 629760  }
 0x445   : > { %4441 = vrot.lane.b32.xlu1 %v6941_v14, %s8979_s15  ;;  %5759 = vmatpush3.bf16.msra.mxu1 %v3291_v43  ;;  %vm8995_vm9 = vmmov %vm8993_vm10 }
 0x446   : > { %v4135_v23 = vpop.permute.xlu0 %4134  ;;  %vm8999_vm0 = vmmov %vm8995_vm9 }
 0x447   : > { %v8214_v38 = vpop.permute.xlu1 %4138  ;;  %v4152_v27 = vsel %vm8991_vm7, %v4135_v23, %v4137_v7  ;;  %vm9001_vm12 = vmmov %vm8999_vm0  ;;  %vm9007_vm7 = vcmask 433152  }
 0x448   : > { %4116 = vrot.lane.b32.xlu0 %v8887_v62, %s8891_s30  ;;  %v4153_v42 = vsel %vm8990_vm1, %v4137_v7, %v8214_v38  ;;  %vm9006_vm1 = vcmask 621568  }
 0x449   : > { %4318 = vrot.lane.b32.xlu1 %v8887_v62, %s8964_s19  ;;  %4579 = vmatprep.subr.bf16.mxu0 %v4153_v42 }
 0x44a   : > { %v3355_v31 = vpop.permute.xlu0 %3354  ;;  %4580 = vmatpush1.bf16.msra.mxu0 %v4152_v27 }
 0x44b   : > { %v3557_v17 = vpop.permute.xlu1 %3556  ;;  %v3383_v46 = vsel %vm723_vm11, %v7766_v18, %v3355_v31 }
 0x44c   : > { %4775 = vrot.lane.b32.xlu0 %v6838_v44, %s8992_s20  ;;  %v3585_v12 = vsel %vm8993_vm10, %v7940_v55, %v3557_v17  ;;  %vm9008_vm10 = vmmov %vm9007_vm7 }
 0x44d   : > { %4773 = vrot.lane.b32.xlu1 %v6853_v8, %s8992_s20  ;;  %5760 = vmatprep.subr.bf16.mxu1 %v3585_v12 }
 0x44e   : > { %v8231_v37 = vpop.permute.xlu0 %4215  ;;  %5761 = vmatpush3.bf16.msra.mxu1 %v3383_v46 }
 0x44f   : > { %v4214_v39 = vpop.permute.xlu1 %4213 }
 0x450   : > { %4326 = vrot.lane.b32.xlu0 %v8895_v0, %s8964_s19  ;;  %v4245_v11 = vsel %vm8994_vm8, %v4214_v39, %v8231_v37  ;;  %vm9009_vm8 = vmmov %vm9006_vm1 }
 0x451   : > { %4771 = vrot.lane.b32.xlu1 %v6840_v45, %s8992_s20  ;;  %4581 = vmatprep.subr.bf16.mxu0 %v4245_v11 }
 0x452   : > { %v3565_v55 = vpop.permute.xlu0 %3564 }
 0x453   : > { %v4212_v18 = vpop.permute.xlu1 %4211  ;;  %v3588_v54 = vsel %vm8995_vm9, %v7965_v51, %v3565_v55  ;;  %vm9010_vm9 = vmmov %vm9007_vm7 }
 0x454   : > { %v4244_v4 = vsel %vm8996_vm4, %v4212_v18, %v4214_v39  ;;  %4781 = vrot.lane.b32.xlu0 %v6891_v6, %s8992_s20  ;;  %5762 = vmatprep.subr.bf16.mxu1 %v3588_v54  ;;  %vm9011_vm4 = vmmov %vm9007_vm7 }
 0x455   : > { %4124 = vrot.lane.b32.xlu1 %v8895_v0, %s8891_s30  ;;  %4582 = vmatpush1.bf16.msra.mxu0 %v4244_v4 }
 0x456   : > { %v4222_v34 = vpop.permute.xlu0 %4221 }
 0x457   : > { %v3363_v22 = vpop.permute.xlu1 %3362 }
 0x458   : > { %v3386_v63 = vsel %vm723_vm11, %v7798_v58, %v3363_v22  ;;  %4779 = vrot.lane.b32.xlu0 %v6875_v33, %s8992_s20 }
 0x459   : > { %4783 = vrot.lane.b32.xlu1 %v6873_v32, %s8992_s20  ;;  %5763 = vmatpush3.bf16.msra.mxu1 %v3386_v63 }
 0x45a   : > { %v4220_v51 = vpop.permute.xlu0 %4219 }
 0x45b   : > { %v8252_v56 = vpop.permute.xlu1 %4223  ;;  %v4247_v50 = vsel %vm8998_vm2, %v4220_v51, %v4222_v34 }
 0x45c   : > { %4132 = vrot.lane.b32.xlu0 %v8906_v61, %s8891_s30  ;;  %v4248_v10 = vsel %vm8997_vm13, %v4222_v34, %v8252_v56  ;;  %vm9012_vm13 = vmmov %vm9006_vm1 }
 0x45d   : > { %4334 = vrot.lane.b32.xlu1 %v8906_v61, %s8964_s19  ;;  %4583 = vmatprep.subr.bf16.mxu0 %v4248_v10 }
 0x45e   : > { %v3371_v58 = vpop.permute.xlu0 %3370  ;;  %4584 = vmatpush1.bf16.msra.mxu0 %v4247_v50 }
 0x45f   : > { %v3573_v26 = vpop.permute.xlu1 %3572  ;;  %v3389_v7 = vsel %vm723_vm11, %v7807_v15, %v3371_v58 }
 0x460   : > { %4791 = vrot.lane.b32.xlu0 %v6908_v28, %s8992_s20  ;;  %v3591_v21 = vsel %vm8999_vm0, %v7977_v41, %v3573_v26 }
 0x461   : > { %4789 = vrot.lane.b32.xlu1 %v6920_v35, %s8992_s20  ;;  %5764 = vmatprep.subr.bf16.mxu1 %v3591_v21 }
 0x462   : > { %v8269_v20 = vpop.permute.xlu0 %4231  ;;  %5765 = vmatpush3.bf16.msra.mxu1 %v3389_v7 }
 0x463   : > { %v4230_v43 = vpop.permute.xlu1 %4229 }
 0x464   : > { %4342 = vrot.lane.b32.xlu0 %v8919_v52, %s8964_s19  ;;  %v4251_v23 = vsel %vm9000_vm3, %v4230_v43, %v8269_v20  ;;  %vm9015_vm3 = vmmov %vm9006_vm1 }
 0x465   : > { %4787 = vrot.lane.b32.xlu1 %v6916_v30, %s8992_s20  ;;  %4585 = vmatprep.subr.bf16.mxu0 %v4251_v23 }
 0x466   : > { %v3581_v41 = vpop.permute.xlu0 %3580 }
 0x467   : > { %v4228_v15 = vpop.permute.xlu1 %4227  ;;  %v3594_v42 = vsel %vm9001_vm12, %v8005_v53, %v3581_v41 }
 0x468   : > { %v4250_v27 = vsel %vm9002_vm14, %v4228_v15, %v4230_v43  ;;  %4797 = vrot.lane.b32.xlu0 %v6953_v1, %s8992_s20  ;;  %5766 = vmatprep.subr.bf16.mxu1 %v3594_v42 }
 0x469   : > { %4140 = vrot.lane.b32.xlu1 %v8919_v52, %s8891_s30  ;;  %4586 = vmatpush1.bf16.msra.mxu0 %v4250_v27  ;;  %s9033_s30 = smov 29  }
 0x46a   : > { %v4238_v31 = vpop.permute.xlu0 %4237 }
 0x46b   : > { %v3379_v17 = vpop.permute.xlu1 %3378 }
 0x46c   : > { %v3392_v12 = vsel %vm723_vm11, %v7838_v9, %v3379_v17  ;;  %4795 = vrot.lane.b32.xlu0 %v6943_v49, %s8992_s20  ;;  %vm9005_vm11 = vmmov %vm8998_vm2 }
 0x46d   : > { %4799 = vrot.lane.b32.xlu1 %v6941_v14, %s8992_s20  ;;  %5767 = vmatpush3.bf16.msra.mxu1 %v3392_v12  ;;  %vm9013_vm2 = vmmov %vm9011_vm4 }
 0x46e   : > { %v4236_v53 = vpop.permute.xlu0 %4235  ;;  %5857 = vmatprep.subr.bf16.mxu1 %v6379_v2  ;;  %vm9014_vm0 = vmmov %vm9013_vm2 }
 0x46f   : > { %v8291_v46 = vpop.permute.xlu1 %4239  ;;  %v4253_v9 = vsel %vm9005_vm11, %v4236_v53, %v4238_v31  ;;  %vm9017_vm12 = vmmov %vm9014_vm0  ;;  %v8371_v53 = vld [vmem:[%s8728_s5 + $0x48] ss:$12 sps:$4 sm:$0xff]  }
 0x470   : > { %4874 = vrot.lane.b32.xlu0 %v6853_v8, %s9003_s21  ;;  %v4254_v39 = vsel %vm9004_vm15, %v4238_v31, %v8291_v46  ;;  %3922 = vmatmul.mubr.bf16.vlgmr.msra.gmra.mrb[36].mxu1 %v8022_v24  ;;  %vm9018_vm14 = vmmov %vm9014_vm0 }
 0x471   : > { %4419 = vrot.lane.b32.xlu1 %v8887_v62, %s8979_s15  ;;  %4587 = vmatprep.subr.bf16.mxu0 %v4254_v39  ;;  %vm9019_vm15 = vmmov %vm9005_vm11  ;;  %vm9020_vm11 = vcmask 457728  }
 0x472   : > { %v4315_v11 = vpop.permute.xlu0 %4314  ;;  %4588 = vmatpush1.bf16.msra.mxu0 %v4253_v9  ;;  %5865 = vmatprep.mubr.msk.bf16.mxu1 %vm6380_vm5, %v6379_v2 }
 0x473   : > { %v3658_v55 = vpop.permute.xlu1 %3657 }
 0x474   : > { %v3686_v18 = vsel %vm9006_vm1, %v8017_v3, %v3658_v55  ;;  %4872 = vrot.lane.b32.xlu0 %v6840_v45, %s9003_s21  ;;  %vm9021_vm1 = vcmask 424960   ;;  %v5714_v55 = vpop.f32.mrb[16].mxu1 }
 0x475   : > { %4876 = vrot.lane.b32.xlu1 %v6838_v44, %s9003_s21  ;;  %5858 = vmatpush3.bf16.msra.mxu1 %v3686_v18 }
 0x476   : > { %v4313_v24 = vpop.permute.xlu0 %4312  ;;  %5859 = vmatprep.subr.bf16.mxu1 %v6379_v2 }
 0x477   : > { %v8310_v54 = vpop.permute.xlu1 %4316  ;;  %v4345_v3 = vsel %vm9008_vm10, %v4313_v24, %v4315_v11  ;;  %vm9023_vm10 = vmmov %vm9021_vm1 }
 0x478   : > { %4882 = vrot.lane.b32.xlu0 %v6891_v6, %s9003_s21  ;;  %v4346_v4 = vsel %vm9007_vm7, %v4315_v11, %v8310_v54  ;;  %vm9022_vm7 = vmmov %vm9019_vm15 }
 0x479   : > { %4427 = vrot.lane.b32.xlu1 %v8895_v0, %s8979_s15  ;;  %4589 = vmatprep.subr.bf16.mxu0 %v4346_v4 }
 0x47a   : > { %v4323_v34 = vpop.permute.xlu0 %4322  ;;  %4590 = vmatpush1.bf16.msra.mxu0 %v4345_v3  ;;  %v5715_v3 = vpop.f32.mrb[17].mxu1 }
 0x47b   : > { %v3666_v22 = vpop.permute.xlu1 %3665 }
 0x47c   : > { %v3689_v63 = vsel %vm9009_vm8, %v8048_v16, %v3666_v22  ;;  %4880 = vrot.lane.b32.xlu0 %v6875_v33, %s9003_s21  ;;  %v5717_v22 = vpop.f32.mrb[18].mxu1  ;;  %vm9024_vm8 = vmmov %vm9020_vm11 }
 0x47d   : > { %4884 = vrot.lane.b32.xlu1 %v6873_v32, %s9003_s21  ;;  %5860 = vmatpush3.bf16.msra.mxu1 %v3689_v63 }
 0x47e   : > { %v4321_v51 = vpop.permute.xlu0 %4320  ;;  %5861 = vmatprep.subr.bf16.mxu1 %v6379_v2 }
 0x47f   : > { %v8326_v10 = vpop.permute.xlu1 %4324  ;;  %v4348_v16 = vsel %vm9011_vm4, %v4321_v51, %v4323_v34  ;;  %v5718_v51 = vpop.f32.mrb[19].mxu1  ;;  %vm9026_vm4 = vmmov %vm9021_vm1 }
 0x480   : > { %4890 = vrot.lane.b32.xlu0 %v6920_v35, %s9003_s21  ;;  %v4349_v50 = vsel %vm9010_vm9, %v4323_v34, %v8326_v10  ;;  %v5716_v34 = vadd.f32 %v5715_v3, %v5714_v55  ;;  %vm9025_vm9 = vmmov %vm9021_vm1 }
 0x481   : > { %4435 = vrot.lane.b32.xlu1 %v8906_v61, %s8979_s15  ;;  %4591 = vmatprep.subr.bf16.mxu0 %v4349_v50 }
 0x482   : > { %v4331_v58 = vpop.permute.xlu0 %4330  ;;  %4592 = vmatpush1.bf16.msra.mxu0 %v4348_v16  ;;  %v5719_v16 = vadd.f32 %v5718_v51, %v5717_v22 }
 0x483   : > { %v3674_v26 = vpop.permute.xlu1 %3673 }
 0x484   : > { %v3692_v21 = vsel %vm9012_vm13, %v8061_v13, %v3674_v26  ;;  %4888 = vrot.lane.b32.xlu0 %v6916_v30, %s9003_s21  ;;  %vm9027_vm13 = vmmov %vm9022_vm7 }
 0x485   : > { %4892 = vrot.lane.b32.xlu1 %v6908_v28, %s9003_s21  ;;  %5862 = vmatpush3.bf16.msra.mxu1 %v3692_v21 }
 0x486   : > { %v4329_v7 = vpop.permute.xlu0 %4328  ;;  %5863 = vmatprep.subr.bf16.mxu1 %v6379_v2 }
 0x487   : > { %v8342_v43 = vpop.permute.xlu1 %4332  ;;  %v4351_v13 = vsel %vm9014_vm0, %v4329_v7, %v4331_v58  ;;  %vm9029_vm0 = vmmov %vm9021_vm1 }
 0x488   : > { %4898 = vrot.lane.b32.xlu0 %v6953_v1, %s9003_s21  ;;  %v4352_v23 = vsel %vm9013_vm2, %v4331_v58, %v8342_v43  ;;  %v3022_v58 = vpop.f32.mrb[20].mxu1  ;;  %vm9028_vm2 = vmmov %vm9024_vm8 }
 0x489   : > { %4443 = vrot.lane.b32.xlu1 %v8919_v52, %s8979_s15  ;;  %4593 = vmatprep.subr.bf16.mxu0 %v4352_v23  ;;  %v8403_v26 = vadd.f32 %v5716_v34, %v3022_v58  ;;  %v5843_v21 = vpop.f32.mrb[21].mxu1 }
 0x48a   : > { %v4339_v41 = vpop.permute.xlu0 %4338  ;;  %4594 = vmatpush1.bf16.msra.mxu0 %v4351_v13  ;;  %v3025_v7 = vpop.f32.mrb[22].mxu1 }
 0x48b   : > { %v3682_v15 = vpop.permute.xlu1 %3681  ;;  %v8407_v13 = vadd.f32 %v5719_v16, %v3025_v7 }
 0x48c   : > { %v3695_v42 = vsel %vm9015_vm3, %v8080_v48, %v3682_v15  ;;  %4896 = vrot.lane.b32.xlu0 %v6943_v49, %s9003_s21  ;;  %vm9030_vm3 = vmmov %vm9022_vm7 }
 0x48d   : > { %4900 = vrot.lane.b32.xlu1 %v6941_v14, %s9003_s21  ;;  %5864 = vmatpush3.bf16.msra.mxu1 %v3695_v42 }
 0x48e   : > { %v4337_v27 = vpop.permute.xlu0 %4336 }
 0x48f   : > { %v8357_v31 = vpop.permute.xlu1 %4340  ;;  %v4354_v48 = vsel %vm9018_vm14, %v4337_v27, %v4339_v41  ;;  %vm9032_vm14 = vmmov %vm9028_vm2 }
 0x490   : > { %4979 = vrot.lane.b32.xlu0 %v8887_v62, %s9016_s22  ;;  %5866 = vmatmul.mubr.msk.bf16.vlgmr.msra.gmra.mrb[40].mxu1 %vm2857_vm6, %v8095_v57  ;;  %v4355_v17 = vsel %vm9017_vm12, %v4339_v41, %v8357_v31  ;;  %v5844_v41 = vpop.f32.mrb[23].mxu1  ;;  %vm9031_vm12 = vmmov %vm9029_vm0 }
 0x491   : > { %4977 = vrot.lane.b32.xlu1 %v6838_v44, %s9016_s22  ;;  %4595 = vmatprep.subr.bf16.mxu0 %v4355_v17 }
 0x492   : > { %v4016_v12 = vpop.permute.xlu0 %4015  ;;  %4596 = vmatpush1.bf16.msra.mxu0 %v4354_v48  ;;  %4683 = vmatprep.mubr.bf16.mxu1 %v8133_v40 }
 0x493   : > { %v4218_v39 = vpop.permute.xlu1 %4217  ;;  %v4044_v9 = vsel %vm9020_vm11, %v8090_v29, %v4016_v12  ;;  %vm9035_vm11 = vmmov %vm9029_vm0 }
 0x494   : > { %4975 = vrot.lane.b32.xlu0 %v6853_v8, %s9016_s22  ;;  %v4246_v57 = vsel %vm9019_vm15, %v8231_v37, %v4218_v39  ;;  %vm9034_vm15 = vmmov %vm9029_vm0 }
 0x495   : > { %4777 = vrot.lane.b32.xlu1 %v8887_v62, %s8992_s20  ;;  %5779 = vmatprep.subr.bf16.mxu1 %v4246_v57 }
 0x496   : > { %v8382_v11 = vpop.permute.xlu0 %4417  ;;  %5780 = vmatpush3.bf16.msra.mxu1 %v4044_v9  ;;  %4598 = vmatmul.mubr.bf16.vlgmr.msra.gmra.mrb[20].mxu0 %v8371_v53 }
 0x497   : > { %v4416_v40 = vpop.permute.xlu1 %4415  ;;  %4640 = vmatprep.mubr.bf16.mxu0 %v8870_v25 }
 0x498   : > { %4985 = vrot.lane.b32.xlu0 %v6873_v32, %s9016_s22  ;;  %v4447_v37 = vsel %vm9021_vm1, %v4416_v40, %v8382_v11  ;;  %vm9036_vm1 = vcmask 433152  }
 0x499   : > { %4973 = vrot.lane.b32.xlu1 %v6840_v45, %s9016_s22  ;;  %4608 = vmatprep.subr.bf16.mxu0 %v4447_v37 }
 0x49a   : > { %v4226_v29 = vpop.permute.xlu0 %4225 }
 0x49b   : > { %v4414_v18 = vpop.permute.xlu1 %4413  ;;  %v4249_v24 = vsel %vm9022_vm7, %v8252_v56, %v4226_v29  ;;  %vm9037_vm7 = vcmask 449536  }
 0x49c   : > { %v4446_v4 = vsel %vm9023_vm10, %v4414_v18, %v4416_v40  ;;  %4785 = vrot.lane.b32.xlu0 %v8895_v0, %s8992_s20  ;;  %5781 = vmatprep.subr.bf16.mxu1 %v4249_v24  ;;  %vm9038_vm10 = vcmask 261120  }
 0x49d   : > { %4987 = vrot.lane.b32.xlu1 %v8895_v0, %s9016_s22  ;;  %4609 = vmatpush1.bf16.msra.mxu0 %v4446_v4 }
 0x49e   : > { %v4424_v63 = vpop.permute.xlu0 %4423 }
 0x49f   : > { %v4024_v50 = vpop.permute.xlu1 %4023 }
 0x4a0   : > { %v4047_v56 = vsel %vm9024_vm8, %v8110_v47, %v4024_v50  ;;  %4981 = vrot.lane.b32.xlu0 %v6875_v33, %s9016_s22  ;;  %v8463_v50 = vld [vmem:[%s8728_s5 + $0x50] ss:$12 sps:$4 sm:$0xff]   ;;  %vm9039_vm8 = vmmov %vm9036_vm1 }
 0x4a1   : > { %4983 = vrot.lane.b32.xlu1 %v6891_v6, %s9016_s22  ;;  %5782 = vmatpush3.bf16.msra.mxu1 %v4047_v56 }
 0x4a2   : > { %v4422_v23 = vpop.permute.xlu0 %4421 }
 0x4a3   : > { %v8409_v15 = vpop.permute.xlu1 %4425  ;;  %v4449_v42 = vsel %vm9026_vm4, %v4422_v23, %v4424_v63  ;;  %vm9041_vm4 = vmmov %vm9037_vm7 }
 0x4a4   : > { %4995 = vrot.lane.b32.xlu0 %v8906_v61, %s9016_s22  ;;  %v4450_v47 = vsel %vm9025_vm9, %v4424_v63, %v8409_v15  ;;  %vm9040_vm9 = vmmov %vm9038_vm10 }
 0x4a5   : > { %4993 = vrot.lane.b32.xlu1 %v6908_v28, %s9016_s22  ;;  %4610 = vmatprep.subr.bf16.mxu0 %v4450_v47 }
 0x4a6   : > { %v4032_v27 = vpop.permute.xlu0 %4031  ;;  %4611 = vmatpush1.bf16.msra.mxu0 %v4449_v42 }
 0x4a7   : > { %v4234_v17 = vpop.permute.xlu1 %4233  ;;  %v4050_v12 = vsel %vm9028_vm2, %v8119_v59, %v4032_v27  ;;  %v2938_v27 = vpop.f32.mrb[16].mxu0  ;;  %vm9043_vm2 = vmmov %vm9040_vm9 }
 0x4a8   : > { %4991 = vrot.lane.b32.xlu0 %v6920_v35, %s9016_s22  ;;  %v4252_v48 = vsel %vm9027_vm13, %v8269_v20, %v4234_v17  ;;  %vm9042_vm13 = vmmov %vm9040_vm9 }
 0x4a9   : > { %4793 = vrot.lane.b32.xlu1 %v8906_v61, %s8992_s20  ;;  %5783 = vmatprep.subr.bf16.mxu1 %v4252_v48  ;;  %v3124_v39 = vpop.f32.mrb[24].mxu1 }
 0x4aa   : > { %v8426_v57 = vpop.permute.xlu0 %4433  ;;  %5784 = vmatpush3.bf16.msra.mxu1 %v4050_v12  ;;  %v3126_v9 = vpop.f32.mrb[25].mxu1  ;;  %v8490_v48 = vadd.f32 %v3124_v39, %v2938_v27 }
 0x4ab   : > { %v4432_v40 = vpop.permute.xlu1 %4431  ;;  %v8428_v37 = vpop.f32.mrb[26].mxu1 }
 0x4ac   : > { %5001 = vrot.lane.b32.xlu0 %v6941_v14, %s9016_s22  ;;  %v4453_v20 = vsel %vm9029_vm0, %v4432_v40, %v8426_v57  ;;  %v8434_v29 = vpop.f32.mrb[27].mxu1  ;;  %v2940_v12 = vpop.f32.mrb[17].mxu0  ;;  %vm9044_vm0 = vmmov %vm9036_vm1 }
 0x4ad   : > { %4989 = vrot.lane.b32.xlu1 %v6916_v30, %s9016_s22  ;;  %4612 = vmatprep.subr.bf16.mxu0 %v4453_v20  ;;  %v2942_v20 = vpop.f32.mrb[18].mxu0 }
 0x4ae   : > { %v4242_v59 = vpop.permute.xlu0 %4241  ;;  %v2944_v39 = vpop.f32.mrb[19].mxu0 }
 0x4af   : > { %v4430_v55 = vpop.permute.xlu1 %4429  ;;  %v4255_v18 = vsel %vm9030_vm3, %v8291_v46, %v4242_v59  ;;  %vm9045_vm3 = vmmov %vm9041_vm4 }
 0x4b0   : > { %v4452_v24 = vsel %vm9031_vm12, %v4430_v55, %v4432_v40  ;;  %4801 = vrot.lane.b32.xlu0 %v8919_v52, %s8992_s20  ;;  %5785 = vmatprep.subr.bf16.mxu1 %v4255_v18  ;;  %v8501_v55 = vadd.f32 %v8428_v37, %v2942_v20  ;;  %vm9046_vm12 = vmmov %vm9043_vm2  ;;  %s6026_s20 = smul.u32 48, %s9114_s24 }
 0x4b1   : > { %5003 = vrot.lane.b32.xlu1 %v8919_v52, %s9016_s22  ;;  %4613 = vmatpush1.bf16.msra.mxu0 %v4452_v24 }
 0x4b2   : > { %v4440_v4 = vpop.permute.xlu0 %4439  ;;  %s331_s23 = scalar_lea.vmem %s8730_s7, %s6026_s20 }
 0x4b3   : > { %v4040_v3 = vpop.permute.xlu1 %4039 }
 0x4b4   : > { %v4053_v34 = vsel %vm9032_vm14, %v8138_v5, %v4040_v3  ;;  %4997 = vrot.lane.b32.xlu0 %v6943_v49, %s9016_s22  ;;  %vm9047_vm14 = vmmov %vm9044_vm0 }
 0x4b5   : > { %4999 = vrot.lane.b32.xlu1 %v6953_v1, %s9016_s22  ;;  %5786 = vmatpush3.bf16.msra.mxu1 %v4053_v34 }
 0x4b6   : > { %v4438_v46 = vpop.permute.xlu0 %4437 }
 0x4b7   : > { %v8451_v22 = vpop.permute.xlu1 %4441  ;;  %v4455_v51 = vsel %vm9035_vm11, %v4438_v46, %v4440_v4  ;;  %vm9049_vm11 = vmmov %vm9045_vm3 }
 0x4b8   : > { %5080 = vrot.lane.b32.xlu0 %v8887_v62, %s9033_s30  ;;  %v4456_v63 = vsel %vm9034_vm15, %v4440_v4, %v8451_v22  ;;  %v8504_v4 = vadd.f32 %v8434_v29, %v2944_v39  ;;  %vm9048_vm15 = vmmov %vm9043_vm2 }
 0x4b9   : > { %5078 = vrot.lane.b32.xlu1 %v6838_v44, %s9033_s30  ;;  %4614 = vmatprep.subr.bf16.mxu0 %v4456_v63 }
 0x4ba   : > { %v4117_v5 = vpop.permute.xlu0 %4116  ;;  %4615 = vmatpush1.bf16.msra.mxu0 %v4455_v51 }
 0x4bb   : > { %v4319_v16 = vpop.permute.xlu1 %4318  ;;  %v4145_v56 = vsel %vm9037_vm7, %v8155_v36, %v4117_v5 }
 0x4bc   : > { %5076 = vrot.lane.b32.xlu0 %v6853_v8, %s9033_s30  ;;  %v4347_v58 = vsel %vm9036_vm1, %v8310_v54, %v4319_v16  ;;  %vm9051_vm1 = vmmov %vm9043_vm2 }
 0x4bd   : > { %4878 = vrot.lane.b32.xlu1 %v8887_v62, %s9003_s21  ;;  %5787 = vmatprep.subr.bf16.mxu1 %v4347_v58  ;;  %vm9052_vm7 = vmmov %vm9051_vm1 }
 0x4be   : > { %v8473_v21 = vpop.permute.xlu0 %4775  ;;  %5788 = vmatpush3.bf16.msra.mxu1 %v4145_v56  ;;  %5685 = vmatmul.mubr.msk.bf16.vlgmr.msra.gmra.mrb[20].mxu0 %vm2857_vm6, %v8463_v50 }
 0x4bf   : > { %v4774_v7 = vpop.permute.xlu1 %4773 }
 0x4c0   : > { %5086 = vrot.lane.b32.xlu0 %v6873_v32, %s9033_s30  ;;  %v4805_v54 = vsel %vm9038_vm10, %v4774_v7, %v8473_v21  ;;  %vm9053_vm10 = vcmask 424960  }
 0x4c1   : > { %5074 = vrot.lane.b32.xlu1 %v6840_v45, %s9033_s30  ;;  %5327 = vmatprep.subr.bf16.mxu0 %v4805_v54 }
 0x4c2   : > { %v4327_v36 = vpop.permute.xlu0 %4326 }
 0x4c3   : > { %v4772_v23 = vpop.permute.xlu1 %4771  ;;  %v4350_v41 = vsel %vm9039_vm8, %v8326_v10, %v4327_v36  ;;  %v8496_v10 = vadd.f32 %v3126_v9, %v2940_v12  ;;  %v8538_v36 = vld [vmem:[%s8728_s5 + $0x64] ss:$12 sps:$4 sm:$0xff]   ;;  %vm9054_vm8 = vcmask 252928  }
 0x4c4   : > { %v4804_v47 = vsel %vm9040_vm9, %v4772_v23, %v4774_v7  ;;  %4886 = vrot.lane.b32.xlu0 %v8895_v0, %s9003_s21  ;;  %5789 = vmatprep.subr.bf16.mxu1 %v4350_v41  ;;  %vm9055_vm9 = vmmov %vm9054_vm8 }
 0x4c5   : > { %5088 = vrot.lane.b32.xlu1 %v8895_v0, %s9033_s30  ;;  %5328 = vmatpush1.bf16.msra.mxu0 %v4804_v47 }
 0x4c6   : > { %v4782_v42 = vpop.permute.xlu0 %4781  ;;  %5359 = vmatprep.mubr.bf16.mxu0 %v8538_v36 }
 0x4c7   : > { %v4125_v17 = vpop.permute.xlu1 %4124 }
 0x4c8   : > { %v4148_v40 = vsel %vm9041_vm4, %v8176_v60, %v4125_v17  ;;  %5082 = vrot.lane.b32.xlu0 %v6875_v33, %s9033_s30  ;;  %vm9056_vm4 = vmmov %vm9053_vm10 }
 0x4c9   : > { %5084 = vrot.lane.b32.xlu1 %v6891_v6, %s9033_s30  ;;  %5790 = vmatpush3.bf16.msra.mxu1 %v4148_v40  ;;  %v5741_v59 = vpop.f32.mrb[28].mxu1 }
 0x4ca   : > { %v4780_v18 = vpop.permute.xlu0 %4779  ;;  %v5742_v24 = vpop.f32.mrb[29].mxu1 }
 0x4cb   : > { %v8506_v60 = vpop.permute.xlu1 %4783  ;;  %v5743_v3 = vadd.f32 %v5742_v24, %v5741_v59  ;;  %v5744_v9 = vpop.f32.mrb[30].mxu1  ;;  %v4807_v37 = vsel %vm9043_vm2, %v4780_v18, %v4782_v42  ;;  %vm9058_vm2 = vmmov %vm9054_vm8 }
 0x4cc   : > { %5096 = vrot.lane.b32.xlu0 %v8906_v61, %s9033_s30  ;;  %v4808_v34 = vsel %vm9042_vm13, %v4782_v42, %v8506_v60  ;;  %v5745_v46 = vpop.f32.mrb[31].mxu1  ;;  %vm9057_vm13 = vmmov %vm9054_vm8 }
 0x4cd   : > { %5094 = vrot.lane.b32.xlu1 %v6908_v28, %s9033_s30  ;;  %5329 = vmatprep.subr.bf16.mxu0 %v4808_v34  ;;  %v5746_v63 = vadd.f32 %v5745_v46, %v5744_v9  ;;  %v3168_v29 = vadd.f32 %v5743_v3, %v8403_v26 }
 0x4ce   : > { %v4133_v51 = vpop.permute.xlu0 %4132  ;;  %5330 = vmatpush1.bf16.msra.mxu0 %v4807_v37 }
 0x4cf   : > { %v4335_v5 = vpop.permute.xlu1 %4334  ;;  %v3171_v16 = vadd.f32 %v5746_v63, %v8407_v13  ;;  %v4151_v56 = vsel %vm9045_vm3, %v8193_v19, %v4133_v51  ;;  %vm9060_vm3 = vmmov %vm9058_vm2 }
 0x4d0   : > { %5092 = vrot.lane.b32.xlu0 %v6920_v35, %s9033_s30  ;;  %v4353_v58 = vsel %vm9044_vm0, %v8342_v43, %v4335_v5  ;;  %vm9059_vm0 = vmmov %vm9056_vm4 }
 0x4d1   : > { %4894 = vrot.lane.b32.xlu1 %v8906_v61, %s9003_s21  ;;  %5791 = vmatprep.subr.bf16.mxu1 %v4353_v58 }
 0x4d2   : > { %v8525_v7 = vpop.permute.xlu0 %4791  ;;  %5792 = vmatpush3.bf16.msra.mxu1 %v4151_v56 }
 0x4d3   : > { %v4790_v26 = vpop.permute.xlu1 %4789 }
 0x4d4   : > { %5102 = vrot.lane.b32.xlu0 %v6941_v14, %s9033_s30  ;;  %v4811_v13 = vsel %vm9046_vm12, %v4790_v26, %v8525_v7  ;;  %vm9061_vm12 = vmmov %vm9058_vm2 }
 0x4d5   : > { %5090 = vrot.lane.b32.xlu1 %v6916_v30, %s9033_s30  ;;  %5331 = vmatprep.subr.bf16.mxu0 %v4811_v13 }
 0x4d6   : > { %v4343_v43 = vpop.permute.xlu0 %4342 }
 0x4d7   : > { %v4788_v19 = vpop.permute.xlu1 %4787  ;;  %v4356_v54 = vsel %vm9047_vm14, %v8357_v31, %v4343_v43  ;;  %vm9062_vm14 = vmmov %vm9059_vm0 }
 0x4d8   : > { %v4810_v23 = vsel %vm9048_vm15, %v4788_v19, %v4790_v26  ;;  %4902 = vrot.lane.b32.xlu0 %v8919_v52, %s9003_s21  ;;  %5793 = vmatprep.subr.bf16.mxu1 %v4356_v54  ;;  %vm9063_vm15 = vmmov %vm9058_vm2 }
 0x4d9   : > { %5104 = vrot.lane.b32.xlu1 %v8919_v52, %s9033_s30  ;;  %5332 = vmatpush1.bf16.msra.mxu0 %v4810_v23  ;;  %v3208_v41 = vpop.f32.mrb[32].mxu1 }
 0x4da   : > { %v4798_v47 = vpop.permute.xlu0 %4797  ;;  %v8545_v42 = vadd.f32 %v3208_v41, %v3168_v29  ;;  %v5855_v31 = vpop.f32.mrb[33].mxu1 }
 0x4db   : > { %v4141_v27 = vpop.permute.xlu1 %4140  ;;  %v3211_v17 = vpop.f32.mrb[34].mxu1 }
 0x4dc   : > { %v4154_v12 = vsel %vm9049_vm11, %v8214_v38, %v4141_v27  ;;  %5098 = vrot.lane.b32.xlu0 %v6943_v49, %s9033_s30  ;;  %v8552_v40 = vadd.f32 %v3211_v17, %v3171_v16  ;;  %v5856_v20 = vpop.f32.mrb[35].mxu1  ;;  %vm9064_vm11 = vmmov %vm9058_vm2 }
 0x4dd   : > { %5100 = vrot.lane.b32.xlu1 %v6953_v1, %s9033_s30  ;;  %5794 = vmatpush3.bf16.msra.mxu1 %v4154_v12 }
 0x4de   : > { %v4796_v59 = vpop.permute.xlu0 %4795  ;;  %5869 = vmatprep.subr.bf16.mxu1 %v6379_v2 }
 0x4df   : > { %v8557_v39 = vpop.permute.xlu1 %4799  ;;  %v4813_v18 = vsel %vm9052_vm7, %v4796_v59, %v4798_v47 }
 0x4e0   : > { %5179 = vrot.lane.b32.xlu0 %v6838_v44, %s9050_s18  ;;  %v4814_v38 = vsel %vm9051_vm1, %v4798_v47, %v8557_v39  ;;  %4684 = vmatmul.mubr.bf16.vlgmr.msra.gmra.mrb[44].mxu1 %v8371_v53  ;;  %vm9065_vm1 = vcmask 244736  }
 0x4e1   : > { %5177 = vrot.lane.b32.xlu1 %v6853_v8, %s9050_s18  ;;  %5333 = vmatprep.subr.bf16.mxu0 %v4814_v38  ;;  %vm9066_vm7 = vmmov %vm9065_vm1 }
 0x4e2   : > { %v4875_v24 = vpop.permute.xlu0 %4874  ;;  %5334 = vmatpush1.bf16.msra.mxu0 %v4813_v18  ;;  %5877 = vmatprep.mubr.msk.bf16.mxu1 %vm6380_vm5, %v6379_v2 }
 0x4e3   : > { %v4420_v3 = vpop.permute.xlu1 %4419 }
 0x4e4   : > { %v4448_v44 = vsel %vm9053_vm10, %v8382_v11, %v4420_v3  ;;  %5175 = vrot.lane.b32.xlu0 %v6840_v45, %s9050_s18  ;;  %vm9067_vm10 = vcmask 261120  }
 0x4e5   : > { %5181 = vrot.lane.b32.xlu1 %v8887_v62, %s9050_s18  ;;  %5870 = vmatpush3.bf16.msra.mxu1 %v4448_v44 }
 0x4e6   : > { %v4873_v53 = vpop.permute.xlu0 %4872  ;;  %5871 = vmatprep.subr.bf16.mxu1 %v6379_v2 }
 0x4e7   : > { %v8576_v8 = vpop.permute.xlu1 %4876  ;;  %v4905_v11 = vsel %vm9055_vm9, %v4873_v53, %v4875_v24  ;;  %vm9069_vm9 = vmmov %vm9065_vm1 }
 0x4e8   : > { %5187 = vrot.lane.b32.xlu0 %v6873_v32, %s9050_s18  ;;  %v4906_v9 = vsel %vm9054_vm8, %v4875_v24, %v8576_v8  ;;  %vm9068_vm8 = vmmov %vm9065_vm1 }
 0x4e9   : > { %5185 = vrot.lane.b32.xlu1 %v6891_v6, %s9050_s18  ;;  %5335 = vmatprep.subr.bf16.mxu0 %v4906_v9 }
 0x4ea   : > { %v4883_v45 = vpop.permute.xlu0 %4882  ;;  %5336 = vmatpush1.bf16.msra.mxu0 %v4905_v11 }
 0x4eb   : > { %v4428_v62 = vpop.permute.xlu1 %4427 }
 0x4ec   : > { %v4451_v34 = vsel %vm9056_vm4, %v8409_v15, %v4428_v62  ;;  %5183 = vrot.lane.b32.xlu0 %v6875_v33, %s9050_s18  ;;  %vm9070_vm4 = vmmov %vm9067_vm10 }
 0x4ed   : > { %5189 = vrot.lane.b32.xlu1 %v8895_v0, %s9050_s18  ;;  %5872 = vmatpush3.bf16.msra.mxu1 %v4451_v34 }
 0x4ee   : > { %v4881_v32 = vpop.permute.xlu0 %4880  ;;  %5873 = vmatprep.subr.bf16.mxu1 %v6379_v2 }
 0x4ef   : > { %v8592_v46 = vpop.permute.xlu1 %4884  ;;  %v4908_v15 = vsel %vm9058_vm2, %v4881_v32, %v4883_v45  ;;  %vm9072_vm2 = vmmov %vm9065_vm1 }
 0x4f0   : > { %5195 = vrot.lane.b32.xlu0 %v6908_v28, %s9050_s18  ;;  %v4909_v6 = vsel %vm9057_vm13, %v4883_v45, %v8592_v46  ;;  %vm9071_vm13 = vmmov %vm9065_vm1 }
 0x4f1   : > { %5193 = vrot.lane.b32.xlu1 %v6920_v35, %s9050_s18  ;;  %5337 = vmatprep.subr.bf16.mxu0 %v4909_v6 }
 0x4f2   : > { %v4891_v33 = vpop.permute.xlu0 %4890  ;;  %5338 = vmatpush1.bf16.msra.mxu0 %v4908_v15 }
 0x4f3   : > { %v4436_v0 = vpop.permute.xlu1 %4435 }
 0x4f4   : > { %v4454_v37 = vsel %vm9059_vm0, %v8426_v57, %v4436_v0  ;;  %5191 = vrot.lane.b32.xlu0 %v6916_v30, %s9050_s18  ;;  %vm9073_vm0 = vmmov %vm9065_vm1 }
 0x4f5   : > { %5197 = vrot.lane.b32.xlu1 %v8906_v61, %s9050_s18  ;;  %5874 = vmatpush3.bf16.msra.mxu1 %v4454_v37 }
 0x4f6   : > { %v4889_v28 = vpop.permute.xlu0 %4888  ;;  %5875 = vmatprep.subr.bf16.mxu1 %v6379_v2 }
 0x4f7   : > { %v8608_v63 = vpop.permute.xlu1 %4892  ;;  %v4911_v57 = vsel %vm9061_vm12, %v4889_v28, %v4891_v33  ;;  %vm9075_vm12 = vmmov %vm9070_vm4 }
 0x4f8   : > { %5203 = vrot.lane.b32.xlu0 %v6941_v14, %s9050_s18  ;;  %v4912_v35 = vsel %vm9060_vm3, %v4891_v33, %v8608_v63  ;;  %v1779_v14 = vld [vmem:[%s8729_s6 + $0x8] sm:$0xff]  ;;  %vm9074_vm3 = vmmov %vm9073_vm0 }
 0x4f9   : > { %5201 = vrot.lane.b32.xlu1 %v6953_v1, %s9050_s18  ;;  %5339 = vmatprep.subr.bf16.mxu0 %v4912_v35  ;;  %v1778_v1 = vld [vmem:[%s8729_s6] sm:$0xff] }
 0x4fa   : > { %v4899_v30 = vpop.permute.xlu0 %4898  ;;  %5340 = vmatpush1.bf16.msra.mxu0 %v4911_v57 }
 0x4fb   : > { %v4444_v61 = vpop.permute.xlu1 %4443 }
 0x4fc   : > { %v4457_v29 = vsel %vm9062_vm14, %v8451_v22, %v4444_v61  ;;  %5199 = vrot.lane.b32.xlu0 %v6943_v49, %s9050_s18  ;;  %vm9076_vm14 = vmmov %vm9073_vm0 }
 0x4fd   : > { %5205 = vrot.lane.b32.xlu1 %v8919_v52, %s9050_s18  ;;  %5876 = vmatpush3.bf16.msra.mxu1 %v4457_v29 }
 0x4fe   : > { %v4897_v51 = vpop.permute.xlu0 %4896 }
 0x4ff   : > { %v8629_v5 = vpop.permute.xlu1 %4900  ;;  %v4914_v52 = vsel %vm9064_vm11, %v4897_v51, %v4899_v30  ;;  %vm9078_vm11 = vmmov %vm9070_vm4 }
 0x500   : > { %5508 = vperm.xlu0 %6308, %v1779_v14   ;;  %5878 = vmatmul.mubr.msk.bf16.vlgmr.msra.gmra.mrb[48].mxu1 %vm2857_vm6, %v8463_v50  ;;  %v4915_v49 = vsel %vm9063_vm15, %v4899_v30, %v8629_v5  ;;  %vm9077_vm15 = vmmov %vm9073_vm0 }
 0x501   : > { %5503 = vperm.xlu1 %6309, %v1778_v1   ;;  %5341 = vmatprep.subr.bf16.mxu0 %v4915_v49 }
 0x502   : > { %v4980_v22 = vpop.permute.xlu0 %4979  ;;  %5342 = vmatpush1.bf16.msra.mxu0 %v4914_v52  ;;  %5445 = vmatprep.mubr.bf16.mxu1 %v8538_v36 }
 0x503   : > { %v4978_v16 = vpop.permute.xlu1 %4977 }
 0x504   : > { %v5008_v58 = vsel %vm9065_vm1, %v4978_v16, %v4980_v22  ;;  %vm9079_vm1 = vmmov %vm9073_vm0 }
 0x505   : > { %5806 = vmatprep.subr.bf16.mxu1 %v5008_v58 }
 0x506   : > { %v4976_v56 = vpop.permute.xlu0 %4975 }
 0x507   : > { %v4778_v26 = vpop.permute.xlu1 %4777  ;;  %v5007_v13 = vsel %vm9066_vm7, %v4976_v56, %v4978_v16  ;;  %vm9080_vm7 = vmmov %vm9073_vm0 }
 0x508   : > { %v4806_v50 = vsel %vm9067_vm10, %v8473_v21, %v4778_v26  ;;  %5343 = vmatprep.subr.bf16.mxu0 %v5007_v13  ;;  %vm9081_vm10 = vcmask 236544  }
 0x509   : > { %5807 = vmatpush3.bf16.msra.mxu1 %v4806_v50 }
 0x50a   : > { %v4986_v43 = vpop.permute.xlu0 %4985 }
 0x50b   : > { %v4974_v19 = vpop.permute.xlu1 %4973 }
 0x50c   : > { %v5006_v54 = vsel %vm9068_vm8, %v4974_v19, %v4976_v56  ;;  %vm9082_vm8 = vmmov %vm9081_vm10 }
 0x50d   : > { %5344 = vmatpush1.bf16.msra.mxu0 %v5006_v54 }
 0x50e   : > { %v4786_v23 = vpop.permute.xlu0 %4785 }
 0x50f   : > { %v4988_v36 = vpop.permute.xlu1 %4987  ;;  %v4809_v47 = vsel %vm9070_vm4, %v8506_v60, %v4786_v23  ;;  %vm9084_vm4 = vmmov %vm9082_vm8 }
 0x510   : > { %v5011_v41 = vsel %vm9069_vm9, %v4986_v43, %v4988_v36  ;;  %vm9083_vm9 = vcmask 252928  }
 0x511   : > { %5808 = vmatprep.subr.bf16.mxu1 %v5011_v41 }
 0x512   : > { %v4982_v31 = vpop.permute.xlu0 %4981  ;;  %5809 = vmatpush3.bf16.msra.mxu1 %v4809_v47 }
 0x513   : > { %v4984_v27 = vpop.permute.xlu1 %4983 }
 0x514   : > { %v5009_v21 = vsel %vm9071_vm13, %v4982_v31, %v4984_v27  ;;  %v5010_v17 = vsel %vm9072_vm2, %v4984_v27, %v4986_v43  ;;  %vm9085_vm13 = vmmov %vm9084_vm4 }
 0x515   : > { %5345 = vmatprep.subr.bf16.mxu0 %v5010_v17  ;;  %vm9086_vm2 = vmmov %vm9083_vm9 }
 0x516   : > { %v4996_v12 = vpop.permute.xlu0 %4995  ;;  %5346 = vmatpush1.bf16.msra.mxu0 %v5009_v21 }
 0x517   : > { %v4994_v20 = vpop.permute.xlu1 %4993 }
 0x518   : > { %v5014_v59 = vsel %vm9073_vm0, %v4994_v20, %v4996_v12  ;;  %vm9087_vm0 = vmmov %vm9084_vm4 }
 0x519   : > { %5810 = vmatprep.subr.bf16.mxu1 %v5014_v59 }
 0x51a   : > { %v4992_v38 = vpop.permute.xlu0 %4991 }
 0x51b   : > { %v4794_v18 = vpop.permute.xlu1 %4793  ;;  %v5013_v24 = vsel %vm9074_vm3, %v4992_v38, %v4994_v20  ;;  %vm9088_vm3 = vmmov %vm9087_vm0 }
 0x51c   : > { %v4812_v60 = vsel %vm9075_vm12, %v8525_v7, %v4794_v18  ;;  %5347 = vmatprep.subr.bf16.mxu0 %v5013_v24  ;;  %vm9089_vm12 = vmmov %vm9087_vm0 }
 0x51d   : > { %5811 = vmatpush3.bf16.msra.mxu1 %v4812_v60 }
 0x51e   : > { %v5002_v3 = vpop.permute.xlu0 %5001 }
 0x51f   : > { %v4990_v44 = vpop.permute.xlu1 %4989 }
 0x520   : > { %v5012_v53 = vsel %vm9076_vm14, %v4990_v44, %v4992_v38  ;;  %vm9090_vm14 = vmmov %vm9087_vm0 }
 0x521   : > { %5348 = vmatpush1.bf16.msra.mxu0 %v5012_v53 }
 0x522   : > { %v4802_v9 = vpop.permute.xlu0 %4801 }
 0x523   : > { %v5004_v11 = vpop.permute.xlu1 %5003  ;;  %v4815_v62 = vsel %vm9078_vm11, %v8557_v39, %v4802_v9  ;;  %vm9092_vm11 = vmmov %vm9087_vm0 }
 0x524   : > { %v5017_v45 = vsel %vm9077_vm15, %v5002_v3, %v5004_v11  ;;  %vm9091_vm15 = vmmov %vm9086_vm2 }
 0x525   : > { %5812 = vmatprep.subr.bf16.mxu1 %v5017_v45 }
 0x526   : > { %v4998_v34 = vpop.permute.xlu0 %4997  ;;  %5813 = vmatpush3.bf16.msra.mxu1 %v4815_v62 }
 0x527   : > { %v5000_v32 = vpop.permute.xlu1 %4999 }
 0x528   : > { %v5015_v7 = vsel %vm9079_vm1, %v4998_v34, %v5000_v32  ;;  %v5016_v6 = vsel %vm9080_vm7, %v5000_v32, %v5002_v3  ;;  %vm9093_vm1 = vmmov %vm9087_vm0 }
 0x529   : > { %5349 = vmatprep.subr.bf16.mxu0 %v5016_v6  ;;  %vm9094_vm7 = vmmov %vm9086_vm2 }
 0x52a   : > { %v5081_v15 = vpop.permute.xlu0 %5080  ;;  %5350 = vmatpush1.bf16.msra.mxu0 %v5015_v7 }
 0x52b   : > { %v5079_v33 = vpop.permute.xlu1 %5078 }
 0x52c   : > { %v5109_v0 = vsel %vm9081_vm10, %v5079_v33, %v5081_v15  ;;  %vm9095_vm10 = vmmov %vm9087_vm0 }
 0x52d   : > { %5814 = vmatprep.subr.bf16.mxu1 %v5109_v0 }
 0x52e   : > { %v5077_v37 = vpop.permute.xlu0 %5076 }
 0x52f   : > { %v4879_v28 = vpop.permute.xlu1 %4878  ;;  %v5108_v35 = vsel %vm9082_vm8, %v5077_v37, %v5079_v33  ;;  %vm9096_vm8 = vmmov %vm9087_vm0 }
 0x530   : > { %v4907_v39 = vsel %vm9083_vm9, %v8576_v8, %v4879_v28  ;;  %5351 = vmatprep.subr.bf16.mxu0 %v5108_v35  ;;  %vm9097_vm9 = vcmask 228352  }
 0x531   : > { %5815 = vmatpush3.bf16.msra.mxu1 %v4907_v39 }
 0x532   : > { %v5087_v57 = vpop.permute.xlu0 %5086 }
 0x533   : > { %v5075_v30 = vpop.permute.xlu1 %5074 }
 0x534   : > { %v5107_v61 = vsel %vm9084_vm4, %v5075_v30, %v5077_v37  ;;  %vm9098_vm4 = vmmov %vm9097_vm9 }
 0x535   : > { %5352 = vmatpush1.bf16.msra.mxu0 %v5107_v61 }
 0x536   : > { %v4887_v29 = vpop.permute.xlu0 %4886 }
 0x537   : > { %v5089_v14 = vpop.permute.xlu1 %5088  ;;  %v4910_v1 = vsel %vm9086_vm2, %v8592_v46, %v4887_v29  ;;  %vm9101_vm2 = vmmov %vm9098_vm4 }
 0x538   : > { %v5112_v51 = vsel %vm9085_vm13, %v5087_v57, %v5089_v14  ;;  %vm9099_vm13 = vmmov %vm9098_vm4 }
 0x539   : > { %5816 = vmatprep.subr.bf16.mxu1 %v5112_v51 }
 0x53a   : > { %v5083_v49 = vpop.permute.xlu0 %5082  ;;  %5817 = vmatpush3.bf16.msra.mxu1 %v4910_v1 }
 0x53b   : > { %v5085_v52 = vpop.permute.xlu1 %5084 }
 0x53c   : > { %v5110_v8 = vsel %vm9087_vm0, %v5083_v49, %v5085_v52  ;;  %v5111_v22 = vsel %vm9088_vm3, %v5085_v52, %v5087_v57  ;;  %vm9102_vm0 = vmmov %vm9101_vm2 }
 0x53d   : > { %5353 = vmatprep.subr.bf16.mxu0 %v5111_v22  ;;  %vm9103_vm3 = vmmov %vm9102_vm0 }
 0x53e   : > { %v5097_v16 = vpop.permute.xlu0 %5096  ;;  %5354 = vmatpush1.bf16.msra.mxu0 %v5110_v8 }
 0x53f   : > { %v5095_v58 = vpop.permute.xlu1 %5094 }
 0x540   : > { %v5115_v56 = vsel %vm9089_vm12, %v5095_v58, %v5097_v16  ;;  %vm9104_vm12 = vmmov %vm9102_vm0 }
 0x541   : > { %5818 = vmatprep.subr.bf16.mxu1 %v5115_v56  ;;  %v6329_v56 = vld [vmem:[%s8728_s5 + $0x68] ss:$12 sps:$4 sm:$0xff]  }
 0x542   : > { %v5093_v26 = vpop.permute.xlu0 %5092 }
 0x543   : > { %v4895_v13 = vpop.permute.xlu1 %4894  ;;  %v5114_v50 = vsel %vm9090_vm14, %v5093_v26, %v5095_v58  ;;  %v5768_v46 = vpop.f32.mrb[36].mxu1  ;;  %vm9105_vm14 = vmmov %vm9102_vm0 }
 0x544   : > { %v4913_v43 = vsel %vm9091_vm15, %v8608_v63, %v4895_v13  ;;  %5355 = vmatprep.subr.bf16.mxu0 %v5114_v50  ;;  %v5769_v19 = vpop.f32.mrb[37].mxu1  ;;  %v6326_v63 = vld [vmem:[%s8728_s5 + $0x60] ss:$12 sps:$4 sm:$0xff]   ;;  %vm9106_vm15 = vmmov %vm9102_vm0 }
 0x545   : > { %5819 = vmatpush3.bf16.msra.mxu1 %v4913_v43  ;;  %v5770_v54 = vadd.f32 %v5769_v19, %v5768_v46  ;;  %v5771_v23 = vpop.f32.mrb[38].mxu1 }
 0x546   : > { %v5103_v36 = vpop.permute.xlu0 %5102  ;;  %v5772_v41 = vpop.f32.mrb[39].mxu1 }
 0x547   : > { %v5091_v47 = vpop.permute.xlu1 %5090  ;;  %v5773_v31 = vadd.f32 %v5772_v41, %v5771_v23 }
 0x548   : > { %v5113_v27 = vsel %vm9092_vm11, %v5091_v47, %v5093_v26  ;;  %vm9107_vm11 = vmmov %vm9102_vm0 }
 0x549   : > { %5356 = vmatpush1.bf16.msra.mxu0 %v5113_v27 }
 0x54a   : > { %v4903_v21 = vpop.permute.xlu0 %4902 }
 0x54b   : > { %v5105_v17 = vpop.permute.xlu1 %5104  ;;  %v4916_v20 = vsel %vm9094_vm7, %v8629_v5, %v4903_v21 }
 0x54c   : > { %v5118_v12 = vsel %vm9093_vm1, %v5103_v36, %v5105_v17  ;;  %vm9108_vm1 = vmmov %vm9102_vm0 }
 0x54d   : > { %5820 = vmatprep.subr.bf16.mxu1 %v5118_v12 }
 0x54e   : > { %v5099_v59 = vpop.permute.xlu0 %5098  ;;  %5821 = vmatpush3.bf16.msra.mxu1 %v4916_v20 }
 0x54f   : > { %v5101_v38 = vpop.permute.xlu1 %5100  ;;  %5881 = vmatprep.subr.bf16.mxu1 %v6379_v2 }
 0x550   : > { %v5116_v18 = vsel %vm9095_vm10, %v5099_v59, %v5101_v38  ;;  %v5117_v24 = vsel %vm9096_vm8, %v5101_v38, %v5103_v36 }
 0x551   : > { %5357 = vmatprep.subr.bf16.mxu0 %v5117_v24  ;;  %5446 = vmatmul.mubr.bf16.vlgmr.msra.gmra.mrb[52].mxu1 %v6326_v63 }
 0x552   : > { %v5180_v60 = vpop.permute.xlu0 %5179  ;;  %5358 = vmatpush1.bf16.msra.mxu0 %v5116_v18  ;;  %5889 = vmatprep.mubr.msk.bf16.mxu1 %vm6380_vm5, %v6379_v2  ;;  %vm9100_vm5 = vmmov %vm9098_vm4 }
 0x553   : > { %v5178_v5 = vpop.permute.xlu1 %5177 }
 0x554   : > { %v5209_v3 = vsel %vm9097_vm9, %v5178_v5, %v5180_v60 }
 0x555   : > { %5370 = vmatprep.subr.bf16.mxu0 %v5209_v3  ;;  %5360 = vmatmul.mubr.bf16.vlgmr.msra.gmra.mrb[20].mxu0 %v6326_v63 }
 0x556   : > { %v5176_v44 = vpop.permute.xlu0 %5175  ;;  %5402 = vmatprep.mubr.bf16.mxu0 %v8870_v25 }
 0x557   : > { %v5208_v53 = vsel %vm9098_vm4, %v5176_v44, %v5178_v5  ;;  %v5182_v9 = vpop.permute.xlu1 %5181 }
 0x558   : > { %v5210_v11 = vsel %vm9099_vm13, %v5180_v60, %v5182_v9  ;;  %5371 = vmatpush1.bf16.msra.mxu0 %v5208_v53 }
 0x559   : > { %5882 = vmatpush3.bf16.msra.mxu1 %v5210_v11 }
 0x55a   : > { %v5188_v45 = vpop.permute.xlu0 %5187  ;;  %5883 = vmatprep.subr.bf16.mxu1 %v6379_v2 }
 0x55b   : > { %v5186_v62 = vpop.permute.xlu1 %5185 }
 0x55c   : > { %v5212_v34 = vsel %vm9100_vm5, %v5186_v62, %v5188_v45 }
 0x55d   : > { %5372 = vmatprep.subr.bf16.mxu0 %v5212_v34 }
 0x55e   : > { %v5184_v32 = vpop.permute.xlu0 %5183 }
 0x55f   : > { %v5211_v7 = vsel %vm9101_vm2, %v5184_v32, %v5186_v62  ;;  %v5190_v6 = vpop.permute.xlu1 %5189 }
 0x560   : > { %v5213_v25 = vsel %vm9102_vm0, %v5188_v45, %v5190_v6  ;;  %5373 = vmatpush1.bf16.msra.mxu0 %v5211_v7 }
 0x561   : > { %5884 = vmatpush3.bf16.msra.mxu1 %v5213_v25 }
 0x562   : > { %v5196_v15 = vpop.permute.xlu0 %5195  ;;  %5885 = vmatprep.subr.bf16.mxu1 %v6379_v2 }
 0x563   : > { %v3964_v33 = vpop.f32.mrb[40].mxu1  ;;  %v5194_v0 = vpop.permute.xlu1 %5193 }
 0x564   : > { %v3965_v37 = vadd.f32 %v5770_v54, %v3964_v33  ;;  %v5867_v28 = vpop.f32.mrb[41].mxu1  ;;  %v5215_v35 = vsel %vm9103_vm3, %v5194_v0, %v5196_v15 }
 0x565   : > { %v3967_v39 = vpop.f32.mrb[42].mxu1  ;;  %5374 = vmatprep.subr.bf16.mxu0 %v5215_v35 }
 0x566   : > { %v3973_v57 = vadd.f32 %v3965_v37, %v8545_v42  ;;  %v3968_v30 = vadd.f32 %v5773_v31, %v3967_v39  ;;  %v5192_v61 = vpop.permute.xlu0 %5191  ;;  %v5868_v29 = vpop.f32.mrb[43].mxu1 }
 0x567   : > { %v5214_v14 = vsel %vm9104_vm12, %v5192_v61, %v5194_v0  ;;  %v5198_v51 = vpop.permute.xlu1 %5197 }
 0x568   : > { %v3976_v1 = vadd.f32 %v3968_v30, %v8552_v40  ;;  %v5216_v49 = vsel %vm9105_vm14, %v5196_v15, %v5198_v51  ;;  %5375 = vmatpush1.bf16.msra.mxu0 %v5214_v14 }
 0x569   : > { %5886 = vmatpush3.bf16.msra.mxu1 %v5216_v49 }
 0x56a   : > { %v5204_v52 = vpop.permute.xlu0 %5203  ;;  %5887 = vmatprep.subr.bf16.mxu1 %v6379_v2 }
 0x56b   : > { %v5202_v8 = vpop.permute.xlu1 %5201 }
 0x56c   : > { %v5218_v22 = vsel %vm9106_vm15, %v5202_v8, %v5204_v52 }
 0x56d   : > { %5376 = vmatprep.subr.bf16.mxu0 %v5218_v22 }
 0x56e   : > { %v5200_v42 = vpop.permute.xlu0 %5199 }
 0x56f   : > { %v5217_v16 = vsel %vm9107_vm11, %v5200_v42, %v5202_v8  ;;  %v5206_v58 = vpop.permute.xlu1 %5205 }
 0x570   : > { %v5219_v40 = vsel %vm9108_vm1, %v5204_v52, %v5206_v58  ;;  %5377 = vmatpush1.bf16.msra.mxu0 %v5217_v16 }
 0x571   : > { %5888 = vmatpush3.bf16.msra.mxu1 %v5219_v40 }
 0x573   : > { %5694 = vmatmul.mubr.msk.bf16.vlgmr.msra.gmra.mrb[20].mxu0 %vm2857_vm6, %v6329_v56 }
 0x574   : > { %5890 = vmatmul.mubr.msk.bf16.vlgmr.msra.gmra.mrb[56].mxu1 %vm2857_vm6, %v6329_v56 }
 0x57f   : > { %v5509_v32 = vpop.permute.xlu0 %5508 }
 0x580   : > { %v5504_v38 = vpop.permute.xlu1 %5503 }
 0x5b3   : > { %v5795_v2 = vpop.f32.mrb[44].mxu1 }
 0x5b4   : > { %v5796_v26 = vpop.f32.mrb[45].mxu1 }
 0x5b5   : > { %v5797_v13 = vadd.f32 %v5796_v26, %v5795_v2  ;;  %v5798_v50 = vpop.f32.mrb[46].mxu1 }
 0x5b6   : > { %v5799_v46 = vpop.f32.mrb[47].mxu1 }
 0x5b7   : > { %v5800_v43 = vadd.f32 %v5799_v46, %v5798_v50 }
 0x5d3   : > { %v4726_v19 = vpop.f32.mrb[48].mxu1 }
 0x5d4   : > { %v4727_v54 = vadd.f32 %v5797_v13, %v4726_v19  ;;  %v5879_v23 = vpop.f32.mrb[49].mxu1 }
 0x5d5   : > { %v4729_v36 = vpop.f32.mrb[50].mxu1 }
 0x5d6   : > { %v4735_v41 = vadd.f32 %v4727_v54, %v3973_v57  ;;  %v4730_v47 = vadd.f32 %v5800_v43, %v4729_v36  ;;  %v5880_v31 = vpop.f32.mrb[51].mxu1 }
 0x5d8   : > { %v4738_v27 = vadd.f32 %v4730_v47, %v3976_v1 }
 0x624   : > { %v5822_v21 = vpop.f32.mrb[52].mxu1 }
 0x625   : > { %v5823_v17 = vpop.f32.mrb[53].mxu1 }
 0x626   : > { %v5824_v12 = vadd.f32 %v5823_v17, %v5822_v21  ;;  %v5825_v20 = vpop.f32.mrb[54].mxu1 }
 0x627   : > { %v5826_v63 = vpop.f32.mrb[55].mxu1 }
 0x628   : > { %v5827_v59 = vadd.f32 %v5826_v63, %v5825_v20 }
 0x646   : > { %v5404_v18 = vpop.f32.mrb[20].mxu0 }
 0x647   : > { %v5990_v24 = vadd.f32 %v8490_v48, %v5404_v18  ;;  %v5406_v60 = vpop.f32.mrb[21].mxu0  ;;  %v5488_v5 = vpop.f32.mrb[56].mxu1 }
 0x648   : > { %v5992_v3 = vadd.f32 %v8496_v10, %v5406_v60  ;;  %v5489_v44 = vadd.f32 %v5824_v12, %v5488_v5  ;;  %v5408_v53 = vpop.f32.mrb[22].mxu0  ;;  %v5891_v9 = vpop.f32.mrb[57].mxu1 }
 0x649   : > { %v5511_v11 = vadd.f32 %v5990_v24, %v5504_v38  ;;  %v5994_v45 = vadd.f32 %v8501_v55, %v5408_v53  ;;  %v5410_v62 = vpop.f32.mrb[23].mxu0  ;;  %v5491_v34 = vpop.f32.mrb[58].mxu1 }
 0x64a   : > { %v5512_v7 = vadd.f32 %v5992_v3, %v5504_v38  ;;  %v5497_v6 = vadd.f32 %v5489_v44, %v4735_v41  ;;  %v5996_v48 = vadd.f32 %v8504_v4, %v5410_v62  ;;  %v5492_v25 = vadd.f32 %v5827_v59, %v5491_v34  ;;  %v5892_v15 = vpop.f32.mrb[59].mxu1 }
 0x64b   : > { %5517 = vst [vmem:[%s331_s23] sm:$0xff] %v5511_v11  ;;  %v5514_v33 = vadd.f32 %v5994_v45, %v5509_v32 }
 0x64c   : > { %5518 = vst [vmem:[%s331_s23 + $0x8] sm:$0xff] %v5512_v7  ;;  %v5513_v0 = vadd.f32 %v5504_v38, %v5497_v6  ;;  %v5515_v10 = vadd.f32 %v5996_v48, %v5509_v32  ;;  %v5500_v37 = vadd.f32 %v5492_v25, %v4738_v27 }
 0x64d   : > { %5520 = vst [vmem:[%s331_s23 + $0x18] sm:$0xff] %v5514_v33 }
 0x64e   : > { %5519 = vst [vmem:[%s331_s23 + $0x10] sm:$0xff] %v5513_v0  ;;  %5521 = vst [vmem:[%s331_s23 + $0x20] sm:$0xff] %v5515_v10  ;;  %v5516_v28 = vadd.f32 %v5509_v32, %v5500_v37 }
 0x650   : > { %5522 = vst [vmem:[%s331_s23 + $0x28] sm:$0xff] %v5516_v28 }
 0x651 PF: > { %s17_s26 = sadd.s32 1, %s6352_s26   ;;  %s9109_s24 = smov %s6348_s25 }
 0x652   : > { %p14_p5 = scmp.ge.s32.totalorder %s17_s26, 4   ;;  %s9110_s25 = smov %s9112_s27 }
 0x654   :  { %16 = sbr.rel (!%p14_p5) target bundleno = 2 (0x2), region = 85 }

</bundles_post_ra>
